<compile_context>
chip_gen: v7x
topology: tpu7x:2x2x1
jax: 0.10.0
libtpu: 0.0.40
codegen_flags: <defaults>
</compile_context>

<pallas_src>
import numpy as np

import jax
import jax.numpy as jnp
from jax.experimental import pallas as pl

# ---------------- synthetic config (small) ----------------
IMAGE_SIZE = 16
PATCH_SIZE = 4
HIDDEN = 32
NUM_HEADS = 2
HEAD_DIM = HIDDEN // NUM_HEADS
MLP_DIM = 4 * HIDDEN
NUM_LAYERS = 2
FC_SIZE = 64
DOWNSAMPLE = 0.5
GRID_HW = IMAGE_SIZE // PATCH_SIZE                      # 4
NUM_PATCHES = GRID_HW ** 2                              # 16
SEQ = NUM_PATCHES + 1                                   # 17 (patches + CLS)
S_PAD = ((SEQ + 7) // 8) * 8                            # 24 (multiple of 8)
PATCH_DIM = 3 * PATCH_SIZE * PATCH_SIZE                 # 48
C4 = HIDDEN * int(1 / DOWNSAMPLE) ** 2                  # 128 (post shuffle)
NUM_IMAGE_TOKEN = int(NUM_PATCHES * DOWNSAMPLE ** 2)    # 4
HALF = GRID_HW // 2                                     # 2
VIT_EPS = 1e-6
MLP1_EPS = 1e-5
NEG_INF = -1e30
INV_SQRT2 = 0.7071067811865476


# ---------------- in-kernel helpers ----------------
def _ln(x, g, b, eps):
    mu = jnp.mean(x, axis=-1, keepdims=True)
    var = jnp.mean(jnp.square(x - mu), axis=-1, keepdims=True)
    return (x - mu) * jax.lax.rsqrt(var + eps) * g + b


def _erf(z):
    # Abramowitz & Stegun 7.1.26 (|err| <= 1.5e-7); avoids lax.erf lowering.
    az = jnp.abs(z)
    t = 1.0 / (1.0 + 0.3275911 * az)
    poly = t * (0.254829592 + t * (-0.284496736 + t * (1.421413741
               + t * (-1.453152027 + t * 1.061405429))))
    e = 1.0 - poly * jnp.exp(-az * az)
    return jnp.where(z < 0, -e, e)


def _gelu(x):
    # nn.GELU() default (erf based)
    return 0.5 * x * (1.0 + _erf(x * INV_SQRT2))


# ---------------- fused Pallas kernel ----------------
def fused_forward_kernel(act_ref, sel_ref, lw_ref, lv_ref, hw_ref, o_ref):
    B = act_ref.shape[0] // S_PAD
    BNT = B * NUM_IMAGE_TOKEN

    # ---- patch embedding: x = xp_pad @ w_embed + fused bias (all in vregs) ----
    w_embed = hw_ref[FC_SIZE:FC_SIZE + PATCH_DIM,
                     FC_SIZE:FC_SIZE + HIDDEN]                       # (48, 32)
    xp = act_ref[:, 0:PATCH_DIM]                                     # (B*S_PAD, 48)
    bias = act_ref[:, PATCH_DIM:PATCH_DIM + HIDDEN]                  # (B*S_PAD, 32)
    x = jnp.dot(xp, w_embed, preferred_element_type=jnp.float32) + bias

    # ---- key mask, built once and hoisted out of the layer loop ----
    col = jax.lax.broadcasted_iota(jnp.int32,
                                   (B * NUM_HEADS * S_PAD, S_PAD), 1)
    key_mask = jnp.where(col < SEQ, 0.0, NEG_INF)                    # (96, 24)

    # ---- encoder layers (pre-norm; dh^-0.5, ls1, ls2 folded into weights) ----
    for l in range(NUM_LAYERS):
        wqkv = lw_ref[l, :, 0:3 * HIDDEN]                            # (32, 96)
        wo = lw_ref[l, :, 3 * HIDDEN:4 * HIDDEN]                     # (32, 32)
        w1 = lw_ref[l, :, 4 * HIDDEN:4 * HIDDEN + MLP_DIM]           # (32, 128)
        w2t = lw_ref[l, :, 4 * HIDDEN + MLP_DIM:
                           4 * HIDDEN + 2 * MLP_DIM]                 # (32, 128)
        ln1g = lv_ref[l, 0:1, 0:HIDDEN]
        ln1b = lv_ref[l, 1:2, 0:HIDDEN]
        bqkv = lv_ref[l, 2:3, 0:3 * HIDDEN]
        bo = lv_ref[l, 3:4, 0:HIDDEN]
        ln2g = lv_ref[l, 4:5, 0:HIDDEN]
        ln2b = lv_ref[l, 5:6, 0:HIDDEN]
        b1 = lv_ref[l, 6:7, 0:MLP_DIM]
        b2 = lv_ref[l, 7:8, 0:HIDDEN]

        # -- attention --
        xn = _ln(x, ln1g, ln1b, VIT_EPS)
        qkv = jnp.dot(xn, wqkv, preferred_element_type=jnp.float32) + bqkv
        q = qkv[:, 0:HIDDEN]                 # dh^-0.5 folded into wq/bq
        k = qkv[:, HIDDEN:2 * HIDDEN]
        v = qkv[:, 2 * HIDDEN:3 * HIDDEN]

        # scores of every (image, head) stacked along the sublane axis
        s_blocks = []
        for b in range(B):                   # static loops: B=2, H=2
            r0 = b * S_PAD
            for h in range(NUM_HEADS):
                c0 = h * HEAD_DIM
                qh = q[r0:r0 + S_PAD, c0:c0 + HEAD_DIM]
                kh = k[r0:r0 + S_PAD, c0:c0 + HEAD_DIM]
                # q @ k^T without materializing the transpose
                s_blocks.append(jax.lax.dot_general(
                    qh, kh, (((1,), (1,)), ((), ())),
                    preferred_element_type=jnp.float32))             # (24, 24)
        s = jnp.concatenate(s_blocks, axis=0) + key_mask             # (96, 24)
        m = jnp.max(s, axis=-1, keepdims=True)
        e = jnp.exp(s - m)
        denom = jnp.sum(e, axis=-1, keepdims=True)
        p = e * pl.reciprocal(denom, approx=True)                    # softmax

        # per-(image, head) contexts, reassembled entirely in registers
        ctx_rows = []
        for b in range(B):
            r0 = b * S_PAD
            heads = []
            for h in range(NUM_HEADS):
                blk = (b * NUM_HEADS + h) * S_PAD
                ph = p[blk:blk + S_PAD, :]                           # (24, 24)
                vh = v[r0:r0 + S_PAD, h * HEAD_DIM:(h + 1) * HEAD_DIM]
                heads.append(jnp.dot(ph, vh,
                                     preferred_element_type=jnp.float32))
            ctx_rows.append(jnp.concatenate(heads, axis=-1))         # (24, 32)
        ctx = jnp.concatenate(ctx_rows, axis=0)                      # (48, 32)
        x = x + jnp.dot(ctx, wo, preferred_element_type=jnp.float32) + bo

        # -- MLP --
        xn2 = _ln(x, ln2g, ln2b, VIT_EPS)
        hmid = _gelu(jnp.dot(xn2, w1,
                             preferred_element_type=jnp.float32) + b1)
        # w2 stored transposed -> contract last dims (no in-kernel transpose)
        x = x + jax.lax.dot_general(hmid, w2t, (((1,), (1,)), ((), ())),
                                    preferred_element_type=jnp.float32) + b2

    # ---- drop CLS + pixel_shuffle(0.5, 'v2') as one-hot selection matmul ----
    y = jnp.dot(sel_ref[...], x, preferred_element_type=jnp.float32)  # (4*BNT, 32)
    ps = jnp.concatenate([y[q * BNT:(q + 1) * BNT, :] for q in range(4)],
                         axis=-1)                                     # (BNT, 128)

    # ---- mlp1: LayerNorm(C4) -> Linear(C4, FC) -> GELU -> Linear(FC, FC) ----
    m_w1 = hw_ref[:, 0:FC_SIZE]                                       # (128, 64)
    m_w2 = hw_ref[0:FC_SIZE, FC_SIZE:2 * FC_SIZE]                     # (64, 64)
    m_lng = lv_ref[NUM_LAYERS, 0:1, 0:C4]
    m_lnb = lv_ref[NUM_LAYERS, 1:2, 0:C4]
    m_b1 = lv_ref[NUM_LAYERS, 2:3, 0:FC_SIZE]
    m_b2 = lv_ref[NUM_LAYERS, 3:4, 0:FC_SIZE]

    psn = _ln(ps, m_lng, m_lnb, MLP1_EPS)
    h1 = _gelu(jnp.dot(psn, m_w1, preferred_element_type=jnp.float32) + m_b1)
    out = jnp.dot(h1, m_w2, preferred_element_type=jnp.float32) + m_b2

    # ---- single whole-array output store ----
    o_ref[...] = out                                                  # (BNT, 64)


# ---------------- wrapper ----------------
def _build_sel(batch):
    """One-hot selection matrix implementing drop-CLS + pixel_shuffle(0.5,'v2').

    Row q4*(B*NT) + b*NT + t is one-hot on the encoder row that supplies channel
    block q4 (lanes q4*HIDDEN:(q4+1)*HIDDEN) of output token t of image b.
    Mapping verified against torch's view/permute order (ps_version='v2').
    """
    sel = np.zeros((4 * batch * NUM_IMAGE_TOKEN, batch * S_PAD), np.float32)
    for q4 in range(4):
        for b in range(batch):
            for t in range(NUM_IMAGE_TOKEN):
                wi, hi = t // HALF, t % HALF
                src = b * S_PAD + (2 * wi + q4 // 2) * GRID_HW + 2 * hi + (q4 % 2)
                sel[q4 * batch * NUM_IMAGE_TOKEN
                    + b * NUM_IMAGE_TOKEN + t, src] = 1.0
    return jnp.asarray(sel)


def internvit_classifier_forward(pixel_values, fp):
    """extract_feature: backbone -> drop CLS -> pixel_shuffle -> mlp1."""
    B = pixel_values.shape[0]
    # NCHW -> (B, Np, 3*p*p); feature order (c, kh, kw) == Conv2d(k=p, s=p)
    x = pixel_values.reshape(B, 3, GRID_HW, PATCH_SIZE, GRID_HW, PATCH_SIZE)
    xp = jnp.transpose(x, (0, 2, 4, 1, 3, 5)).reshape(B, NUM_PATCHES, PATCH_DIM)
    # zero rows for the CLS slot (row 16) and the pad rows (17..23)
    xp_pad = jnp.pad(xp, ((0, 0), (0, S_PAD - NUM_PATCHES), (0, 0)))
    bias = jnp.broadcast_to(fp["bias_img"][None], (B, S_PAD, HIDDEN))
    act_in = jnp.concatenate([xp_pad, bias], axis=-1).reshape(
        B * S_PAD, PATCH_DIM + HIDDEN)
    sel = _build_sel(B)

    out = pl.pallas_call(
        fused_forward_kernel,
        out_shape=jax.ShapeDtypeStruct((B * NUM_IMAGE_TOKEN, FC_SIZE),
                                       jnp.float32),
    )(act_in, sel, fp["layer_w"], fp["vec_blob"], fp["head_w"])
    return out.reshape(B, NUM_IMAGE_TOKEN, FC_SIZE)


# ---------------- deterministic parameter init (PyTorch-like layout) ----------------
def init_params(key):
    keys = iter(jax.random.split(key, 64))

    def nrm(shape, scale=0.02):
        return scale * jax.random.normal(next(keys), shape, jnp.float32)

    p = {
        "patch_w": nrm((HIDDEN, 3, PATCH_SIZE, PATCH_SIZE)),  # Conv2d layout
        "patch_b": nrm((1, HIDDEN)),
        "cls": nrm((1, 1, HIDDEN)),
        "pos": nrm((1, SEQ, HIDDEN)),
        "layers": [],
    }
    for _ in range(NUM_LAYERS):
        p["layers"].append({
            "ln1_g": jnp.ones((1, HIDDEN), jnp.float32),
            "ln1_b": jnp.zeros((1, HIDDEN), jnp.float32),
            "wq": nrm((NUM_HEADS, HIDDEN, HEAD_DIM)),
            "bq": nrm((NUM_HEADS, HEAD_DIM)),
            "wk": nrm((NUM_HEADS, HIDDEN, HEAD_DIM)),
            "bk": nrm((NUM_HEADS, HEAD_DIM)),
            "wv": nrm((NUM_HEADS, HIDDEN, HEAD_DIM)),
            "bv": nrm((NUM_HEADS, HEAD_DIM)),
            "wo": nrm((NUM_HEADS, HEAD_DIM, HIDDEN)),
            "bo": nrm((1, HIDDEN)),
            "ls1": jnp.full((1, HIDDEN), 0.1, jnp.float32),
            "ln2_g": jnp.ones((1, HIDDEN), jnp.float32),
            "ln2_b": jnp.zeros((1, HIDDEN), jnp.float32),
            "w1": nrm((HIDDEN, MLP_DIM)),
            "b1": nrm((1, MLP_DIM)),
            "w2": nrm((MLP_DIM, HIDDEN)),
            "b2": nrm((1, HIDDEN)),
            "ls2": jnp.full((1, HIDDEN), 0.1, jnp.float32),
        })
    p["mlp1_ln_g"] = jnp.ones((1, C4), jnp.float32)
    p["mlp1_ln_b"] = jnp.zeros((1, C4), jnp.float32)
    p["mlp1_w1"] = nrm((C4, FC_SIZE))
    p["mlp1_b1"] = nrm((1, FC_SIZE))
    p["mlp1_w2"] = nrm((FC_SIZE, FC_SIZE))
    p["mlp1_b2"] = nrm((1, FC_SIZE))
    return p


# ---------------- one-time weight folding + packing into DMA blobs ----------------
def prepare_params(p):
    scale = float(HEAD_DIM) ** -0.5

    def heads_to_cols(w):           # (H, D, dh) -> (D, H*dh), head-major cols
        return jnp.transpose(w, (1, 0, 2)).reshape(HIDDEN, NUM_HEADS * HEAD_DIM)

    layer_w, vec_slices = [], []
    for lp in p["layers"]:
        wqkv = jnp.concatenate([heads_to_cols(lp["wq"]) * scale,
                                heads_to_cols(lp["wk"]),
                                heads_to_cols(lp["wv"])], axis=1)     # (32, 96)
        wo = lp["wo"].reshape(NUM_HEADS * HEAD_DIM, HIDDEN) * lp["ls1"]
        w2t = (lp["w2"] * lp["ls2"]).T                                # (32, 128)
        layer_w.append(jnp.concatenate([wqkv, wo, lp["w1"], w2t], axis=1))

        bqkv = jnp.concatenate([lp["bq"].reshape(1, -1) * scale,
                                lp["bk"].reshape(1, -1),
                                lp["bv"].reshape(1, -1)], axis=1)     # (1, 96)
        v = jnp.zeros((8, 128), jnp.float32)
        v = v.at[0, :HIDDEN].set(lp["ln1_g"][0]).at[1, :HIDDEN].set(lp["ln1_b"][0])
        v = v.at[2, :3 * HIDDEN].set(bqkv[0])
        v = v.at[3, :HIDDEN].set((lp["bo"] * lp["ls1"])[0])
        v = v.at[4, :HIDDEN].set(lp["ln2_g"][0]).at[5, :HIDDEN].set(lp["ln2_b"][0])
        v = v.at[6, :MLP_DIM].set(lp["b1"][0])
        v = v.at[7, :HIDDEN].set((lp["b2"] * lp["ls2"])[0])
        vec_slices.append(v)

    # extra vector slice (index NUM_LAYERS) for the mlp1 head
    vh = jnp.zeros((8, 128), jnp.float32)
    vh = vh.at[0, :C4].set(p["mlp1_ln_g"][0]).at[1, :C4].set(p["mlp1_ln_b"][0])
    vh = vh.at[2, :FC_SIZE].set(p["mlp1_b1"][0])
    vh = vh.at[3, :FC_SIZE].set(p["mlp1_b2"][0])
    vec_slices.append(vh)

    # patch-embed + mlp1 matmul weights packed into one (128, 128) blob
    head_w = jnp.zeros((C4, C4), jnp.float32)
    head_w = head_w.at[:, 0:FC_SIZE].set(p["mlp1_w1"])
    head_w = head_w.at[0:FC_SIZE, FC_SIZE:2 * FC_SIZE].set(p["mlp1_w2"])
    w_embed = p["patch_w"].reshape(HIDDEN, PATCH_DIM).T               # (48, 32)
    head_w = head_w.at[FC_SIZE:FC_SIZE + PATCH_DIM,
                       FC_SIZE:FC_SIZE + HIDDEN].set(w_embed)

    # per-image fused bias: rows 0..15 conv-bias+pos[1:], row 16 cls+pos[0], rest 0
    bias_img = jnp.zeros((S_PAD, HIDDEN), jnp.float32)
    bias_img = bias_img.at[0:NUM_PATCHES, :].set(p["patch_b"] + p["pos"][0, 1:, :])
    bias_img = bias_img.at[NUM_PATCHES, :].set(p["cls"][0, 0] + p["pos"][0, 0])

    return {
        "layer_w": jnp.stack(layer_w, axis=0),      # (L, 32, 384)
        "vec_blob": jnp.stack(vec_slices, axis=0),  # (L+1, 8, 128)
        "head_w": head_w,                           # (128, 128)
        "bias_img": bias_img,                       # (24, 32)
    }


if __name__ == "__main__":
    key = jax.random.PRNGKey(0)
    k_in, k_par = jax.random.split(key)
    B = 2
    pixel_values = jax.random.normal(k_in, (B, 3, IMAGE_SIZE, IMAGE_SIZE),
                                     jnp.float32)
    params = init_params(k_par)
    fused = prepare_params(params)                 # fold scales / pack blobs once

    fwd = jax.jit(internvit_classifier_forward)
    out = jax.block_until_ready(fwd(pixel_values, fused))
    assert out.shape == (B, NUM_IMAGE_TOKEN, FC_SIZE), out.shape
    assert out.dtype == jnp.float32
    assert bool(jnp.all(jnp.isfinite(out)))
    print("KERNEL_OK")
</pallas_src>

<mosaic_0001>
module attributes {stable_mosaic.version = 11 : i64} {
  func.func @fused_forward_kernel(%arg0: memref<48x80xf32, #tpu.memory_space<vmem>>, %arg1: memref<32x48xf32, #tpu.memory_space<vmem>>, %arg2: memref<2x32x384xf32, #tpu.memory_space<vmem>>, %arg3: memref<3x8x128xf32, #tpu.memory_space<vmem>>, %arg4: memref<128x128xf32, #tpu.memory_space<vmem>>, %arg5: memref<8x64xf32, #tpu.memory_space<vmem>>) attributes {dimension_semantics = [], scalar_prefetch = 0 : i64, scratch_operands = 0 : i64, tpu.core_type = #tpu.core_type<tc>} {
    %c64 = arith.constant 64 : index
    %c64_0 = arith.constant 64 : index
    %0 = vector.load %arg4[%c64, %c64_0] : memref<128x128xf32, #tpu.memory_space<vmem>>, vector<48x32xf32>
    %c0 = arith.constant 0 : index
    %c0_1 = arith.constant 0 : index
    %1 = vector.load %arg0[%c0, %c0_1] : memref<48x80xf32, #tpu.memory_space<vmem>>, vector<48x48xf32>
    %c0_2 = arith.constant 0 : index
    %c48 = arith.constant 48 : index
    %2 = vector.load %arg0[%c0_2, %c48] : memref<48x80xf32, #tpu.memory_space<vmem>>, vector<48x32xf32>
    %cst = arith.constant dense<0.000000e+00> : vector<48x32xf32>
    %3 = tpu.matmul %1, %0, %cst {dimension_numbers = #tpu.dot_dimension_numbers<[1], [0], [0], [1], [0, 0, 1, 1], [], []>} : vector<48x48xf32>, vector<48x32xf32>, vector<48x32xf32> -> vector<48x32xf32>
    %4 = arith.addf %3, %2 : vector<48x32xf32>
    %5 = tpu.iota {dimensions = array<i32: 1>} : vector<96x24xi32>
    %c17_i32 = arith.constant 17 : i32
    %6 = vector.broadcast %c17_i32 : i32 to vector<96x24xi32>
    %7 = arith.cmpi slt, %5, %6 : vector<96x24xi32>
    %cst_3 = arith.constant 0.000000e+00 : f32
    %cst_4 = arith.constant -1.000000e+30 : f32
    %8 = vector.broadcast %cst_3 : f32 to vector<96x24xf32>
    %9 = vector.broadcast %cst_4 : f32 to vector<96x24xf32>
    %10 = arith.select %7, %8, %9 : vector<96x24xi1>, vector<96x24xf32>
    %c0_5 = arith.constant 0 : index
    %c0_6 = arith.constant 0 : index
    %c0_7 = arith.constant 0 : index
    %11 = vector.load %arg2[%c0_5, %c0_6, %c0_7] : memref<2x32x384xf32, #tpu.memory_space<vmem>>, vector<1x32x96xf32>
    %12 = vector.shape_cast %11 : vector<1x32x96xf32> to vector<32x96xf32>
    %c0_8 = arith.constant 0 : index
    %c0_9 = arith.constant 0 : index
    %c96 = arith.constant 96 : index
    %13 = vector.load %arg2[%c0_8, %c0_9, %c96] : memref<2x32x384xf32, #tpu.memory_space<vmem>>, vector<1x32x32xf32>
    %14 = vector.shape_cast %13 : vector<1x32x32xf32> to vector<32x32xf32>
    %c0_10 = arith.constant 0 : index
    %c0_11 = arith.constant 0 : index
    %c128 = arith.constant 128 : index
    %15 = vector.load %arg2[%c0_10, %c0_11, %c128] : memref<2x32x384xf32, #tpu.memory_space<vmem>>, vector<1x32x128xf32>
    %16 = vector.shape_cast %15 : vector<1x32x128xf32> to vector<32x128xf32>
    %c0_12 = arith.constant 0 : index
    %c0_13 = arith.constant 0 : index
    %c256 = arith.constant 256 : index
    %17 = vector.load %arg2[%c0_12, %c0_13, %c256] : memref<2x32x384xf32, #tpu.memory_space<vmem>>, vector<1x32x128xf32>
    %18 = vector.shape_cast %17 : vector<1x32x128xf32> to vector<32x128xf32>
    %c0_14 = arith.constant 0 : index
    %c0_15 = arith.constant 0 : index
    %c0_16 = arith.constant 0 : index
    %19 = vector.load %arg3[%c0_14, %c0_15, %c0_16] : memref<3x8x128xf32, #tpu.memory_space<vmem>>, vector<1x1x32xf32>
    %20 = vector.shape_cast %19 : vector<1x1x32xf32> to vector<1x32xf32>
    %c0_17 = arith.constant 0 : index
    %c1 = arith.constant 1 : index
    %c0_18 = arith.constant 0 : index
    %21 = vector.load %arg3[%c0_17, %c1, %c0_18] : memref<3x8x128xf32, #tpu.memory_space<vmem>>, vector<1x1x32xf32>
    %22 = vector.shape_cast %21 : vector<1x1x32xf32> to vector<1x32xf32>
    %c0_19 = arith.constant 0 : index
    %c2 = arith.constant 2 : index
    %c0_20 = arith.constant 0 : index
    %23 = vector.load %arg3[%c0_19, %c2, %c0_20] : memref<3x8x128xf32, #tpu.memory_space<vmem>>, vector<1x1x96xf32>
    %24 = vector.shape_cast %23 : vector<1x1x96xf32> to vector<1x96xf32>
    %c0_21 = arith.constant 0 : index
    %c3 = arith.constant 3 : index
    %c0_22 = arith.constant 0 : index
    %25 = vector.load %arg3[%c0_21, %c3, %c0_22] : memref<3x8x128xf32, #tpu.memory_space<vmem>>, vector<1x1x32xf32>
    %26 = vector.shape_cast %25 : vector<1x1x32xf32> to vector<1x32xf32>
    %c0_23 = arith.constant 0 : index
    %c4 = arith.constant 4 : index
    %c0_24 = arith.constant 0 : index
    %27 = vector.load %arg3[%c0_23, %c4, %c0_24] : memref<3x8x128xf32, #tpu.memory_space<vmem>>, vector<1x1x32xf32>
    %28 = vector.shape_cast %27 : vector<1x1x32xf32> to vector<1x32xf32>
    %c0_25 = arith.constant 0 : index
    %c5 = arith.constant 5 : index
    %c0_26 = arith.constant 0 : index
    %29 = vector.load %arg3[%c0_25, %c5, %c0_26] : memref<3x8x128xf32, #tpu.memory_space<vmem>>, vector<1x1x32xf32>
    %30 = vector.shape_cast %29 : vector<1x1x32xf32> to vector<1x32xf32>
    %c0_27 = arith.constant 0 : index
    %c6 = arith.constant 6 : index
    %c0_28 = arith.constant 0 : index
    %31 = vector.load %arg3[%c0_27, %c6, %c0_28] : memref<3x8x128xf32, #tpu.memory_space<vmem>>, vector<1x1x128xf32>
    %32 = vector.shape_cast %31 : vector<1x1x128xf32> to vector<1x128xf32>
    %c0_29 = arith.constant 0 : index
    %c7 = arith.constant 7 : index
    %c0_30 = arith.constant 0 : index
    %33 = vector.load %arg3[%c0_29, %c7, %c0_30] : memref<3x8x128xf32, #tpu.memory_space<vmem>>, vector<1x1x32xf32>
    %34 = vector.shape_cast %33 : vector<1x1x32xf32> to vector<1x32xf32>
    %cst_31 = arith.constant dense<0.000000e+00> : vector<48xf32>
    %35 = vector.multi_reduction <add>, %4, %cst_31 [1] : vector<48x32xf32> to vector<48xf32>
    %36 = vector.shape_cast %35 : vector<48xf32> to vector<48x1xf32>
    %cst_32 = arith.constant 3.200000e+01 : f32
    %37 = vector.broadcast %cst_32 : f32 to vector<48x1xf32>
    %38 = arith.divf %36, %37 : vector<48x1xf32>
    %39 = vector.broadcast %38 : vector<48x1xf32> to vector<48x32xf32>
    %40 = arith.subf %4, %39 : vector<48x32xf32>
    %41 = arith.mulf %40, %40 : vector<48x32xf32>
    %cst_33 = arith.constant dense<0.000000e+00> : vector<48xf32>
    %42 = vector.multi_reduction <add>, %41, %cst_33 [1] : vector<48x32xf32> to vector<48xf32>
    %43 = vector.shape_cast %42 : vector<48xf32> to vector<48x1xf32>
    %cst_34 = arith.constant 3.200000e+01 : f32
    %44 = vector.broadcast %cst_34 : f32 to vector<48x1xf32>
    %45 = arith.divf %43, %44 : vector<48x1xf32>
    %46 = vector.broadcast %38 : vector<48x1xf32> to vector<48x32xf32>
    %47 = arith.subf %4, %46 : vector<48x32xf32>
    %cst_35 = arith.constant 9.99999997E-7 : f32
    %48 = vector.broadcast %cst_35 : f32 to vector<48x1xf32>
    %49 = arith.addf %45, %48 : vector<48x1xf32>
    %50 = math.rsqrt %49 : vector<48x1xf32>
    %51 = vector.broadcast %50 : vector<48x1xf32> to vector<48x32xf32>
    %52 = arith.mulf %47, %51 : vector<48x32xf32>
    %53 = vector.broadcast %20 : vector<1x32xf32> to vector<48x32xf32>
    %54 = arith.mulf %52, %53 : vector<48x32xf32>
    %55 = vector.broadcast %22 : vector<1x32xf32> to vector<48x32xf32>
    %56 = arith.addf %54, %55 : vector<48x32xf32>
    %cst_36 = arith.constant dense<0.000000e+00> : vector<48x96xf32>
    %57 = tpu.matmul %56, %12, %cst_36 {dimension_numbers = #tpu.dot_dimension_numbers<[1], [0], [0], [1], [0, 0, 1, 1], [], []>} : vector<48x32xf32>, vector<32x96xf32>, vector<48x96xf32> -> vector<48x96xf32>
    %58 = vector.broadcast %24 : vector<1x96xf32> to vector<48x96xf32>
    %59 = arith.addf %57, %58 : vector<48x96xf32>
    %60 = vector.extract_strided_slice %59 {offsets = [0, 0], sizes = [48, 32], strides = [1, 1]} : vector<48x96xf32> to vector<48x32xf32>
    %61 = vector.extract_strided_slice %59 {offsets = [0, 32], sizes = [48, 32], strides = [1, 1]} : vector<48x96xf32> to vector<48x32xf32>
    %62 = vector.extract_strided_slice %59 {offsets = [0, 64], sizes = [48, 32], strides = [1, 1]} : vector<48x96xf32> to vector<48x32xf32>
    %63 = vector.extract_strided_slice %60 {offsets = [0, 0], sizes = [24, 16], strides = [1, 1]} : vector<48x32xf32> to vector<24x16xf32>
    %64 = vector.extract_strided_slice %61 {offsets = [0, 0], sizes = [24, 16], strides = [1, 1]} : vector<48x32xf32> to vector<24x16xf32>
    %cst_37 = arith.constant dense<0.000000e+00> : vector<24x24xf32>
    %65 = tpu.matmul %63, %64, %cst_37 {dimension_numbers = #tpu.dot_dimension_numbers<[1], [1], [0], [0], [0, 0, 1, 0], [], []>} : vector<24x16xf32>, vector<24x16xf32>, vector<24x24xf32> -> vector<24x24xf32>
    %66 = vector.extract_strided_slice %60 {offsets = [0, 16], sizes = [24, 16], strides = [1, 1]} : vector<48x32xf32> to vector<24x16xf32>
    %67 = vector.extract_strided_slice %61 {offsets = [0, 16], sizes = [24, 16], strides = [1, 1]} : vector<48x32xf32> to vector<24x16xf32>
    %cst_38 = arith.constant dense<0.000000e+00> : vector<24x24xf32>
    %68 = tpu.matmul %66, %67, %cst_38 {dimension_numbers = #tpu.dot_dimension_numbers<[1], [1], [0], [0], [0, 0, 1, 0], [], []>} : vector<24x16xf32>, vector<24x16xf32>, vector<24x24xf32> -> vector<24x24xf32>
    %69 = vector.extract_strided_slice %60 {offsets = [24, 0], sizes = [24, 16], strides = [1, 1]} : vector<48x32xf32> to vector<24x16xf32>
    %70 = vector.extract_strided_slice %61 {offsets = [24, 0], sizes = [24, 16], strides = [1, 1]} : vector<48x32xf32> to vector<24x16xf32>
    %cst_39 = arith.constant dense<0.000000e+00> : vector<24x24xf32>
    %71 = tpu.matmul %69, %70, %cst_39 {dimension_numbers = #tpu.dot_dimension_numbers<[1], [1], [0], [0], [0, 0, 1, 0], [], []>} : vector<24x16xf32>, vector<24x16xf32>, vector<24x24xf32> -> vector<24x24xf32>
    %72 = vector.extract_strided_slice %60 {offsets = [24, 16], sizes = [24, 16], strides = [1, 1]} : vector<48x32xf32> to vector<24x16xf32>
    %73 = vector.extract_strided_slice %61 {offsets = [24, 16], sizes = [24, 16], strides = [1, 1]} : vector<48x32xf32> to vector<24x16xf32>
    %cst_40 = arith.constant dense<0.000000e+00> : vector<24x24xf32>
    %74 = tpu.matmul %72, %73, %cst_40 {dimension_numbers = #tpu.dot_dimension_numbers<[1], [1], [0], [0], [0, 0, 1, 0], [], []>} : vector<24x16xf32>, vector<24x16xf32>, vector<24x24xf32> -> vector<24x24xf32>
    %75 = tpu.concatenate %65, %68, %71, %74 in 0 : vector<24x24xf32>, vector<24x24xf32>, vector<24x24xf32>, vector<24x24xf32> -> vector<96x24xf32>
    %76 = arith.addf %75, %10 : vector<96x24xf32>
    %cst_41 = arith.constant dense<0xFF800000> : vector<96xf32>
    %77 = vector.multi_reduction <maximumf>, %76, %cst_41 [1] : vector<96x24xf32> to vector<96xf32>
    %78 = vector.shape_cast %77 : vector<96xf32> to vector<96x1xf32>
    %79 = vector.broadcast %78 : vector<96x1xf32> to vector<96x24xf32>
    %80 = arith.subf %76, %79 : vector<96x24xf32>
    %81 = math.exp %80 : vector<96x24xf32>
    %cst_42 = arith.constant dense<0.000000e+00> : vector<96xf32>
    %82 = vector.multi_reduction <add>, %81, %cst_42 [1] : vector<96x24xf32> to vector<96xf32>
    %83 = vector.shape_cast %82 : vector<96xf32> to vector<96x1xf32>
    %84 = tpu.reciprocal %83 {approx = true} : vector<96x1xf32> -> vector<96x1xf32>
    %85 = vector.broadcast %84 : vector<96x1xf32> to vector<96x24xf32>
    %86 = arith.mulf %81, %85 : vector<96x24xf32>
    %87 = vector.extract_strided_slice %86 {offsets = [0, 0], sizes = [24, 24], strides = [1, 1]} : vector<96x24xf32> to vector<24x24xf32>
    %88 = vector.extract_strided_slice %62 {offsets = [0, 0], sizes = [24, 16], strides = [1, 1]} : vector<48x32xf32> to vector<24x16xf32>
    %cst_43 = arith.constant dense<0.000000e+00> : vector<24x16xf32>
    %89 = tpu.matmul %87, %88, %cst_43 {dimension_numbers = #tpu.dot_dimension_numbers<[1], [0], [0], [1], [0, 0, 1, 1], [], []>} : vector<24x24xf32>, vector<24x16xf32>, vector<24x16xf32> -> vector<24x16xf32>
    %90 = vector.extract_strided_slice %86 {offsets = [24, 0], sizes = [24, 24], strides = [1, 1]} : vector<96x24xf32> to vector<24x24xf32>
    %91 = vector.extract_strided_slice %62 {offsets = [0, 16], sizes = [24, 16], strides = [1, 1]} : vector<48x32xf32> to vector<24x16xf32>
    %cst_44 = arith.constant dense<0.000000e+00> : vector<24x16xf32>
    %92 = tpu.matmul %90, %91, %cst_44 {dimension_numbers = #tpu.dot_dimension_numbers<[1], [0], [0], [1], [0, 0, 1, 1], [], []>} : vector<24x24xf32>, vector<24x16xf32>, vector<24x16xf32> -> vector<24x16xf32>
    %93 = tpu.concatenate %89, %92 in 1 : vector<24x16xf32>, vector<24x16xf32> -> vector<24x32xf32>
    %94 = vector.extract_strided_slice %86 {offsets = [48, 0], sizes = [24, 24], strides = [1, 1]} : vector<96x24xf32> to vector<24x24xf32>
    %95 = vector.extract_strided_slice %62 {offsets = [24, 0], sizes = [24, 16], strides = [1, 1]} : vector<48x32xf32> to vector<24x16xf32>
    %cst_45 = arith.constant dense<0.000000e+00> : vector<24x16xf32>
    %96 = tpu.matmul %94, %95, %cst_45 {dimension_numbers = #tpu.dot_dimension_numbers<[1], [0], [0], [1], [0, 0, 1, 1], [], []>} : vector<24x24xf32>, vector<24x16xf32>, vector<24x16xf32> -> vector<24x16xf32>
    %97 = vector.extract_strided_slice %86 {offsets = [72, 0], sizes = [24, 24], strides = [1, 1]} : vector<96x24xf32> to vector<24x24xf32>
    %98 = vector.extract_strided_slice %62 {offsets = [24, 16], sizes = [24, 16], strides = [1, 1]} : vector<48x32xf32> to vector<24x16xf32>
    %cst_46 = arith.constant dense<0.000000e+00> : vector<24x16xf32>
    %99 = tpu.matmul %97, %98, %cst_46 {dimension_numbers = #tpu.dot_dimension_numbers<[1], [0], [0], [1], [0, 0, 1, 1], [], []>} : vector<24x24xf32>, vector<24x16xf32>, vector<24x16xf32> -> vector<24x16xf32>
    %100 = tpu.concatenate %96, %99 in 1 : vector<24x16xf32>, vector<24x16xf32> -> vector<24x32xf32>
    %101 = tpu.concatenate %93, %100 in 0 : vector<24x32xf32>, vector<24x32xf32> -> vector<48x32xf32>
    %cst_47 = arith.constant dense<0.000000e+00> : vector<48x32xf32>
    %102 = tpu.matmul %101, %14, %cst_47 {dimension_numbers = #tpu.dot_dimension_numbers<[1], [0], [0], [1], [0, 0, 1, 1], [], []>} : vector<48x32xf32>, vector<32x32xf32>, vector<48x32xf32> -> vector<48x32xf32>
    %103 = arith.addf %4, %102 : vector<48x32xf32>
    %104 = vector.broadcast %26 : vector<1x32xf32> to vector<48x32xf32>
    %105 = arith.addf %103, %104 : vector<48x32xf32>
    %cst_48 = arith.constant dense<0.000000e+00> : vector<48xf32>
    %106 = vector.multi_reduction <add>, %105, %cst_48 [1] : vector<48x32xf32> to vector<48xf32>
    %107 = vector.shape_cast %106 : vector<48xf32> to vector<48x1xf32>
    %cst_49 = arith.constant 3.200000e+01 : f32
    %108 = vector.broadcast %cst_49 : f32 to vector<48x1xf32>
    %109 = arith.divf %107, %108 : vector<48x1xf32>
    %110 = vector.broadcast %109 : vector<48x1xf32> to vector<48x32xf32>
    %111 = arith.subf %105, %110 : vector<48x32xf32>
    %112 = arith.mulf %111, %111 : vector<48x32xf32>
    %cst_50 = arith.constant dense<0.000000e+00> : vector<48xf32>
    %113 = vector.multi_reduction <add>, %112, %cst_50 [1] : vector<48x32xf32> to vector<48xf32>
    %114 = vector.shape_cast %113 : vector<48xf32> to vector<48x1xf32>
    %cst_51 = arith.constant 3.200000e+01 : f32
    %115 = vector.broadcast %cst_51 : f32 to vector<48x1xf32>
    %116 = arith.divf %114, %115 : vector<48x1xf32>
    %117 = vector.broadcast %109 : vector<48x1xf32> to vector<48x32xf32>
    %118 = arith.subf %105, %117 : vector<48x32xf32>
    %cst_52 = arith.constant 9.99999997E-7 : f32
    %119 = vector.broadcast %cst_52 : f32 to vector<48x1xf32>
    %120 = arith.addf %116, %119 : vector<48x1xf32>
    %121 = math.rsqrt %120 : vector<48x1xf32>
    %122 = vector.broadcast %121 : vector<48x1xf32> to vector<48x32xf32>
    %123 = arith.mulf %118, %122 : vector<48x32xf32>
    %124 = vector.broadcast %28 : vector<1x32xf32> to vector<48x32xf32>
    %125 = arith.mulf %123, %124 : vector<48x32xf32>
    %126 = vector.broadcast %30 : vector<1x32xf32> to vector<48x32xf32>
    %127 = arith.addf %125, %126 : vector<48x32xf32>
    %cst_53 = arith.constant dense<0.000000e+00> : vector<48x128xf32>
    %128 = tpu.matmul %127, %16, %cst_53 {dimension_numbers = #tpu.dot_dimension_numbers<[1], [0], [0], [1], [0, 0, 1, 1], [], []>} : vector<48x32xf32>, vector<32x128xf32>, vector<48x128xf32> -> vector<48x128xf32>
    %129 = vector.broadcast %32 : vector<1x128xf32> to vector<48x128xf32>
    %130 = arith.addf %128, %129 : vector<48x128xf32>
    %cst_54 = arith.constant 5.000000e-01 : f32
    %131 = vector.broadcast %cst_54 : f32 to vector<48x128xf32>
    %132 = arith.mulf %131, %130 : vector<48x128xf32>
    %cst_55 = arith.constant 0.707106769 : f32
    %133 = vector.broadcast %cst_55 : f32 to vector<48x128xf32>
    %134 = arith.mulf %130, %133 : vector<48x128xf32>
    %135 = math.absf %134 : vector<48x128xf32>
    %cst_56 = arith.constant 0.327591091 : f32
    %136 = vector.broadcast %cst_56 : f32 to vector<48x128xf32>
    %137 = arith.mulf %136, %135 : vector<48x128xf32>
    %cst_57 = arith.constant 1.000000e+00 : f32
    %138 = vector.broadcast %cst_57 : f32 to vector<48x128xf32>
    %139 = arith.addf %138, %137 : vector<48x128xf32>
    %cst_58 = arith.constant 1.000000e+00 : f32
    %140 = vector.broadcast %cst_58 : f32 to vector<48x128xf32>
    %141 = arith.divf %140, %139 : vector<48x128xf32>
    %cst_59 = arith.constant 1.06140542 : f32
    %142 = vector.broadcast %cst_59 : f32 to vector<48x128xf32>
    %143 = arith.mulf %141, %142 : vector<48x128xf32>
    %cst_60 = arith.constant -1.45315206 : f32
    %144 = vector.broadcast %cst_60 : f32 to vector<48x128xf32>
    %145 = arith.addf %144, %143 : vector<48x128xf32>
    %146 = arith.mulf %141, %145 : vector<48x128xf32>
    %cst_61 = arith.constant 1.42141378 : f32
    %147 = vector.broadcast %cst_61 : f32 to vector<48x128xf32>
    %148 = arith.addf %147, %146 : vector<48x128xf32>
    %149 = arith.mulf %141, %148 : vector<48x128xf32>
    %cst_62 = arith.constant -0.284496725 : f32
    %150 = vector.broadcast %cst_62 : f32 to vector<48x128xf32>
    %151 = arith.addf %150, %149 : vector<48x128xf32>
    %152 = arith.mulf %141, %151 : vector<48x128xf32>
    %cst_63 = arith.constant 0.254829586 : f32
    %153 = vector.broadcast %cst_63 : f32 to vector<48x128xf32>
    %154 = arith.addf %153, %152 : vector<48x128xf32>
    %155 = arith.mulf %141, %154 : vector<48x128xf32>
    %cst_64 = arith.constant 0.000000e+00 : f32
    %156 = vector.broadcast %cst_64 : f32 to vector<48x128xf32>
    %157 = arith.subf %156, %135 : vector<48x128xf32>
    %158 = arith.mulf %157, %135 : vector<48x128xf32>
    %159 = math.exp %158 : vector<48x128xf32>
    %160 = arith.mulf %155, %159 : vector<48x128xf32>
    %cst_65 = arith.constant 1.000000e+00 : f32
    %161 = vector.broadcast %cst_65 : f32 to vector<48x128xf32>
    %162 = arith.subf %161, %160 : vector<48x128xf32>
    %cst_66 = arith.constant 0.000000e+00 : f32
    %163 = vector.broadcast %cst_66 : f32 to vector<48x128xf32>
    %164 = arith.cmpf olt, %134, %163 : vector<48x128xf32>
    %cst_67 = arith.constant 0.000000e+00 : f32
    %165 = vector.broadcast %cst_67 : f32 to vector<48x128xf32>
    %166 = arith.subf %165, %162 : vector<48x128xf32>
    %167 = arith.select %164, %166, %162 : vector<48x128xi1>, vector<48x128xf32>
    %cst_68 = arith.constant 1.000000e+00 : f32
    %168 = vector.broadcast %cst_68 : f32 to vector<48x128xf32>
    %169 = arith.addf %168, %167 : vector<48x128xf32>
    %170 = arith.mulf %132, %169 : vector<48x128xf32>
    %cst_69 = arith.constant dense<0.000000e+00> : vector<48x32xf32>
    %171 = tpu.matmul %170, %18, %cst_69 {dimension_numbers = #tpu.dot_dimension_numbers<[1], [1], [0], [0], [0, 0, 1, 0], [], []>} : vector<48x128xf32>, vector<32x128xf32>, vector<48x32xf32> -> vector<48x32xf32>
    %172 = arith.addf %105, %171 : vector<48x32xf32>
    %173 = vector.broadcast %34 : vector<1x32xf32> to vector<48x32xf32>
    %174 = arith.addf %172, %173 : vector<48x32xf32>
    %c1_70 = arith.constant 1 : index
    %c0_71 = arith.constant 0 : index
    %c0_72 = arith.constant 0 : index
    %175 = vector.load %arg2[%c1_70, %c0_71, %c0_72] : memref<2x32x384xf32, #tpu.memory_space<vmem>>, vector<1x32x96xf32>
    %176 = vector.shape_cast %175 : vector<1x32x96xf32> to vector<32x96xf32>
    %c1_73 = arith.constant 1 : index
    %c0_74 = arith.constant 0 : index
    %c96_75 = arith.constant 96 : index
    %177 = vector.load %arg2[%c1_73, %c0_74, %c96_75] : memref<2x32x384xf32, #tpu.memory_space<vmem>>, vector<1x32x32xf32>
    %178 = vector.shape_cast %177 : vector<1x32x32xf32> to vector<32x32xf32>
    %c1_76 = arith.constant 1 : index
    %c0_77 = arith.constant 0 : index
    %c128_78 = arith.constant 128 : index
    %179 = vector.load %arg2[%c1_76, %c0_77, %c128_78] : memref<2x32x384xf32, #tpu.memory_space<vmem>>, vector<1x32x128xf32>
    %180 = vector.shape_cast %179 : vector<1x32x128xf32> to vector<32x128xf32>
    %c1_79 = arith.constant 1 : index
    %c0_80 = arith.constant 0 : index
    %c256_81 = arith.constant 256 : index
    %181 = vector.load %arg2[%c1_79, %c0_80, %c256_81] : memref<2x32x384xf32, #tpu.memory_space<vmem>>, vector<1x32x128xf32>
    %182 = vector.shape_cast %181 : vector<1x32x128xf32> to vector<32x128xf32>
    %c1_82 = arith.constant 1 : index
    %c0_83 = arith.constant 0 : index
    %c0_84 = arith.constant 0 : index
    %183 = vector.load %arg3[%c1_82, %c0_83, %c0_84] : memref<3x8x128xf32, #tpu.memory_space<vmem>>, vector<1x1x32xf32>
    %184 = vector.shape_cast %183 : vector<1x1x32xf32> to vector<1x32xf32>
    %c1_85 = arith.constant 1 : index
    %c1_86 = arith.constant 1 : index
    %c0_87 = arith.constant 0 : index
    %185 = vector.load %arg3[%c1_85, %c1_86, %c0_87] : memref<3x8x128xf32, #tpu.memory_space<vmem>>, vector<1x1x32xf32>
    %186 = vector.shape_cast %185 : vector<1x1x32xf32> to vector<1x32xf32>
    %c1_88 = arith.constant 1 : index
    %c2_89 = arith.constant 2 : index
    %c0_90 = arith.constant 0 : index
    %187 = vector.load %arg3[%c1_88, %c2_89, %c0_90] : memref<3x8x128xf32, #tpu.memory_space<vmem>>, vector<1x1x96xf32>
    %188 = vector.shape_cast %187 : vector<1x1x96xf32> to vector<1x96xf32>
    %c1_91 = arith.constant 1 : index
    %c3_92 = arith.constant 3 : index
    %c0_93 = arith.constant 0 : index
    %189 = vector.load %arg3[%c1_91, %c3_92, %c0_93] : memref<3x8x128xf32, #tpu.memory_space<vmem>>, vector<1x1x32xf32>
    %190 = vector.shape_cast %189 : vector<1x1x32xf32> to vector<1x32xf32>
    %c1_94 = arith.constant 1 : index
    %c4_95 = arith.constant 4 : index
    %c0_96 = arith.constant 0 : index
    %191 = vector.load %arg3[%c1_94, %c4_95, %c0_96] : memref<3x8x128xf32, #tpu.memory_space<vmem>>, vector<1x1x32xf32>
    %192 = vector.shape_cast %191 : vector<1x1x32xf32> to vector<1x32xf32>
    %c1_97 = arith.constant 1 : index
    %c5_98 = arith.constant 5 : index
    %c0_99 = arith.constant 0 : index
    %193 = vector.load %arg3[%c1_97, %c5_98, %c0_99] : memref<3x8x128xf32, #tpu.memory_space<vmem>>, vector<1x1x32xf32>
    %194 = vector.shape_cast %193 : vector<1x1x32xf32> to vector<1x32xf32>
    %c1_100 = arith.constant 1 : index
    %c6_101 = arith.constant 6 : index
    %c0_102 = arith.constant 0 : index
    %195 = vector.load %arg3[%c1_100, %c6_101, %c0_102] : memref<3x8x128xf32, #tpu.memory_space<vmem>>, vector<1x1x128xf32>
    %196 = vector.shape_cast %195 : vector<1x1x128xf32> to vector<1x128xf32>
    %c1_103 = arith.constant 1 : index
    %c7_104 = arith.constant 7 : index
    %c0_105 = arith.constant 0 : index
    %197 = vector.load %arg3[%c1_103, %c7_104, %c0_105] : memref<3x8x128xf32, #tpu.memory_space<vmem>>, vector<1x1x32xf32>
    %198 = vector.shape_cast %197 : vector<1x1x32xf32> to vector<1x32xf32>
    %cst_106 = arith.constant dense<0.000000e+00> : vector<48xf32>
    %199 = vector.multi_reduction <add>, %174, %cst_106 [1] : vector<48x32xf32> to vector<48xf32>
    %200 = vector.shape_cast %199 : vector<48xf32> to vector<48x1xf32>
    %cst_107 = arith.constant 3.200000e+01 : f32
    %201 = vector.broadcast %cst_107 : f32 to vector<48x1xf32>
    %202 = arith.divf %200, %201 : vector<48x1xf32>
    %203 = vector.broadcast %202 : vector<48x1xf32> to vector<48x32xf32>
    %204 = arith.subf %174, %203 : vector<48x32xf32>
    %205 = arith.mulf %204, %204 : vector<48x32xf32>
    %cst_108 = arith.constant dense<0.000000e+00> : vector<48xf32>
    %206 = vector.multi_reduction <add>, %205, %cst_108 [1] : vector<48x32xf32> to vector<48xf32>
    %207 = vector.shape_cast %206 : vector<48xf32> to vector<48x1xf32>
    %cst_109 = arith.constant 3.200000e+01 : f32
    %208 = vector.broadcast %cst_109 : f32 to vector<48x1xf32>
    %209 = arith.divf %207, %208 : vector<48x1xf32>
    %210 = vector.broadcast %202 : vector<48x1xf32> to vector<48x32xf32>
    %211 = arith.subf %174, %210 : vector<48x32xf32>
    %cst_110 = arith.constant 9.99999997E-7 : f32
    %212 = vector.broadcast %cst_110 : f32 to vector<48x1xf32>
    %213 = arith.addf %209, %212 : vector<48x1xf32>
    %214 = math.rsqrt %213 : vector<48x1xf32>
    %215 = vector.broadcast %214 : vector<48x1xf32> to vector<48x32xf32>
    %216 = arith.mulf %211, %215 : vector<48x32xf32>
    %217 = vector.broadcast %184 : vector<1x32xf32> to vector<48x32xf32>
    %218 = arith.mulf %216, %217 : vector<48x32xf32>
    %219 = vector.broadcast %186 : vector<1x32xf32> to vector<48x32xf32>
    %220 = arith.addf %218, %219 : vector<48x32xf32>
    %cst_111 = arith.constant dense<0.000000e+00> : vector<48x96xf32>
    %221 = tpu.matmul %220, %176, %cst_111 {dimension_numbers = #tpu.dot_dimension_numbers<[1], [0], [0], [1], [0, 0, 1, 1], [], []>} : vector<48x32xf32>, vector<32x96xf32>, vector<48x96xf32> -> vector<48x96xf32>
    %222 = vector.broadcast %188 : vector<1x96xf32> to vector<48x96xf32>
    %223 = arith.addf %221, %222 : vector<48x96xf32>
    %224 = vector.extract_strided_slice %223 {offsets = [0, 0], sizes = [48, 32], strides = [1, 1]} : vector<48x96xf32> to vector<48x32xf32>
    %225 = vector.extract_strided_slice %223 {offsets = [0, 32], sizes = [48, 32], strides = [1, 1]} : vector<48x96xf32> to vector<48x32xf32>
    %226 = vector.extract_strided_slice %223 {offsets = [0, 64], sizes = [48, 32], strides = [1, 1]} : vector<48x96xf32> to vector<48x32xf32>
    %227 = vector.extract_strided_slice %224 {offsets = [0, 0], sizes = [24, 16], strides = [1, 1]} : vector<48x32xf32> to vector<24x16xf32>
    %228 = vector.extract_strided_slice %225 {offsets = [0, 0], sizes = [24, 16], strides = [1, 1]} : vector<48x32xf32> to vector<24x16xf32>
    %cst_112 = arith.constant dense<0.000000e+00> : vector<24x24xf32>
    %229 = tpu.matmul %227, %228, %cst_112 {dimension_numbers = #tpu.dot_dimension_numbers<[1], [1], [0], [0], [0, 0, 1, 0], [], []>} : vector<24x16xf32>, vector<24x16xf32>, vector<24x24xf32> -> vector<24x24xf32>
    %230 = vector.extract_strided_slice %224 {offsets = [0, 16], sizes = [24, 16], strides = [1, 1]} : vector<48x32xf32> to vector<24x16xf32>
    %231 = vector.extract_strided_slice %225 {offsets = [0, 16], sizes = [24, 16], strides = [1, 1]} : vector<48x32xf32> to vector<24x16xf32>
    %cst_113 = arith.constant dense<0.000000e+00> : vector<24x24xf32>
    %232 = tpu.matmul %230, %231, %cst_113 {dimension_numbers = #tpu.dot_dimension_numbers<[1], [1], [0], [0], [0, 0, 1, 0], [], []>} : vector<24x16xf32>, vector<24x16xf32>, vector<24x24xf32> -> vector<24x24xf32>
    %233 = vector.extract_strided_slice %224 {offsets = [24, 0], sizes = [24, 16], strides = [1, 1]} : vector<48x32xf32> to vector<24x16xf32>
    %234 = vector.extract_strided_slice %225 {offsets = [24, 0], sizes = [24, 16], strides = [1, 1]} : vector<48x32xf32> to vector<24x16xf32>
    %cst_114 = arith.constant dense<0.000000e+00> : vector<24x24xf32>
    %235 = tpu.matmul %233, %234, %cst_114 {dimension_numbers = #tpu.dot_dimension_numbers<[1], [1], [0], [0], [0, 0, 1, 0], [], []>} : vector<24x16xf32>, vector<24x16xf32>, vector<24x24xf32> -> vector<24x24xf32>
    %236 = vector.extract_strided_slice %224 {offsets = [24, 16], sizes = [24, 16], strides = [1, 1]} : vector<48x32xf32> to vector<24x16xf32>
    %237 = vector.extract_strided_slice %225 {offsets = [24, 16], sizes = [24, 16], strides = [1, 1]} : vector<48x32xf32> to vector<24x16xf32>
    %cst_115 = arith.constant dense<0.000000e+00> : vector<24x24xf32>
    %238 = tpu.matmul %236, %237, %cst_115 {dimension_numbers = #tpu.dot_dimension_numbers<[1], [1], [0], [0], [0, 0, 1, 0], [], []>} : vector<24x16xf32>, vector<24x16xf32>, vector<24x24xf32> -> vector<24x24xf32>
    %239 = tpu.concatenate %229, %232, %235, %238 in 0 : vector<24x24xf32>, vector<24x24xf32>, vector<24x24xf32>, vector<24x24xf32> -> vector<96x24xf32>
    %240 = arith.addf %239, %10 : vector<96x24xf32>
    %cst_116 = arith.constant dense<0xFF800000> : vector<96xf32>
    %241 = vector.multi_reduction <maximumf>, %240, %cst_116 [1] : vector<96x24xf32> to vector<96xf32>
    %242 = vector.shape_cast %241 : vector<96xf32> to vector<96x1xf32>
    %243 = vector.broadcast %242 : vector<96x1xf32> to vector<96x24xf32>
    %244 = arith.subf %240, %243 : vector<96x24xf32>
    %245 = math.exp %244 : vector<96x24xf32>
    %cst_117 = arith.constant dense<0.000000e+00> : vector<96xf32>
    %246 = vector.multi_reduction <add>, %245, %cst_117 [1] : vector<96x24xf32> to vector<96xf32>
    %247 = vector.shape_cast %246 : vector<96xf32> to vector<96x1xf32>
    %248 = tpu.reciprocal %247 {approx = true} : vector<96x1xf32> -> vector<96x1xf32>
    %249 = vector.broadcast %248 : vector<96x1xf32> to vector<96x24xf32>
    %250 = arith.mulf %245, %249 : vector<96x24xf32>
    %251 = vector.extract_strided_slice %250 {offsets = [0, 0], sizes = [24, 24], strides = [1, 1]} : vector<96x24xf32> to vector<24x24xf32>
    %252 = vector.extract_strided_slice %226 {offsets = [0, 0], sizes = [24, 16], strides = [1, 1]} : vector<48x32xf32> to vector<24x16xf32>
    %cst_118 = arith.constant dense<0.000000e+00> : vector<24x16xf32>
    %253 = tpu.matmul %251, %252, %cst_118 {dimension_numbers = #tpu.dot_dimension_numbers<[1], [0], [0], [1], [0, 0, 1, 1], [], []>} : vector<24x24xf32>, vector<24x16xf32>, vector<24x16xf32> -> vector<24x16xf32>
    %254 = vector.extract_strided_slice %250 {offsets = [24, 0], sizes = [24, 24], strides = [1, 1]} : vector<96x24xf32> to vector<24x24xf32>
    %255 = vector.extract_strided_slice %226 {offsets = [0, 16], sizes = [24, 16], strides = [1, 1]} : vector<48x32xf32> to vector<24x16xf32>
    %cst_119 = arith.constant dense<0.000000e+00> : vector<24x16xf32>
    %256 = tpu.matmul %254, %255, %cst_119 {dimension_numbers = #tpu.dot_dimension_numbers<[1], [0], [0], [1], [0, 0, 1, 1], [], []>} : vector<24x24xf32>, vector<24x16xf32>, vector<24x16xf32> -> vector<24x16xf32>
    %257 = tpu.concatenate %253, %256 in 1 : vector<24x16xf32>, vector<24x16xf32> -> vector<24x32xf32>
    %258 = vector.extract_strided_slice %250 {offsets = [48, 0], sizes = [24, 24], strides = [1, 1]} : vector<96x24xf32> to vector<24x24xf32>
    %259 = vector.extract_strided_slice %226 {offsets = [24, 0], sizes = [24, 16], strides = [1, 1]} : vector<48x32xf32> to vector<24x16xf32>
    %cst_120 = arith.constant dense<0.000000e+00> : vector<24x16xf32>
    %260 = tpu.matmul %258, %259, %cst_120 {dimension_numbers = #tpu.dot_dimension_numbers<[1], [0], [0], [1], [0, 0, 1, 1], [], []>} : vector<24x24xf32>, vector<24x16xf32>, vector<24x16xf32> -> vector<24x16xf32>
    %261 = vector.extract_strided_slice %250 {offsets = [72, 0], sizes = [24, 24], strides = [1, 1]} : vector<96x24xf32> to vector<24x24xf32>
    %262 = vector.extract_strided_slice %226 {offsets = [24, 16], sizes = [24, 16], strides = [1, 1]} : vector<48x32xf32> to vector<24x16xf32>
    %cst_121 = arith.constant dense<0.000000e+00> : vector<24x16xf32>
    %263 = tpu.matmul %261, %262, %cst_121 {dimension_numbers = #tpu.dot_dimension_numbers<[1], [0], [0], [1], [0, 0, 1, 1], [], []>} : vector<24x24xf32>, vector<24x16xf32>, vector<24x16xf32> -> vector<24x16xf32>
    %264 = tpu.concatenate %260, %263 in 1 : vector<24x16xf32>, vector<24x16xf32> -> vector<24x32xf32>
    %265 = tpu.concatenate %257, %264 in 0 : vector<24x32xf32>, vector<24x32xf32> -> vector<48x32xf32>
    %cst_122 = arith.constant dense<0.000000e+00> : vector<48x32xf32>
    %266 = tpu.matmul %265, %178, %cst_122 {dimension_numbers = #tpu.dot_dimension_numbers<[1], [0], [0], [1], [0, 0, 1, 1], [], []>} : vector<48x32xf32>, vector<32x32xf32>, vector<48x32xf32> -> vector<48x32xf32>
    %267 = arith.addf %174, %266 : vector<48x32xf32>
    %268 = vector.broadcast %190 : vector<1x32xf32> to vector<48x32xf32>
    %269 = arith.addf %267, %268 : vector<48x32xf32>
    %cst_123 = arith.constant dense<0.000000e+00> : vector<48xf32>
    %270 = vector.multi_reduction <add>, %269, %cst_123 [1] : vector<48x32xf32> to vector<48xf32>
    %271 = vector.shape_cast %270 : vector<48xf32> to vector<48x1xf32>
    %cst_124 = arith.constant 3.200000e+01 : f32
    %272 = vector.broadcast %cst_124 : f32 to vector<48x1xf32>
    %273 = arith.divf %271, %272 : vector<48x1xf32>
    %274 = vector.broadcast %273 : vector<48x1xf32> to vector<48x32xf32>
    %275 = arith.subf %269, %274 : vector<48x32xf32>
    %276 = arith.mulf %275, %275 : vector<48x32xf32>
    %cst_125 = arith.constant dense<0.000000e+00> : vector<48xf32>
    %277 = vector.multi_reduction <add>, %276, %cst_125 [1] : vector<48x32xf32> to vector<48xf32>
    %278 = vector.shape_cast %277 : vector<48xf32> to vector<48x1xf32>
    %cst_126 = arith.constant 3.200000e+01 : f32
    %279 = vector.broadcast %cst_126 : f32 to vector<48x1xf32>
    %280 = arith.divf %278, %279 : vector<48x1xf32>
    %281 = vector.broadcast %273 : vector<48x1xf32> to vector<48x32xf32>
    %282 = arith.subf %269, %281 : vector<48x32xf32>
    %cst_127 = arith.constant 9.99999997E-7 : f32
    %283 = vector.broadcast %cst_127 : f32 to vector<48x1xf32>
    %284 = arith.addf %280, %283 : vector<48x1xf32>
    %285 = math.rsqrt %284 : vector<48x1xf32>
    %286 = vector.broadcast %285 : vector<48x1xf32> to vector<48x32xf32>
    %287 = arith.mulf %282, %286 : vector<48x32xf32>
    %288 = vector.broadcast %192 : vector<1x32xf32> to vector<48x32xf32>
    %289 = arith.mulf %287, %288 : vector<48x32xf32>
    %290 = vector.broadcast %194 : vector<1x32xf32> to vector<48x32xf32>
    %291 = arith.addf %289, %290 : vector<48x32xf32>
    %cst_128 = arith.constant dense<0.000000e+00> : vector<48x128xf32>
    %292 = tpu.matmul %291, %180, %cst_128 {dimension_numbers = #tpu.dot_dimension_numbers<[1], [0], [0], [1], [0, 0, 1, 1], [], []>} : vector<48x32xf32>, vector<32x128xf32>, vector<48x128xf32> -> vector<48x128xf32>
    %293 = vector.broadcast %196 : vector<1x128xf32> to vector<48x128xf32>
    %294 = arith.addf %292, %293 : vector<48x128xf32>
    %cst_129 = arith.constant 5.000000e-01 : f32
    %295 = vector.broadcast %cst_129 : f32 to vector<48x128xf32>
    %296 = arith.mulf %295, %294 : vector<48x128xf32>
    %cst_130 = arith.constant 0.707106769 : f32
    %297 = vector.broadcast %cst_130 : f32 to vector<48x128xf32>
    %298 = arith.mulf %294, %297 : vector<48x128xf32>
    %299 = math.absf %298 : vector<48x128xf32>
    %cst_131 = arith.constant 0.327591091 : f32
    %300 = vector.broadcast %cst_131 : f32 to vector<48x128xf32>
    %301 = arith.mulf %300, %299 : vector<48x128xf32>
    %cst_132 = arith.constant 1.000000e+00 : f32
    %302 = vector.broadcast %cst_132 : f32 to vector<48x128xf32>
    %303 = arith.addf %302, %301 : vector<48x128xf32>
    %cst_133 = arith.constant 1.000000e+00 : f32
    %304 = vector.broadcast %cst_133 : f32 to vector<48x128xf32>
    %305 = arith.divf %304, %303 : vector<48x128xf32>
    %cst_134 = arith.constant 1.06140542 : f32
    %306 = vector.broadcast %cst_134 : f32 to vector<48x128xf32>
    %307 = arith.mulf %305, %306 : vector<48x128xf32>
    %cst_135 = arith.constant -1.45315206 : f32
    %308 = vector.broadcast %cst_135 : f32 to vector<48x128xf32>
    %309 = arith.addf %308, %307 : vector<48x128xf32>
    %310 = arith.mulf %305, %309 : vector<48x128xf32>
    %cst_136 = arith.constant 1.42141378 : f32
    %311 = vector.broadcast %cst_136 : f32 to vector<48x128xf32>
    %312 = arith.addf %311, %310 : vector<48x128xf32>
    %313 = arith.mulf %305, %312 : vector<48x128xf32>
    %cst_137 = arith.constant -0.284496725 : f32
    %314 = vector.broadcast %cst_137 : f32 to vector<48x128xf32>
    %315 = arith.addf %314, %313 : vector<48x128xf32>
    %316 = arith.mulf %305, %315 : vector<48x128xf32>
    %cst_138 = arith.constant 0.254829586 : f32
    %317 = vector.broadcast %cst_138 : f32 to vector<48x128xf32>
    %318 = arith.addf %317, %316 : vector<48x128xf32>
    %319 = arith.mulf %305, %318 : vector<48x128xf32>
    %cst_139 = arith.constant 0.000000e+00 : f32
    %320 = vector.broadcast %cst_139 : f32 to vector<48x128xf32>
    %321 = arith.subf %320, %299 : vector<48x128xf32>
    %322 = arith.mulf %321, %299 : vector<48x128xf32>
    %323 = math.exp %322 : vector<48x128xf32>
    %324 = arith.mulf %319, %323 : vector<48x128xf32>
    %cst_140 = arith.constant 1.000000e+00 : f32
    %325 = vector.broadcast %cst_140 : f32 to vector<48x128xf32>
    %326 = arith.subf %325, %324 : vector<48x128xf32>
    %cst_141 = arith.constant 0.000000e+00 : f32
    %327 = vector.broadcast %cst_141 : f32 to vector<48x128xf32>
    %328 = arith.cmpf olt, %298, %327 : vector<48x128xf32>
    %cst_142 = arith.constant 0.000000e+00 : f32
    %329 = vector.broadcast %cst_142 : f32 to vector<48x128xf32>
    %330 = arith.subf %329, %326 : vector<48x128xf32>
    %331 = arith.select %328, %330, %326 : vector<48x128xi1>, vector<48x128xf32>
    %cst_143 = arith.constant 1.000000e+00 : f32
    %332 = vector.broadcast %cst_143 : f32 to vector<48x128xf32>
    %333 = arith.addf %332, %331 : vector<48x128xf32>
    %334 = arith.mulf %296, %333 : vector<48x128xf32>
    %cst_144 = arith.constant dense<0.000000e+00> : vector<48x32xf32>
    %335 = tpu.matmul %334, %182, %cst_144 {dimension_numbers = #tpu.dot_dimension_numbers<[1], [1], [0], [0], [0, 0, 1, 0], [], []>} : vector<48x128xf32>, vector<32x128xf32>, vector<48x32xf32> -> vector<48x32xf32>
    %336 = arith.addf %269, %335 : vector<48x32xf32>
    %337 = vector.broadcast %198 : vector<1x32xf32> to vector<48x32xf32>
    %338 = arith.addf %336, %337 : vector<48x32xf32>
    %c0_145 = arith.constant 0 : index
    %c0_146 = arith.constant 0 : index
    %339 = vector.load %arg1[%c0_145, %c0_146] : memref<32x48xf32, #tpu.memory_space<vmem>>, vector<32x48xf32>
    %cst_147 = arith.constant dense<0.000000e+00> : vector<32x32xf32>
    %340 = tpu.matmul %339, %338, %cst_147 {dimension_numbers = #tpu.dot_dimension_numbers<[1], [0], [0], [1], [0, 0, 1, 1], [], []>} : vector<32x48xf32>, vector<48x32xf32>, vector<32x32xf32> -> vector<32x32xf32>
    %341 = vector.extract_strided_slice %340 {offsets = [0, 0], sizes = [8, 32], strides = [1, 1]} : vector<32x32xf32> to vector<8x32xf32>
    %342 = vector.extract_strided_slice %340 {offsets = [8, 0], sizes = [8, 32], strides = [1, 1]} : vector<32x32xf32> to vector<8x32xf32>
    %343 = vector.extract_strided_slice %340 {offsets = [16, 0], sizes = [8, 32], strides = [1, 1]} : vector<32x32xf32> to vector<8x32xf32>
    %344 = vector.extract_strided_slice %340 {offsets = [24, 0], sizes = [8, 32], strides = [1, 1]} : vector<32x32xf32> to vector<8x32xf32>
    %345 = tpu.concatenate %341, %342, %343, %344 in 1 : vector<8x32xf32>, vector<8x32xf32>, vector<8x32xf32>, vector<8x32xf32> -> vector<8x128xf32>
    %c0_148 = arith.constant 0 : index
    %c0_149 = arith.constant 0 : index
    %346 = vector.load %arg4[%c0_148, %c0_149] : memref<128x128xf32, #tpu.memory_space<vmem>>, vector<128x64xf32>
    %c0_150 = arith.constant 0 : index
    %c64_151 = arith.constant 64 : index
    %347 = vector.load %arg4[%c0_150, %c64_151] : memref<128x128xf32, #tpu.memory_space<vmem>>, vector<64x64xf32>
    %c2_152 = arith.constant 2 : index
    %c0_153 = arith.constant 0 : index
    %c0_154 = arith.constant 0 : index
    %348 = vector.load %arg3[%c2_152, %c0_153, %c0_154] : memref<3x8x128xf32, #tpu.memory_space<vmem>>, vector<1x1x128xf32>
    %349 = vector.shape_cast %348 : vector<1x1x128xf32> to vector<1x128xf32>
    %c2_155 = arith.constant 2 : index
    %c1_156 = arith.constant 1 : index
    %c0_157 = arith.constant 0 : index
    %350 = vector.load %arg3[%c2_155, %c1_156, %c0_157] : memref<3x8x128xf32, #tpu.memory_space<vmem>>, vector<1x1x128xf32>
    %351 = vector.shape_cast %350 : vector<1x1x128xf32> to vector<1x128xf32>
    %c2_158 = arith.constant 2 : index
    %c2_159 = arith.constant 2 : index
    %c0_160 = arith.constant 0 : index
    %352 = vector.load %arg3[%c2_158, %c2_159, %c0_160] : memref<3x8x128xf32, #tpu.memory_space<vmem>>, vector<1x1x64xf32>
    %353 = vector.shape_cast %352 : vector<1x1x64xf32> to vector<1x64xf32>
    %c2_161 = arith.constant 2 : index
    %c3_162 = arith.constant 3 : index
    %c0_163 = arith.constant 0 : index
    %354 = vector.load %arg3[%c2_161, %c3_162, %c0_163] : memref<3x8x128xf32, #tpu.memory_space<vmem>>, vector<1x1x64xf32>
    %355 = vector.shape_cast %354 : vector<1x1x64xf32> to vector<1x64xf32>
    %cst_164 = arith.constant dense<0.000000e+00> : vector<8xf32>
    %356 = vector.multi_reduction <add>, %345, %cst_164 [1] : vector<8x128xf32> to vector<8xf32>
    %357 = vector.shape_cast %356 : vector<8xf32> to vector<8x1xf32>
    %cst_165 = arith.constant 1.280000e+02 : f32
    %358 = vector.broadcast %cst_165 : f32 to vector<8x1xf32>
    %359 = arith.divf %357, %358 : vector<8x1xf32>
    %360 = vector.broadcast %359 : vector<8x1xf32> to vector<8x128xf32>
    %361 = arith.subf %345, %360 : vector<8x128xf32>
    %362 = arith.mulf %361, %361 : vector<8x128xf32>
    %cst_166 = arith.constant dense<0.000000e+00> : vector<8xf32>
    %363 = vector.multi_reduction <add>, %362, %cst_166 [1] : vector<8x128xf32> to vector<8xf32>
    %364 = vector.shape_cast %363 : vector<8xf32> to vector<8x1xf32>
    %cst_167 = arith.constant 1.280000e+02 : f32
    %365 = vector.broadcast %cst_167 : f32 to vector<8x1xf32>
    %366 = arith.divf %364, %365 : vector<8x1xf32>
    %367 = vector.broadcast %359 : vector<8x1xf32> to vector<8x128xf32>
    %368 = arith.subf %345, %367 : vector<8x128xf32>
    %cst_168 = arith.constant 9.99999974E-6 : f32
    %369 = vector.broadcast %cst_168 : f32 to vector<8x1xf32>
    %370 = arith.addf %366, %369 : vector<8x1xf32>
    %371 = math.rsqrt %370 : vector<8x1xf32>
    %372 = vector.broadcast %371 : vector<8x1xf32> to vector<8x128xf32>
    %373 = arith.mulf %368, %372 : vector<8x128xf32>
    %374 = vector.broadcast %349 : vector<1x128xf32> to vector<8x128xf32>
    %375 = arith.mulf %373, %374 : vector<8x128xf32>
    %376 = vector.broadcast %351 : vector<1x128xf32> to vector<8x128xf32>
    %377 = arith.addf %375, %376 : vector<8x128xf32>
    %cst_169 = arith.constant dense<0.000000e+00> : vector<8x64xf32>
    %378 = tpu.matmul %377, %346, %cst_169 {dimension_numbers = #tpu.dot_dimension_numbers<[1], [0], [0], [1], [0, 0, 1, 1], [], []>} : vector<8x128xf32>, vector<128x64xf32>, vector<8x64xf32> -> vector<8x64xf32>
    %379 = vector.broadcast %353 : vector<1x64xf32> to vector<8x64xf32>
    %380 = arith.addf %378, %379 : vector<8x64xf32>
    %cst_170 = arith.constant 5.000000e-01 : f32
    %381 = vector.broadcast %cst_170 : f32 to vector<8x64xf32>
    %382 = arith.mulf %381, %380 : vector<8x64xf32>
    %cst_171 = arith.constant 0.707106769 : f32
    %383 = vector.broadcast %cst_171 : f32 to vector<8x64xf32>
    %384 = arith.mulf %380, %383 : vector<8x64xf32>
    %385 = math.absf %384 : vector<8x64xf32>
    %cst_172 = arith.constant 0.327591091 : f32
    %386 = vector.broadcast %cst_172 : f32 to vector<8x64xf32>
    %387 = arith.mulf %386, %385 : vector<8x64xf32>
    %cst_173 = arith.constant 1.000000e+00 : f32
    %388 = vector.broadcast %cst_173 : f32 to vector<8x64xf32>
    %389 = arith.addf %388, %387 : vector<8x64xf32>
    %cst_174 = arith.constant 1.000000e+00 : f32
    %390 = vector.broadcast %cst_174 : f32 to vector<8x64xf32>
    %391 = arith.divf %390, %389 : vector<8x64xf32>
    %cst_175 = arith.constant 1.06140542 : f32
    %392 = vector.broadcast %cst_175 : f32 to vector<8x64xf32>
    %393 = arith.mulf %391, %392 : vector<8x64xf32>
    %cst_176 = arith.constant -1.45315206 : f32
    %394 = vector.broadcast %cst_176 : f32 to vector<8x64xf32>
    %395 = arith.addf %394, %393 : vector<8x64xf32>
    %396 = arith.mulf %391, %395 : vector<8x64xf32>
    %cst_177 = arith.constant 1.42141378 : f32
    %397 = vector.broadcast %cst_177 : f32 to vector<8x64xf32>
    %398 = arith.addf %397, %396 : vector<8x64xf32>
    %399 = arith.mulf %391, %398 : vector<8x64xf32>
    %cst_178 = arith.constant -0.284496725 : f32
    %400 = vector.broadcast %cst_178 : f32 to vector<8x64xf32>
    %401 = arith.addf %400, %399 : vector<8x64xf32>
    %402 = arith.mulf %391, %401 : vector<8x64xf32>
    %cst_179 = arith.constant 0.254829586 : f32
    %403 = vector.broadcast %cst_179 : f32 to vector<8x64xf32>
    %404 = arith.addf %403, %402 : vector<8x64xf32>
    %405 = arith.mulf %391, %404 : vector<8x64xf32>
    %cst_180 = arith.constant 0.000000e+00 : f32
    %406 = vector.broadcast %cst_180 : f32 to vector<8x64xf32>
    %407 = arith.subf %406, %385 : vector<8x64xf32>
    %408 = arith.mulf %407, %385 : vector<8x64xf32>
    %409 = math.exp %408 : vector<8x64xf32>
    %410 = arith.mulf %405, %409 : vector<8x64xf32>
    %cst_181 = arith.constant 1.000000e+00 : f32
    %411 = vector.broadcast %cst_181 : f32 to vector<8x64xf32>
    %412 = arith.subf %411, %410 : vector<8x64xf32>
    %cst_182 = arith.constant 0.000000e+00 : f32
    %413 = vector.broadcast %cst_182 : f32 to vector<8x64xf32>
    %414 = arith.cmpf olt, %384, %413 : vector<8x64xf32>
    %cst_183 = arith.constant 0.000000e+00 : f32
    %415 = vector.broadcast %cst_183 : f32 to vector<8x64xf32>
    %416 = arith.subf %415, %412 : vector<8x64xf32>
    %417 = arith.select %414, %416, %412 : vector<8x64xi1>, vector<8x64xf32>
    %cst_184 = arith.constant 1.000000e+00 : f32
    %418 = vector.broadcast %cst_184 : f32 to vector<8x64xf32>
    %419 = arith.addf %418, %417 : vector<8x64xf32>
    %420 = arith.mulf %382, %419 : vector<8x64xf32>
    %cst_185 = arith.constant dense<0.000000e+00> : vector<8x64xf32>
    %421 = tpu.matmul %420, %347, %cst_185 {dimension_numbers = #tpu.dot_dimension_numbers<[1], [0], [0], [1], [0, 0, 1, 1], [], []>} : vector<8x64xf32>, vector<64x64xf32>, vector<8x64xf32> -> vector<8x64xf32>
    %422 = vector.broadcast %355 : vector<1x64xf32> to vector<8x64xf32>
    %423 = arith.addf %421, %422 : vector<8x64xf32>
    %c0_186 = arith.constant 0 : index
    %c0_187 = arith.constant 0 : index
    %424 = vector.load %arg5[%c0_186, %c0_187] : memref<8x64xf32, #tpu.memory_space<vmem>>, vector<8x64xf32>
    tpu.vector_store %arg5[%c0_186, %c0_187], %423 {strides = array<i32>} : memref<8x64xf32, #tpu.memory_space<vmem>>, vector<8x64xf32>,
    return
  }
}

</mosaic_0001>

<bundles_post_ra>
// kernel: internvit_classifier_forward.1
= control target key start
LH: loop header
LB: loop body
LE: loop exit
PB: predicated region body
PF: predicated region fallthrough
CT: control target
= control target key end

     0   :  { %s7061_s0 = inlined_call_operand.vmem [shape: f32[48,80], index: 0, kind: input, shape index: {}]   ;;  %s7062_s1 = inlined_call_operand.vmem [shape: f32[32,48], index: 1, kind: input, shape index: {}]   ;;  %s7063_s2 = inlined_call_operand.vmem [shape: f32[2,32,384], index: 2, kind: input, shape index: {}]   ;;  %s7064_s3 = inlined_call_operand.vmem [shape: f32[3,8,128], index: 3, kind: input, shape index: {}]   ;;  %s7065_s4 = inlined_call_operand.vmem [shape: f32[128,128], index: 4, kind: input, shape index: {}]   ;;  %s7066_s5 = inlined_call_operand.hbm [shape: f32[8,64], index: 5, kind: output, shape index: {}]  }
   0x1   :  { %v21_v0 = vld [vmem:[%s7065_s4 + $0x40] sm:$0xff]  ;;  %v22_v1 = vld [vmem:[%s7065_s4 + $0x48] sm:$0xff]  ;;  %v23_v2 = vld [vmem:[%s7065_s4 + $0x50] sm:$0xff] }
   0x2   :  { %v5333_v3 = vpack.i.bf16 %v22_v1, %v21_v0  ;;  %v24_v4 = vld [vmem:[%s7065_s4 + $0x58] sm:$0xff]  ;;  %v25_v5 = vld [vmem:[%s7065_s4 + $0x60] sm:$0xff]  ;;  %v26_v6 = vld [vmem:[%s7065_s4 + $0x68] sm:$0xff] }
   0x3   :  { %v5343_v7 = vpack.i.bf16 %v26_v6, %v25_v5 }
   0x4   :  { %10 = vsyncpa [#allocation3], 0  ;;  %s5690_s30 = smov 64   ;;  %v5338_v8 = vpack.i.bf16 %v24_v4, %v23_v2  ;;  %v27_v9 = vld [vmem:[%s7061_s0] sm:$0xff]  ;;  %vm81_vm0 = vcmask 392192   ;;  %v28_v10 = vld [vmem:[%s7061_s0 + $0x8] sm:$0xff] }
   0x5   :  { %5334 = vrot.lane.b32.xlu0 %v5333_v3, %s5690_s30  ;;  %5344 = vrot.lane.b32.xlu1 %v5343_v7, %s5690_s30  ;;  %s5691_s10 = smov 80   ;;  %v29_v11 = vld [vmem:[%s7061_s0 + $0x10] sm:$0xff]  ;;  %v30_v12 = vld [vmem:[%s7061_s0 + $0x18] sm:$0xff]  ;;  %vm213_vm1 = vcmask 261120   ;;  %s5693_s8 = smov 96   ;;  %vm5694_vm2 = vmmov 0  }
   0x6   :  { %4680 = vmatprep.mubr.msk.f32.mxu0 %vm81_vm0, %v27_v9  ;;  %v31_v13 = vld [vmem:[%s7061_s0 + $0x20] sm:$0xff]  ;;  %v32_v14 = vld [vmem:[%s7061_s0 + $0x28] sm:$0xff]  ;;  %s5696_s9 = smov 112   ;;  %vm439_vm3 = vcmask 130048   ;;  %vm853_vm6 = vcmask 195584   ;;  %s5698_s11 = smov 48  }
   0x7   :  { %vm5942_vm4 = vmpackc.low %vm439_vm3, %vm439_vm3  ;;  %s5699_s12 = smov 32   ;;  %s5700_s13 = smov 16  }
   0x8   :  { %s5701_s29 = smov [#allocation2]  }
   0x9   :  { %5339 = vrot.lane.b32.xlu0 %v5338_v8, %s5690_s30  ;;  %63 = vrot.lane.b32.xlu1 %v27_v9, %s5691_s10  ;;  %s4273_s6 = sshll.u32 %s5701_s29, 4  ;;  %s4274_s6 = int_to_ptr.vmem [resolvable:$true] %s4273_s6 }
   0xa   :  { %s5666_s7 = scalar_lea.vmem %s4274_s6, 128  ;;  %p5671_p1 = scmp.lt.s32.totalorder %s4274_s6, %s4274_s6 }
   0xb   :  { %p5667_p0 = scmp.ne.s32.totalorder %s4274_s6, %s5666_s7  ;;  %p5672_p2 = scmp.lt.s32.totalorder %s5666_s7, %s5666_s7 }
   0xd   :  { %65 = vrot.lane.b32.xlu0 %v28_v10, %s5691_s10  ;;  %67 = vrot.lane.b32.xlu1 %v29_v11, %s5691_s10  ;;  %p5673_p3 = por %p5672_p2, %p5671_p1 }
   0xf   :  { %p5674_p4 = pnand %p5673_p3, %p5667_p0 }
  0x11   :  { %69 = vrot.lane.b32.xlu0 %v30_v12, %s5691_s10  ;;  %71 = vrot.lane.b32.xlu1 %v31_v13, %s5691_s10 }
  0x15   :  { %73 = vrot.lane.b32.xlu0 %v32_v14, %s5691_s10 }
  0x77   :  { %v5335_v15 = vpop.permute.xlu0 %5334  ;;  %v5345_v18 = vpop.permute.xlu1 %5344 }
  0x78   :  { %v5337_v16 = vunpack.i.h.bf16 %v5335_v15  ;;  %v5336_v17 = vunpack.i.l.bf16 %v5335_v15  ;;  %v5347_v20 = vunpack.i.h.bf16 %v5345_v18  ;;  %v5346_v21 = vunpack.i.l.bf16 %v5345_v18  ;;  %v5851_v18 = vld [vmem:[%s7063_s2 + $0x18] sm:$0xff] }
  0x7a   :  { %v5137_v19 = vpack.c.bf16 %v5337_v16, %v5336_v17  ;;  %v5145_v26 = vpack.c.bf16 %v5347_v20, %v5346_v21  ;;  %v5846_v17 = vld [vmem:[%s7063_s2] sm:$0xff]  ;;  %v5860_v21 = vld [vmem:[%s7063_s2 + $0x30] sm:$0xff] }
  0x7b   :  { %v5340_v22 = vpop.permute.xlu0 %5339  ;;  %v64_v28 = vpop.permute.xlu1 %63  ;;  %v5149_v20 = vpack.c.bf16 %v5851_v18, %v5846_v17 }
  0x7c   :  { %v5342_v23 = vunpack.i.h.bf16 %v5340_v22  ;;  %v5341_v24 = vunpack.i.l.bf16 %v5340_v22  ;;  %5138 = vmatprep.subr.bf16.mxu0 %v5137_v19  ;;  %v5865_v22 = vld [vmem:[%s7063_s2 + $0x48] sm:$0xff] }
  0x7d   :  { %5140 = vmatpush3.bf16.msra.mxu0 %v5137_v19  ;;  %v5388_v19 = vpack.i.bf16 %v5851_v18, %v5846_v17  ;;  %5150 = vmatprep.subr.bf16.mxu1 %v5149_v20 }
  0x7e   :  { %v5141_v25 = vpack.c.bf16 %v5342_v23, %v5341_v24  ;;  %v5153_v23 = vpack.c.bf16 %v5865_v22, %v5860_v21  ;;  %5152 = vmatpush3.bf16.msra.mxu1 %v5149_v20 }
  0x7f   :  { %v66_v27 = vpop.permute.xlu0 %65  ;;  %v68_v33 = vpop.permute.xlu1 %67 }
  0x80   :  { %5142 = vmatprep.subr.bf16.mxu0 %v5141_v25  ;;  %5154 = vmatprep.subr.bf16.mxu1 %v5153_v23 }
  0x81   :  { %5144 = vmatpush3.bf16.msra.mxu0 %v5141_v25 }
  0x82   :  { %5146 = vmatprep.subr.bf16.mxu0 %v5145_v26  ;;  %5156 = vmatpush3.bf16.msra.mxu1 %v5153_v23 }
  0x83   :  { %v70_v30 = vpop.permute.xlu0 %69  ;;  %v72_v42 = vpop.permute.xlu1 %71 }
  0x85   :  { %5148 = vmatpush3.bf16.msra.mxu0 %v5145_v26 }
  0x87   :  { %v74_v41 = vpop.permute.xlu0 %73 }
  0x88   :  { %4681 = vmatmul.mubr.msk.f32.vlgmr.msra.gmra.mrb[0].mxu0 %vm81_vm0, %v28_v10 }
  0x89   :  { %4683 = vmatprep.mubr.msk.f32.mxu0 %vm81_vm0, %v29_v11 }
  0x8c   :  { %4684 = vmatmul.mubr.msk.f32.gmra.mrb[2].mxu0 %vm81_vm0, %v30_v12 }
  0x8d   :  { %4686 = vmatprep.mubr.msk.f32.mxu0 %vm81_vm0, %v31_v13 }
  0x90   :  { %4687 = vmatmul.mubr.msk.f32.gmra.mrb[4].mxu0 %vm81_vm0, %v32_v14 }
 0x15b   :  { %v4682_v29 = vpop.f32.mrb[0].mxu0 }
 0x15c   :  { %v5783_v31 = vadd.f32 %v4682_v29, %v66_v27  ;;  %v160_v32 = vpop.f32.mrb[1].mxu0 }
 0x15d   :  { %v5785_v34 = vadd.f32 %v160_v32, %v64_v28 }
 0x15e   :  { %v217_v35 = vsel %vm213_vm1, %v5783_v31, 0.0 }
 0x15f   :  { %218 = vadd.xlane.f32.xlu0 %v217_v35  ;;  %v4685_v36 = vpop.f32.mrb[2].mxu0  ;;  %v214_v37 = vsel %vm213_vm1, %v5785_v34, 0.0 }
 0x160   :  { %v5791_v38 = vadd.f32 %v4685_v36, %v70_v30  ;;  %v170_v39 = vpop.f32.mrb[3].mxu0  ;;  %215 = vadd.xlane.f32.xlu1 %v214_v37 }
 0x161   :  { %v5793_v40 = vadd.f32 %v170_v39, %v68_v33 }
 0x162   :  { %v223_v43 = vsel %vm213_vm1, %v5791_v38, 0.0 }
 0x163   :  { %v4688_v44 = vpop.f32.mrb[4].mxu0  ;;  %v220_v45 = vsel %vm213_vm1, %v5793_v40, 0.0 }
 0x164   :  { %v5799_v46 = vadd.f32 %v4688_v44, %v74_v41  ;;  %v180_v47 = vpop.f32.mrb[5].mxu0  ;;  %221 = vadd.xlane.f32.xlu0 %v220_v45  ;;  %224 = vadd.xlane.f32.xlu1 %v223_v43 }
 0x165   :  { %v5801_v48 = vadd.f32 %v180_v47, %v72_v42 }
 0x166   :  { %v229_v49 = vsel %vm213_vm1, %v5799_v46, 0.0 }
 0x167   :  { %v226_v50 = vsel %vm213_vm1, %v5801_v48, 0.0 }
 0x168   :  { %227 = vadd.xlane.f32.xlu0 %v226_v50  ;;  %230 = vadd.xlane.f32.xlu1 %v229_v49  ;;  %v4287_v49 = vld [vmem:[%s7064_s3] ss:$0 sm:$0xff] }
 0x1ec   :  { %v219_v51 = vpop.xlane.xlu0 %218 }
 0x1ed   :  { %v234_v52 = vmul.f32 0.03125, %v219_v51  ;;  %v216_v53 = vpop.xlane.xlu1 %215 }
 0x1ee   :  { %v233_v54 = vmul.f32 0.03125, %v216_v53  ;;  %v4288_v53 = vld [vmem:[%s7064_s3 + $0x1] ss:$0 sm:$0xff] }
 0x1ef   :  { %v5808_v55 = vsub.f32 %v5783_v31, %v234_v52 }
 0x1f0   :  { %v5811_v56 = vsub.f32 %v5785_v34, %v233_v54 }
 0x1f1   :  { %v222_v57 = vpop.xlane.xlu0 %221  ;;  %v225_v58 = vpop.xlane.xlu1 %224  ;;  %v246_v59 = vmul.f32 %v5808_v55, %v5808_v55 }
 0x1f2   :  { %v235_v60 = vmul.f32 0.03125, %v222_v57  ;;  %v236_v61 = vmul.f32 0.03125, %v225_v58  ;;  %v245_v62 = vmul.f32 %v5811_v56, %v5811_v56 }
 0x1f3   :  { %v254_v63 = vsel %vm213_vm1, %v246_v59, 0.0 }
 0x1f4   :  { %v5819_v0 = vsub.f32 %v5793_v40, %v235_v60  ;;  %v5822_v1 = vsub.f32 %v5791_v38, %v236_v61  ;;  %255 = vadd.xlane.f32.xlu1 %v254_v63  ;;  %v251_v2 = vsel %vm213_vm1, %v245_v62, 0.0 }
 0x1f5   :  { %v228_v3 = vpop.xlane.xlu0 %227  ;;  %252 = vadd.xlane.f32.xlu0 %v251_v2  ;;  %v231_v4 = vpop.xlane.xlu1 %230 }
 0x1f6   :  { %v237_v5 = vmul.f32 0.03125, %v228_v3  ;;  %v238_v6 = vmul.f32 0.03125, %v231_v4  ;;  %v247_v7 = vmul.f32 %v5819_v0, %v5819_v0  ;;  %v248_v8 = vmul.f32 %v5822_v1, %v5822_v1 }
 0x1f8   :  { %v5830_v9 = vsub.f32 %v5801_v48, %v237_v5  ;;  %v5833_v10 = vsub.f32 %v5799_v46, %v238_v6  ;;  %v257_v11 = vsel %vm213_vm1, %v247_v7, 0.0  ;;  %v260_v12 = vsel %vm213_vm1, %v248_v8, 0.0 }
 0x1f9   :  { %258 = vadd.xlane.f32.xlu0 %v257_v11  ;;  %261 = vadd.xlane.f32.xlu1 %v260_v12  ;;  %v5692_v12 = vmov 0.0|0.0  }
 0x1fa   :  { %v249_v13 = vmul.f32 %v5830_v9, %v5830_v9  ;;  %v250_v14 = vmul.f32 %v5833_v10, %v5833_v10  ;;  %5157 = vmatprep.subr.bf16.mxu1 %v5692_v12  ;;  %5161 = vmatprep.subr.bf16.mxu0 %v5692_v12 }
 0x1fc   :  { %v263_v15 = vsel %vm213_vm1, %v249_v13, 0.0  ;;  %v266_v16 = vsel %vm213_vm1, %v250_v14, 0.0 }
 0x1fd   :  { %264 = vadd.xlane.f32.xlu0 %v263_v15  ;;  %267 = vadd.xlane.f32.xlu1 %v266_v16 }
 0x281   :  { %v256_v24 = vpop.xlane.xlu1 %255 }
 0x282   :  { %v270_v25 = vmul.f32 0.03125, %v256_v24  ;;  %v253_v26 = vpop.xlane.xlu0 %252  ;;  %v5695_v24 = vmov 0.0  }
 0x283   :  { %v269_v27 = vmul.f32 0.03125, %v253_v26  ;;  %4727 = vmatprep.mubr.msk.f32.mxu0 %vm5694_vm2, %v5695_v24 }
 0x284   :  { %v276_v28 = vadd.f32 1e-06, %v270_v25 }
 0x285   :  { %v275_v29 = vadd.f32 1e-06, %v269_v27 }
 0x286   :  { %5468 = vrsqrt.f32 %v276_v28  ;;  %v259_v30 = vpop.xlane.xlu0 %258  ;;  %v262_v32 = vpop.xlane.xlu1 %261 }
 0x287   :  { %5470 = vrsqrt.f32 %v275_v29  ;;  %v271_v33 = vmul.f32 0.03125, %v259_v30  ;;  %v272_v35 = vmul.f32 0.03125, %v262_v32 }
 0x289   :  { %v277_v36 = vadd.f32 1e-06, %v271_v33  ;;  %v278_v37 = vadd.f32 1e-06, %v272_v35 }
 0x28a   :  { %v265_v39 = vpop.xlane.xlu0 %264  ;;  %v268_v41 = vpop.xlane.xlu1 %267 }
 0x28b   :  { %5472 = vrsqrt.f32 %v277_v36  ;;  %v273_v42 = vmul.f32 0.03125, %v265_v39  ;;  %v274_v43 = vmul.f32 0.03125, %v268_v41 }
 0x28c   :  { %5474 = vrsqrt.f32 %v278_v37 }
 0x28d   :  { %v279_v44 = vadd.f32 1e-06, %v273_v42  ;;  %v280_v45 = vadd.f32 1e-06, %v274_v43 }
 0x28f   :  { %5476 = vrsqrt.f32 %v279_v44 }
 0x290   :  { %v5469_v47 = vpop.eup %5468  ;;  %5478 = vrsqrt.f32 %v280_v45 }
 0x291   :  { %v5471_v50 = vpop.eup %5470  ;;  %v288_v51 = vmul.f32 %v5469_v47, %v5808_v55 }
 0x292   :  { %v287_v52 = vmul.f32 %v5471_v50, %v5811_v56 }
 0x293   :  { %v298_v54 = vmul.f32 %v4287_v49, %v288_v51 }
 0x294   :  { %v297_v57 = vmul.f32 %v4287_v49, %v287_v52 }
 0x295   :  { %v5473_v58 = vpop.eup %5472  ;;  %v308_v62 = vadd.f32 %v4288_v53, %v298_v54 }
 0x296   :  { %v5475_v59 = vpop.eup %5474  ;;  %v307_v60 = vadd.f32 %v4288_v53, %v297_v57  ;;  %v289_v61 = vmul.f32 %v5473_v58, %v5819_v0 }
 0x297   :  { %v290_v63 = vmul.f32 %v5475_v59, %v5822_v1 }
 0x298   :  { %4697 = vmatprep.mubr.msk.f32.mxu1 %vm213_vm1, %v307_v60  ;;  %v299_v2 = vmul.f32 %v4287_v49, %v289_v61 }
 0x299   :  { %v5477_v55 = vpop.eup %5476  ;;  %4698 = vmatmul.mubr.msk.f32.vlgmr.msra.gmra.mrb[0].mxu1 %vm213_vm1, %v308_v62  ;;  %v300_v56 = vmul.f32 %v4287_v49, %v290_v63 }
 0x29a   :  { %v5479_v3 = vpop.eup %5478  ;;  %v309_v4 = vadd.f32 %v4288_v53, %v299_v2  ;;  %v291_v5 = vmul.f32 %v5477_v55, %v5830_v9  ;;  %v4289_v9 = vld [vmem:[%s7064_s3 + $0x2] ss:$0 sm:$0xff] }
 0x29b   :  { %v310_v6 = vadd.f32 %v4288_v53, %v300_v56  ;;  %v292_v7 = vmul.f32 %v5479_v3, %v5833_v10  ;;  %v189_v3 = vlaneseq }
 0x29c   :  { %4700 = vmatprep.mubr.msk.f32.mxu1 %vm213_vm1, %v309_v4  ;;  %v301_v0 = vmul.f32 %v4287_v49, %v291_v5  ;;  %v5697_v5 = vmov -1e+30  }
 0x29d   :  { %4701 = vmatmul.mubr.msk.f32.gmra.mrb[2].mxu1 %vm213_vm1, %v310_v6  ;;  %v302_v1 = vmul.f32 %v4287_v49, %v292_v7  ;;  %v190_v4 = vand.u32 127, %v189_v3 }
 0x29e   :  { %v311_v8 = vadd.f32 %v4288_v53, %v301_v0 }
 0x29f   :  { %v312_v11 = vadd.f32 %v4288_v53, %v302_v1  ;;  %vm191_vm5 = vcmp.lt.s32.totalorder %v190_v4, 17 }
 0x2a0   :  { %4703 = vmatprep.mubr.msk.f32.mxu1 %vm213_vm1, %v311_v8  ;;  %v6007_v6 = vsel %vm191_vm5, 0.0, %v5697_v5 }
 0x2a1   :  { %4704 = vmatmul.mubr.msk.f32.gmra.mrb[4].mxu1 %vm213_vm1, %v312_v11 }
 0x2a2   :  { %4712 = vmatprep.mubr.msk.f32.mxu1 %vm5694_vm2, %v5695_v24 }
 0x36c   :  { %v4699_v10 = vpop.f32.mrb[0].mxu1 }
 0x36d   :  { %v5892_v13 = vadd.f32 %v4699_v10, %v4289_v9  ;;  %v401_v14 = vpop.f32.mrb[1].mxu1 }
 0x36e   :  { %v402_v15 = vadd.f32 %v4289_v9, %v401_v14 }
 0x370   :  { %v4702_v16 = vpop.f32.mrb[2].mxu1  ;;  %v5895_v20 = vpack.i.bf16 %v5892_v13, %v402_v15 }
 0x371   :  { %v411_v23 = vpop.f32.mrb[3].mxu1  ;;  %v5907_v28 = vadd.f32 %v4702_v16, %v4289_v9 }
 0x372   :  { %5354 = vrot.lane.b32.xlu1 %v5895_v20, %s5691_s10  ;;  %5349 = vrot.lane.b32.xlu0 %v5895_v20, %s5693_s8  ;;  %v5905_v25 = vadd.f32 %v4289_v9, %v411_v23 }
 0x374   :  { %v4705_v26 = vpop.f32.mrb[4].mxu1 }
 0x375   :  { %v421_v27 = vpop.f32.mrb[5].mxu1  ;;  %v5926_v32 = vadd.f32 %v4705_v26, %v4289_v9 }
 0x376   :  { %v5909_v29 = vadd.f32 %v4289_v9, %v421_v27  ;;  %542 = vrot.lane.b32.xlu0 %v5905_v25, %s5691_s10  ;;  %437 = vrot.lane.b32.xlu1 %v5905_v25, %s5693_s8 }
 0x378   :  { %v5917_v30 = vpack.i.bf16 %v5909_v29, %v5907_v28 }
 0x37a   :  { %532 = vrot.lane.b32.xlu0 %v402_v15, %s5696_s9  ;;  %5359 = vrot.lane.b32.xlu1 %v5917_v30, %s5691_s10 }
 0x37e   :  { %536 = vrot.lane.b32.xlu0 %v5905_v25, %s5696_s9  ;;  %534 = vrot.lane.b32.xlu1 %v5892_v13, %s5696_s9 }
 0x382   :  { %737 = vrot.lane.b32.xlu0 %v5907_v28, %s5696_s9  ;;  %747 = vrot.lane.b32.xlu1 %v5926_v32, %s5691_s10 }
 0x386   :  { %741 = vrot.lane.b32.xlu0 %v5926_v32, %s5696_s9  ;;  %739 = vrot.lane.b32.xlu1 %v5909_v29, %s5696_s9 }
 0x38a   :  { %643 = vrot.lane.b32.xlu0 %v5926_v32, %s5693_s8  ;;  %5364 = vrot.lane.b32.xlu1 %v5917_v30, %s5693_s8 }
 0x3e4   :  { %v5350_v33 = vpop.permute.xlu0 %5349  ;;  %v5355_v35 = vpop.permute.xlu1 %5354 }
 0x3e5   :  { %v5352_v36 = vunpack.i.h.bf16 %v5350_v33  ;;  %v5351_v37 = vunpack.i.l.bf16 %v5350_v33  ;;  %v5357_v39 = vunpack.i.h.bf16 %v5355_v35  ;;  %v5356_v41 = vunpack.i.l.bf16 %v5355_v35 }
 0x3e7   :  { %v5158_v43 = vpack.c.bf16 %v5352_v36, %v5351_v37  ;;  %v5162_v44 = vpack.c.bf16 %v5357_v39, %v5356_v41 }
 0x3e8   :  { %v438_v45 = vpop.permute.xlu1 %437  ;;  %v543_v47 = vpop.permute.xlu0 %542 }
 0x3e9   :  { %5160 = vmatpush3.bf16.xpose.msk.msra.mxu1 %vm5942_vm4, %v5158_v43  ;;  %5164 = vmatpush3.bf16.xpose.msk.msra.mxu0 %vm5942_vm4, %v5162_v44 }
 0x3ea   :  { %4710 = vmatprep.subr.mxu1 %v5695_v24  ;;  %4725 = vmatprep.subr.mxu0 %v5695_v24 }
 0x3ec   :  { %v5360_v49 = vpop.permute.xlu1 %5359  ;;  %v533_v52 = vpop.permute.xlu0 %532 }
 0x3ed   :  { %v5362_v50 = vunpack.i.h.bf16 %v5360_v49  ;;  %v5361_v51 = vunpack.i.l.bf16 %v5360_v49 }
 0x3ef   :  { %v5170_v54 = vpack.c.bf16 %v5362_v50, %v5361_v51 }
 0x3f0   :  { %v535_v53 = vpop.permute.xlu1 %534  ;;  %v537_v58 = vpop.permute.xlu0 %536 }
 0x3f1   :  { %4711 = vmatpush3.xpose.msk.msra.mxu1 %vm439_vm3, %v438_v45  ;;  %4726 = vmatpush3.xpose.msk.msra.mxu0 %vm439_vm3, %v543_v47 }
 0x3f2   :  { %5169 = vmatprep.subr.bf16.mxu0 %v5692_v12  ;;  %5165 = vmatprep.subr.bf16.mxu1 %v5692_v12 }
 0x3f4   :  { %4713 = vmatmul.mubr.msk.f32.vlgmr.msra.gmra.mrb[6].mxu1 %vm439_vm3, %v402_v15  ;;  %v748_v57 = vpop.permute.xlu1 %747  ;;  %4728 = vmatmul.mubr.msk.f32.vlgmr.msra.gmra.mrb[6].mxu0 %vm439_vm3, %v533_v52  ;;  %v738_v60 = vpop.permute.xlu0 %737 }
 0x3f5   :  { %5172 = vmatpush3.bf16.xpose.msk.msra.mxu0 %vm5942_vm4, %v5170_v54  ;;  %4715 = vmatprep.mubr.msk.f32.mxu1 %vm5694_vm2, %v5695_v24 }
 0x3f6   :  { %4730 = vmatprep.mubr.msk.f32.mxu0 %vm5694_vm2, %v5695_v24  ;;  %4755 = vmatprep.subr.mxu0 %v5695_v24 }
 0x3f8   :  { %4716 = vmatmul.mubr.msk.f32.gmra.mrb[8].mxu1 %vm439_vm3, %v5892_v13  ;;  %v740_v59 = vpop.permute.xlu1 %739  ;;  %4731 = vmatmul.mubr.msk.f32.gmra.mrb[8].mxu0 %vm439_vm3, %v535_v53  ;;  %v742_v55 = vpop.permute.xlu0 %741 }
 0x3f9   :  { %4718 = vmatprep.mubr.msk.f32.mxu1 %vm5694_vm2, %v5695_v24  ;;  %4733 = vmatprep.mubr.msk.f32.mxu0 %vm5694_vm2, %v5695_v24 }
 0x3fc   :  { %4719 = vmatmul.mubr.msk.f32.gmra.mrb[10].mxu1 %vm439_vm3, %v5905_v25  ;;  %v5365_v61 = vpop.permute.xlu1 %5364  ;;  %4734 = vmatmul.mubr.msk.f32.gmra.mrb[10].mxu0 %vm439_vm3, %v537_v58  ;;  %v644_v56 = vpop.permute.xlu0 %643 }
 0x3fd   :  { %v5367_v62 = vunpack.i.h.bf16 %v5365_v61  ;;  %v5366_v63 = vunpack.i.l.bf16 %v5365_v61  ;;  %4756 = vmatpush3.xpose.msk.msra.mxu0 %vm439_vm3, %v748_v57  ;;  %4757 = vmatprep.mubr.msk.f32.mxu0 %vm5694_vm2, %v5695_v24 }
 0x3fe   :  { %4742 = vmatprep.mubr.msk.f32.mxu1 %vm5694_vm2, %v5695_v24  ;;  %5173 = vmatprep.subr.bf16.mxu0 %v5692_v12 }
 0x3ff   :  { %v5166_v2 = vpack.c.bf16 %v5367_v62, %v5366_v63 }
 0x400   :  { %4758 = vmatmul.mubr.msk.f32.vlgmr.msra.gmra.mrb[12].mxu0 %vm439_vm3, %v738_v60 }
 0x401   :  { %5168 = vmatpush3.bf16.xpose.msk.msra.mxu1 %vm5942_vm4, %v5166_v2  ;;  %4760 = vmatprep.mubr.msk.f32.mxu0 %vm5694_vm2, %v5695_v24 }
 0x402   :  { %4740 = vmatprep.subr.mxu1 %v5695_v24 }
 0x404   :  { %4761 = vmatmul.mubr.msk.f32.gmra.mrb[14].mxu0 %vm439_vm3, %v740_v59 }
 0x405   :  { %4763 = vmatprep.mubr.msk.f32.mxu0 %vm5694_vm2, %v5695_v24 }
 0x408   :  { %4764 = vmatmul.mubr.msk.f32.gmra.mrb[16].mxu0 %vm439_vm3, %v742_v55 }
 0x409   :  { %4741 = vmatpush3.xpose.msk.msra.mxu1 %vm439_vm3, %v644_v56  ;;  %4772 = vmatprep.mubr.msk.f32.mxu0 %vm5694_vm2, %v5695_v24 }
 0x40a   :  { %5317 = vmatprep.subr.bf16.mxu1 %v5692_v12 }
 0x40c   :  { %4743 = vmatmul.mubr.msk.f32.vlgmr.msra.gmra.mrb[12].mxu1 %vm439_vm3, %v5907_v28 }
 0x40d   :  { %4745 = vmatprep.mubr.msk.f32.mxu1 %vm5694_vm2, %v5695_v24 }
 0x410   :  { %4746 = vmatmul.mubr.msk.f32.gmra.mrb[14].mxu1 %vm439_vm3, %v5909_v29 }
 0x411   :  { %4748 = vmatprep.mubr.msk.f32.mxu1 %vm5694_vm2, %v5695_v24 }
 0x414   :  { %4749 = vmatmul.mubr.msk.f32.gmra.mrb[16].mxu1 %vm439_vm3, %v5926_v32 }
 0x415   :  { %4775 = vmatprep.mubr.msk.f32.mxu1 %vm5694_vm2, %v5695_v24 }
 0x4c7   :  { %v518_v7 = vpop.f32.mrb[6].mxu1  ;;  %v622_v0 = vpop.f32.mrb[6].mxu0 }
 0x4c8   :  { %v6010_v1 = vadd.f32 %v518_v7, %v6007_v6  ;;  %v6013_v8 = vadd.f32 %v622_v0, %v6007_v6  ;;  %v4714_v11 = vpop.f32.mrb[7].mxu1  ;;  %v4729_v9 = vpop.f32.mrb[7].mxu0 }
 0x4ca   :  { %v854_v10 = vsel %vm853_vm6, %v6010_v1, -inf  ;;  %v863_v13 = vsel %vm853_vm6, %v6013_v8, -inf }
 0x4cb   :  { %855 = vmax.xlane.f32.xlu1 %v854_v10  ;;  %v523_v14 = vpop.f32.mrb[8].mxu1  ;;  %864 = vmax.xlane.f32.xlu0 %v863_v13  ;;  %v627_v15 = vpop.f32.mrb[8].mxu0 }
 0x4cc   :  { %v845_v16 = vadd.f32 %v627_v15, %v6007_v6  ;;  %v4717_v23 = vpop.f32.mrb[9].mxu1  ;;  %v4732_v26 = vpop.f32.mrb[9].mxu0  ;;  %v6027_v50 = vadd.f32 %v523_v14, %v6007_v6 }
 0x4ce   :  { %v866_v27 = vsel %vm853_vm6, %v845_v16, -inf  ;;  %v857_v58 = vsel %vm853_vm6, %v6027_v50, -inf }
 0x4cf   :  { %v528_v28 = vpop.f32.mrb[10].mxu1  ;;  %867 = vmax.xlane.f32.xlu0 %v866_v27  ;;  %v632_v29 = vpop.f32.mrb[10].mxu0 }
 0x4d0   :  { %v846_v33 = vadd.f32 %v632_v29, %v6007_v6  ;;  %v4720_v35 = vpop.f32.mrb[11].mxu1  ;;  %v4735_v36 = vpop.f32.mrb[11].mxu0  ;;  %v6032_v57 = vadd.f32 %v528_v28, %v6007_v6 }
 0x4d2   :  { %v869_v37 = vsel %vm853_vm6, %v846_v33, -inf  ;;  %v860_v2 = vsel %vm853_vm6, %v6032_v57, -inf }
 0x4d3   :  { %870 = vmax.xlane.f32.xlu1 %v869_v37  ;;  %v827_v39 = vpop.f32.mrb[12].mxu0 }
 0x4d4   :  { %v850_v41 = vadd.f32 %v827_v39, %v6007_v6  ;;  %v4759_v43 = vpop.f32.mrb[13].mxu0 }
 0x4d6   :  { %v881_v44 = vsel %vm853_vm6, %v850_v41, -inf }
 0x4d7   :  { %882 = vmax.xlane.f32.xlu0 %v881_v44  ;;  %v832_v45 = vpop.f32.mrb[14].mxu0 }
 0x4d8   :  { %v851_v47 = vadd.f32 %v832_v45, %v6007_v6  ;;  %v4762_v49 = vpop.f32.mrb[15].mxu0 }
 0x4da   :  { %v884_v51 = vsel %vm853_vm6, %v851_v47, -inf }
 0x4db   :  { %885 = vmax.xlane.f32.xlu1 %v884_v51  ;;  %v837_v52 = vpop.f32.mrb[16].mxu0 }
 0x4dc   :  { %v852_v53 = vadd.f32 %v837_v52, %v6007_v6  ;;  %v4765_v54 = vpop.f32.mrb[17].mxu0 }
 0x4de   :  { %v887_v59 = vsel %vm853_vm6, %v852_v53, -inf }
 0x4df   :  { %v723_v60 = vpop.f32.mrb[12].mxu1  ;;  %858 = vmax.xlane.f32.xlu1 %v857_v58  ;;  %888 = vmax.xlane.f32.xlu0 %v887_v59 }
 0x4e0   :  { %v6038_v61 = vadd.f32 %v723_v60, %v6007_v6  ;;  %v4744_v62 = vpop.f32.mrb[13].mxu1 }
 0x4e2   :  { %v872_v63 = vsel %vm853_vm6, %v6038_v61, -inf }
 0x4e3   :  { %v728_v55 = vpop.f32.mrb[14].mxu1  ;;  %873 = vmax.xlane.f32.xlu1 %v872_v63  ;;  %861 = vmax.xlane.f32.xlu0 %v860_v2 }
 0x4e4   :  { %v6045_v56 = vadd.f32 %v728_v55, %v6007_v6  ;;  %v4747_v3 = vpop.f32.mrb[15].mxu1 }
 0x4e6   :  { %v875_v4 = vsel %vm853_vm6, %v6045_v56, -inf }
 0x4e7   :  { %v733_v5 = vpop.f32.mrb[16].mxu1  ;;  %876 = vmax.xlane.f32.xlu0 %v875_v4 }
 0x4e8   :  { %v4750_v7 = vpop.f32.mrb[17].mxu1  ;;  %v6052_v0 = vadd.f32 %v733_v5, %v6007_v6 }
 0x4ea   :  { %v878_v11 = vsel %vm853_vm6, %v6052_v0, -inf }
 0x4f4   :  { %5369 = vrot.lane.b32.xlu1 %v5895_v20, %s5690_s30 }
 0x518   :  { %879 = vmax.xlane.f32.xlu1 %v878_v11 }
 0x558   :  { %v856_v9 = vpop.xlane.xlu1 %855  ;;  %v865_v10 = vpop.xlane.xlu0 %864 }
 0x559   :  { %v890_v13 = vsub.f32 %v6010_v1, %v856_v9  ;;  %v893_v14 = vsub.f32 %v6013_v8, %v865_v10 }
 0x55b   :  { %v902_v15 = vmul.f32 1.442695, %v890_v13  ;;  %v908_v23 = vmul.f32 1.442695, %v893_v14 }
 0x55c   :  { %v868_v26 = vpop.xlane.xlu0 %867 }
 0x55d   :  { %5480 = vpow2.f32 %v902_v15  ;;  %v894_v27 = vsub.f32 %v845_v16, %v868_v26 }
 0x55e   :  { %5482 = vpow2.f32 %v908_v23 }
 0x55f   :  { %v910_v28 = vmul.f32 1.442695, %v894_v27 }
 0x560   :  { %v871_v29 = vpop.xlane.xlu1 %870 }
 0x561   :  { %5484 = vpow2.f32 %v910_v28  ;;  %v895_v35 = vsub.f32 %v846_v33, %v871_v29 }
 0x563   :  { %v912_v36 = vmul.f32 1.442695, %v895_v35 }
 0x564   :  { %v883_v37 = vpop.xlane.xlu0 %882 }
 0x565   :  { %5486 = vpow2.f32 %v912_v36  ;;  %v899_v39 = vsub.f32 %v850_v41, %v883_v37 }
 0x567   :  { %v6058_v43 = vpop.eup %5480  ;;  %v920_v44 = vmul.f32 1.442695, %v899_v39 }
 0x568   :  { %v6060_v1 = vpop.eup %5482  ;;  %v886_v8 = vpop.xlane.xlu1 %885  ;;  %v926_v45 = vsel %vm853_vm6, %v6058_v43, 0.0 }
 0x569   :  { %5488 = vpow2.f32 %v920_v44  ;;  %v900_v16 = vsub.f32 %v851_v47, %v886_v8  ;;  %v935_v49 = vsel %vm853_vm6, %v6060_v1, 0.0  ;;  %927 = vadd.xlane.f32.xlu0 %v926_v45 }
 0x56a   :  { %936 = vadd.xlane.f32.xlu1 %v935_v49 }
 0x56b   :  { %v6066_v33 = vpop.eup %5484  ;;  %v922_v51 = vmul.f32 1.442695, %v900_v16 }
 0x56c   :  { %v859_v41 = vpop.xlane.xlu1 %858  ;;  %v889_v52 = vpop.xlane.xlu0 %888  ;;  %v938_v54 = vsel %vm853_vm6, %v6066_v33, 0.0 }
 0x56d   :  { %5490 = vpow2.f32 %v922_v51  ;;  %v901_v58 = vsub.f32 %v852_v53, %v889_v52  ;;  %939 = vadd.xlane.f32.xlu0 %v938_v54  ;;  %v891_v14 = vsub.f32 %v6027_v50, %v859_v41 }
 0x56f   :  { %v6070_v59 = vpop.eup %5486  ;;  %v924_v60 = vmul.f32 1.442695, %v901_v58  ;;  %v904_v23 = vmul.f32 1.442695, %v891_v14 }
 0x570   :  { %v874_v47 = vpop.xlane.xlu1 %873  ;;  %v941_v62 = vsel %vm853_vm6, %v6070_v59, 0.0  ;;  %v862_v10 = vpop.xlane.xlu0 %861 }
 0x571   :  { %942 = vadd.xlane.f32.xlu1 %v941_v62  ;;  %5492 = vpow2.f32 %v924_v60  ;;  %v892_v13 = vsub.f32 %v6032_v57, %v862_v10 }
 0x573   :  { %v6074_v63 = vpop.eup %5488  ;;  %v906_v15 = vmul.f32 1.442695, %v892_v13 }
 0x574   :  { %v5370_v2 = vpop.permute.xlu1 %5369  ;;  %v953_v55 = vsel %vm853_vm6, %v6074_v63, 0.0  ;;  %v877_v26 = vpop.xlane.xlu0 %876 }
 0x575   :  { %v5372_v3 = vunpack.i.h.bf16 %v5370_v2  ;;  %v5371_v4 = vunpack.i.l.bf16 %v5370_v2  ;;  %954 = vadd.xlane.f32.xlu0 %v953_v55  ;;  %5494 = vpow2.f32 %v906_v15  ;;  %v897_v28 = vsub.f32 %v6045_v56, %v877_v26 }
 0x576   :  { %5496 = vpow2.f32 %v904_v23 }
 0x577   :  { %v6078_v53 = vpop.eup %5490  ;;  %v5174_v5 = vpack.c.bf16 %v5372_v3, %v5371_v4 }
 0x578   :  { %v956_v7 = vsel %vm853_vm6, %v6078_v53, 0.0 }
 0x579   :  { %5175 = vmatpush3.bf16.msra.mxu0 %v5174_v5  ;;  %5319 = vmatpush3.bf16.msra.mxu1 %v5174_v5 }
 0x57a   :  { %957 = vadd.xlane.f32.xlu0 %v956_v7  ;;  %4770 = vmatprep.subr.mxu0 %v5695_v24 }
 0x57b   :  { %5318 = vmatprep.subr.mxu1 %v5695_v24  ;;  %v6084_v11 = vpop.eup %5492 }
 0x57c   :  { %v959_v9 = vsel %vm853_vm6, %v6084_v11, 0.0 }
 0x57e   :  { %960 = vadd.xlane.f32.xlu0 %v959_v9 }
 0x57f   :  { %v6103_v57 = vpop.eup %5494 }
 0x580   :  { %v6105_v50 = vpop.eup %5496 }
 0x581   :  { %v929_v37 = vsel %vm853_vm6, %v6105_v50, 0.0 }
 0x582   :  { %5374 = vrot.lane.b32.xlu1 %v5895_v20, %s5698_s11  ;;  %v896_v20 = vsub.f32 %v6038_v61, %v874_v47  ;;  %v932_v61 = vsel %vm853_vm6, %v6103_v57, 0.0 }
 0x584   :  { %v914_v27 = vmul.f32 1.442695, %v896_v20 }
 0x586   :  { %1088 = vrot.lane.b32.xlu1 %v5905_v25, %s5698_s11  ;;  %5498 = vpow2.f32 %v914_v27 }
 0x58a   :  { %5379 = vrot.lane.b32.xlu1 %v5917_v30, %s5698_s11 }
 0x58e   :  { %1299 = vrot.lane.b32.xlu1 %v5926_v32, %s5698_s11 }
 0x590   :  { %v6111_v56 = vpop.eup %5498 }
 0x591   :  { %v944_v44 = vsel %vm853_vm6, %v6111_v56, 0.0 }
 0x594   :  { %990 = vrot.lane.b32.xlu0 %v5905_v25, %s5690_s30  ;;  %v916_v25 = vmul.f32 1.442695, %v897_v28 }
 0x5a5   :  { %v880_v29 = vpop.xlane.xlu1 %879 }
 0x5a6   :  { %v898_v35 = vsub.f32 %v6052_v0, %v880_v29 }
 0x5a8   :  { %v918_v36 = vmul.f32 1.442695, %v898_v35 }
 0x5aa   :  { %5500 = vpow2.f32 %v918_v36 }
 0x5ab   :  { %5502 = vpow2.f32 %v916_v25 }
 0x5b2   :  { %933 = vadd.xlane.f32.xlu1 %v932_v61 }
 0x5b3   :  { %930 = vadd.xlane.f32.xlu0 %v929_v37 }
 0x5b4   :  { %v6113_v0 = vpop.eup %5500 }
 0x5b5   :  { %v950_v39 = vsel %vm853_vm6, %v6113_v0, 0.0  ;;  %v6119_v8 = vpop.eup %5502 }
 0x5b6   :  { %951 = vadd.xlane.f32.xlu1 %v950_v39  ;;  %v947_v45 = vsel %vm853_vm6, %v6119_v8, 0.0 }
 0x5b7   :  { %945 = vadd.xlane.f32.xlu0 %v944_v44 }
 0x5bb   :  { %948 = vadd.xlane.f32.xlu0 %v947_v45 }
 0x5c7   :  { %1201 = vrot.lane.b32.xlu1 %v5926_v32, %s5690_s30 }
 0x5cb   :  { %5389 = vrot.lane.b32.xlu1 %v5388_v19, %s5699_s12 }
 0x5d1   :  { %5384 = vrot.lane.b32.xlu0 %v5917_v30, %s5690_s30 }
 0x5f6   :  { %v928_v16 = vpop.xlane.xlu0 %927 }
 0x5f7   :  { %v937_v49 = vpop.xlane.xlu1 %936  ;;  %5504 = vrcp.f32 %v928_v16 }
 0x5f8   :  { %5506 = vrcp.f32 %v937_v49 }
 0x5fa   :  { %v940_v51 = vpop.xlane.xlu0 %939 }
 0x5fb   :  { %5508 = vrcp.f32 %v940_v51 }
 0x5fe   :  { %v943_v41 = vpop.xlane.xlu1 %942 }
 0x5ff   :  { %5510 = vrcp.f32 %v943_v41 }
 0x601   :  { %v5505_v47 = vpop.eup %5504 }
 0x602   :  { %v955_v52 = vpop.xlane.xlu0 %954  ;;  %v5375_v54 = vpop.permute.xlu1 %5374  ;;  %v974_v2 = vmul.f32 %v5505_v47, %v6058_v43 }
 0x603   :  { %v5377_v30 = vunpack.i.h.bf16 %v5375_v54  ;;  %v5376_v62 = vunpack.i.l.bf16 %v5375_v54  ;;  %v5507_v19 = vpop.eup %5506  ;;  %5512 = vrcp.f32 %v955_v52 }
 0x604   :  { %v977_v43 = vmul.f32 %v5507_v19, %v6060_v1 }
 0x605   :  { %v5177_v18 = vpack.c.bf16 %v5377_v30, %v5376_v62  ;;  %v5509_v5 = vpop.eup %5508 }
 0x606   :  { %v1089_v60 = vpop.permute.xlu1 %1088  ;;  %v978_v9 = vmul.f32 %v5509_v5, %v6066_v33 }
 0x607   :  { %v958_v58 = vpop.xlane.xlu0 %957 }
 0x608   :  { %5514 = vrcp.f32 %v958_v58 }
 0x609   :  { %v5511_v10 = vpop.eup %5510 }
 0x60a   :  { %v5380_v55 = vpop.permute.xlu1 %5379  ;;  %v979_v1 = vmul.f32 %v5511_v10, %v6070_v59 }
 0x60b   :  { %v961_v32 = vpop.xlane.xlu0 %960  ;;  %v5382_v3 = vunpack.i.h.bf16 %v5380_v55  ;;  %v5381_v4 = vunpack.i.l.bf16 %v5380_v55 }
 0x60c   :  { %5516 = vrcp.f32 %v961_v32 }
 0x60d   :  { %v5183_v7 = vpack.c.bf16 %v5382_v3, %v5381_v4  ;;  %v5513_v14 = vpop.eup %5512 }
 0x60e   :  { %v1300_v13 = vpop.permute.xlu1 %1299  ;;  %v983_v33 = vmul.f32 %v5513_v14, %v6074_v63 }
 0x60f   :  { %v991_v17 = vpop.permute.xlu0 %990 }
 0x610   :  { %4771 = vmatpush3.msra.mxu0 %v991_v17  ;;  %5320 = vmatpush3.msra.mxu1 %v991_v17 }
 0x611   :  { %4773 = vmatmul.mubr.msk.f32.vlgmr.msra.gmra.mrb[18].mxu0 %vm853_vm6, %v974_v2  ;;  %5176 = vmatprep.subr.bf16.mxu0 %v5692_v12 }
 0x612   :  { %5178 = vmatpush3.bf16.msra.mxu0 %v5177_v18  ;;  %4787 = vmatprep.mubr.msk.f32.mxu0 %vm5694_vm2, %v5695_v24  ;;  %v5515_v15 = vpop.eup %5514 }
 0x613   :  { %4785 = vmatprep.subr.mxu0 %v5695_v24  ;;  %5179 = vmatprep.subr.bf16.mxu1 %v5692_v12  ;;  %v984_v23 = vmul.f32 %v5515_v15, %v6078_v53 }
 0x616   :  { %4786 = vmatpush3.msra.mxu0 %v1089_v60  ;;  %v5517_v20 = vpop.eup %5516 }
 0x617   :  { %4788 = vmatmul.mubr.msk.f32.vlgmr.msra.gmra.mrb[20].mxu0 %vm853_vm6, %v977_v43  ;;  %5182 = vmatprep.subr.bf16.mxu0 %v5692_v12  ;;  %v985_v59 = vmul.f32 %v5517_v20, %v6084_v11 }
 0x618   :  { %5184 = vmatpush3.bf16.msra.mxu0 %v5183_v7  ;;  %4790 = vmatprep.mubr.msk.f32.mxu0 %vm5694_vm2, %v5695_v24 }
 0x619   :  { %4815 = vmatprep.subr.mxu0 %v5695_v24 }
 0x61b   :  { %4791 = vmatmul.mubr.msk.f32.gmra.mrb[22].mxu0 %vm853_vm6, %v978_v9 }
 0x61c   :  { %4816 = vmatpush3.msra.mxu0 %v1300_v13  ;;  %4793 = vmatprep.mubr.msk.f32.mxu0 %vm5694_vm2, %v5695_v24 }
 0x61f   :  { %4794 = vmatmul.mubr.msk.f32.gmra.mrb[24].mxu0 %vm853_vm6, %v979_v1 }
 0x620   :  { %4817 = vmatprep.mubr.msk.f32.mxu0 %vm5694_vm2, %v5695_v24 }
 0x623   :  { %4818 = vmatmul.mubr.msk.f32.vlgmr.msra.gmra.mrb[26].mxu0 %vm853_vm6, %v983_v33 }
 0x624   :  { %4820 = vmatprep.mubr.msk.f32.mxu0 %vm5694_vm2, %v5695_v24 }
 0x627   :  { %4821 = vmatmul.mubr.msk.f32.gmra.mrb[28].mxu0 %vm853_vm6, %v984_v23 }
 0x628   :  { %4823 = vmatprep.mubr.msk.f32.mxu0 %vm5694_vm2, %v5695_v24 }
 0x62b   :  { %4824 = vmatmul.mubr.msk.f32.gmra.mrb[30].mxu0 %vm853_vm6, %v985_v59 }
 0x63f   :  { %v934_v26 = vpop.xlane.xlu1 %933 }
 0x640   :  { %v931_v63 = vpop.xlane.xlu0 %930 }
 0x641   :  { %5518 = vrcp.f32 %v931_v63 }
 0x642   :  { %5520 = vrcp.f32 %v934_v26 }
 0x643   :  { %v952_v35 = vpop.xlane.xlu1 %951 }
 0x644   :  { %v946_v27 = vpop.xlane.xlu0 %945 }
 0x645   :  { %5522 = vrcp.f32 %v946_v27 }
 0x647   :  { %v1202_v45 = vpop.permute.xlu1 %1201 }
 0x648   :  { %v949_v28 = vpop.xlane.xlu0 %948 }
 0x649   :  { %5524 = vrcp.f32 %v949_v28 }
 0x64a   :  { %5526 = vrcp.f32 %v952_v35 }
 0x64b   :  { %v5519_v29 = vpop.eup %5518  ;;  %v5390_v41 = vpop.permute.xlu1 %5389 }
 0x64c   :  { %v975_v53 = vmul.f32 %v5519_v29, %v6105_v50  ;;  %v5385_v36 = vpop.permute.xlu0 %5384  ;;  %v5521_v25 = vpop.eup %5520  ;;  %v5392_v52 = vunpack.i.h.bf16 %v5390_v41  ;;  %v5391_v54 = vunpack.i.l.bf16 %v5390_v41 }
 0x64d   :  { %v5387_v61 = vunpack.i.h.bf16 %v5385_v36  ;;  %v5386_v37 = vunpack.i.l.bf16 %v5385_v36  ;;  %v976_v39 = vmul.f32 %v5521_v25, %v6103_v57 }
 0x64e   :  { %4776 = vmatmul.mubr.msk.f32.vlgmr.msra.gmra.mrb[18].mxu1 %vm853_vm6, %v975_v53  ;;  %v5185_v58 = vpack.c.bf16 %v5392_v52, %v5391_v54 }
 0x64f   :  { %v5180_v11 = vpack.c.bf16 %v5387_v61, %v5386_v37  ;;  %4778 = vmatprep.mubr.msk.f32.mxu1 %vm5694_vm2, %v5695_v24  ;;  %v5523_v44 = vpop.eup %5522 }
 0x650   :  { %v980_v50 = vmul.f32 %v5523_v44, %v6111_v56  ;;  %v5393_v56 = vpack.i.bf16 %v5865_v22, %v5860_v21 }
 0x651   :  { %5181 = vmatpush3.bf16.msra.mxu1 %v5180_v11  ;;  %v4338_v11 = vld [vmem:[%s7064_s3 + $0x3] ss:$0 sm:$0xff] }
 0x652   :  { %4779 = vmatmul.mubr.msk.f32.gmra.mrb[20].mxu1 %vm853_vm6, %v976_v39  ;;  %4800 = vmatprep.subr.mxu1 %v5695_v24 }
 0x653   :  { %4802 = vmatprep.mubr.msk.f32.mxu1 %vm5694_vm2, %v5695_v24  ;;  %v5525_v16 = vpop.eup %5524  ;;  %5394 = vrot.lane.b32.xlu0 %v5393_v56, %s5699_s12 }
 0x654   :  { %v981_v57 = vmul.f32 %v5525_v16, %v6119_v8  ;;  %v5527_v49 = vpop.eup %5526 }
 0x655   :  { %4801 = vmatpush3.msra.mxu1 %v1202_v45  ;;  %v982_v51 = vmul.f32 %v5527_v49, %v6113_v0 }
 0x656   :  { %4803 = vmatmul.mubr.msk.f32.vlgmr.msra.gmra.mrb[22].mxu1 %vm853_vm6, %v980_v50  ;;  %5186 = vmatprep.subr.bf16.mxu1 %v5185_v58 }
 0x657   :  { %4805 = vmatprep.mubr.msk.f32.mxu1 %vm5694_vm2, %v5695_v24  ;;  %5188 = vmatpush3.bf16.msra.mxu1 %v5185_v58 }
 0x65a   :  { %4806 = vmatmul.mubr.msk.f32.gmra.mrb[24].mxu1 %vm853_vm6, %v981_v57 }
 0x65b   :  { %4808 = vmatprep.mubr.msk.f32.mxu1 %vm5694_vm2, %v5695_v24 }
 0x65e   :  { %4809 = vmatmul.mubr.msk.f32.gmra.mrb[26].mxu1 %vm853_vm6, %v982_v51 }
 0x6c5   :  { %v5395_v8 = vpop.permute.xlu0 %5394 }
 0x6c6   :  { %v5397_v60 = vunpack.i.h.bf16 %v5395_v8  ;;  %v5396_v32 = vunpack.i.l.bf16 %v5395_v8 }
 0x6c8   :  { %v5189_v47 = vpack.c.bf16 %v5397_v60, %v5396_v32 }
 0x6ca   :  { %5190 = vmatprep.subr.bf16.mxu1 %v5189_v47 }
 0x6cb   :  { %5192 = vmatpush3.bf16.msra.mxu1 %v5189_v47 }
 0x6e4   :  { %v1070_v0 = vpop.f32.mrb[18].mxu0 }
 0x6e5   :  { %v4774_v30 = vpop.f32.mrb[19].mxu0 }
 0x6ea   :  { %v1168_v62 = vpop.f32.mrb[20].mxu0 }
 0x6eb   :  { %1185 = vrot.lane.b32.xlu1 %v1168_v62, %s5700_s13  ;;  %v4789_v21 = vpop.f32.mrb[21].mxu0 }
 0x6ee   :  { %v1173_v22 = vpop.f32.mrb[22].mxu0 }
 0x6ef   :  { %1187 = vrot.lane.b32.xlu0 %v1173_v22, %s5700_s13  ;;  %v4792_v2 = vpop.f32.mrb[23].mxu0 }
 0x6f2   :  { %v1178_v55 = vpop.f32.mrb[24].mxu0 }
 0x6f3   :  { %1189 = vrot.lane.b32.xlu1 %v1178_v55, %s5700_s13  ;;  %v4795_v17 = vpop.f32.mrb[25].mxu0 }
 0x6f6   :  { %v1379_v18 = vpop.f32.mrb[26].mxu0 }
 0x6f7   :  { %1396 = vrot.lane.b32.xlu0 %v1379_v18, %s5700_s13  ;;  %v4819_v19 = vpop.f32.mrb[27].mxu0 }
 0x6fa   :  { %v1384_v3 = vpop.f32.mrb[28].mxu0 }
 0x6fb   :  { %1398 = vrot.lane.b32.xlu1 %v1384_v3, %s5700_s13  ;;  %v4822_v4 = vpop.f32.mrb[29].mxu0 }
 0x6fe   :  { %v1389_v43 = vpop.f32.mrb[30].mxu0 }
 0x6ff   :  { %1400 = vrot.lane.b32.xlu0 %v1389_v43, %s5700_s13  ;;  %v4825_v5 = vpop.f32.mrb[31].mxu0 }
 0x721   :  { %v1075_v7 = vpop.f32.mrb[18].mxu1 }
 0x722   :  { %v4777_v9 = vpop.f32.mrb[19].mxu1 }
 0x725   :  { %v1080_v10 = vpop.f32.mrb[20].mxu1 }
 0x726   :  { %v4780_v13 = vpop.f32.mrb[21].mxu1 }
 0x729   :  { %v1281_v1 = vpop.f32.mrb[22].mxu1 }
 0x72a   :  { %v4804_v14 = vpop.f32.mrb[23].mxu1 }
 0x72d   :  { %v1286_v33 = vpop.f32.mrb[24].mxu1 }
 0x72e   :  { %v4807_v15 = vpop.f32.mrb[25].mxu1 }
 0x731   :  { %v1291_v23 = vpop.f32.mrb[26].mxu1 }
 0x732   :  { %v4810_v20 = vpop.f32.mrb[27].mxu1 }
 0x75d   :  { %v1186_v59 = vpop.permute.xlu1 %1185 }
 0x75e   :  { %v1194_v26 = vsel %vm439_vm3, %v1070_v0, %v1186_v59 }
 0x75f   :  { %4834 = vmatprep.mubr.msk.f32.mxu1 %vm213_vm1, %v1194_v26 }
 0x761   :  { %v1188_v63 = vpop.permute.xlu0 %1187 }
 0x762   :  { %v1195_v27 = vsel %vm439_vm3, %v1075_v7, %v1188_v63 }
 0x763   :  { %4835 = vmatmul.mubr.msk.f32.vlgmr.msra.gmra.mrb[28].mxu1 %vm213_vm1, %v1195_v27 }
 0x765   :  { %v1190_v28 = vpop.permute.xlu1 %1189 }
 0x766   :  { %v1196_v29 = vsel %vm439_vm3, %v1080_v10, %v1190_v28 }
 0x767   :  { %4837 = vmatprep.mubr.msk.f32.mxu1 %vm213_vm1, %v1196_v29 }
 0x769   :  { %v1397_v53 = vpop.permute.xlu0 %1396 }
 0x76a   :  { %v1405_v35 = vsel %vm439_vm3, %v1281_v1, %v1397_v53 }
 0x76b   :  { %4838 = vmatmul.mubr.msk.f32.gmra.mrb[30].mxu1 %vm213_vm1, %v1405_v35  ;;  %v197_v35 = vld [vmem:[%s7063_s2 + $0x8] sm:$0xff] }
 0x76d   :  { %v1399_v36 = vpop.permute.xlu1 %1398 }
 0x76e   :  { %v1406_v25 = vsel %vm439_vm3, %v1286_v33, %v1399_v36  ;;  %v198_v36 = vld [vmem:[%s7063_s2 + $0x20] sm:$0xff] }
 0x76f   :  { %4840 = vmatprep.mubr.msk.f32.mxu1 %vm213_vm1, %v1406_v25  ;;  %v5193_v25 = vpack.c.bf16 %v198_v36, %v197_v35 }
 0x771   :  { %v1401_v61 = vpop.permute.xlu0 %1400  ;;  %5194 = vmatprep.subr.bf16.mxu0 %v5193_v25 }
 0x772   :  { %v1407_v37 = vsel %vm439_vm3, %v1291_v23, %v1401_v61  ;;  %5196 = vmatpush3.bf16.msra.mxu0 %v5193_v25  ;;  %v199_v61 = vld [vmem:[%s7063_s2 + $0x38] sm:$0xff]  ;;  %v4341_v25 = vld [vmem:[%s7064_s3 + $0x6] ss:$0 sm:$0xff] }
 0x773   :  { %4841 = vmatmul.mubr.msk.f32.gmra.mrb[32].mxu1 %vm213_vm1, %v1407_v37  ;;  %v200_v37 = vld [vmem:[%s7063_s2 + $0x50] sm:$0xff] }
 0x836   :  { %v4836_v39 = vpop.f32.mrb[28].mxu1 }
 0x837   :  { %v1538_v44 = vadd.f32 %v4836_v39, %v5783_v31  ;;  %v1508_v50 = vpop.f32.mrb[29].mxu1 }
 0x838   :  { %v1537_v45 = vadd.f32 %v1508_v50, %v5785_v34 }
 0x839   :  { %v6207_v16 = vadd.f32 %v4338_v11, %v1538_v44 }
 0x83a   :  { %v6209_v57 = vadd.f32 %v4338_v11, %v1537_v45 }
 0x83b   :  { %v1556_v49 = vsel %vm213_vm1, %v6207_v16, 0.0 }
 0x83c   :  { %1557 = vadd.xlane.f32.xlu0 %v1556_v49  ;;  %v1553_v51 = vsel %vm213_vm1, %v6209_v57, 0.0 }
 0x83d   :  { %1554 = vadd.xlane.f32.xlu1 %v1553_v51 }
 0x83e   :  { %v4839_v56 = vpop.f32.mrb[30].mxu1 }
 0x83f   :  { %v1540_v41 = vadd.f32 %v4839_v56, %v5791_v38  ;;  %v1518_v52 = vpop.f32.mrb[31].mxu1 }
 0x840   :  { %v1539_v31 = vadd.f32 %v1518_v52, %v5793_v40 }
 0x841   :  { %v6217_v54 = vadd.f32 %v4338_v11, %v1540_v41 }
 0x842   :  { %v6219_v34 = vadd.f32 %v4338_v11, %v1539_v31 }
 0x843   :  { %v1562_v58 = vsel %vm213_vm1, %v6217_v54, 0.0 }
 0x844   :  { %1563 = vadd.xlane.f32.xlu1 %v1562_v58  ;;  %v1559_v8 = vsel %vm213_vm1, %v6219_v34, 0.0 }
 0x845   :  { %1560 = vadd.xlane.f32.xlu0 %v1559_v8 }
 0x846   :  { %v4842_v60 = vpop.f32.mrb[32].mxu1 }
 0x847   :  { %v1542_v32 = vadd.f32 %v4842_v60, %v5799_v46  ;;  %v1528_v47 = vpop.f32.mrb[33].mxu1 }
 0x848   :  { %v1541_v38 = vadd.f32 %v1528_v47, %v5801_v48 }
 0x849   :  { %v6227_v0 = vadd.f32 %v4338_v11, %v1542_v32  ;;  %v4339_v32 = vld [vmem:[%s7064_s3 + $0x4] ss:$0 sm:$0xff] }
 0x84a   :  { %v6229_v40 = vadd.f32 %v4338_v11, %v1541_v38  ;;  %v5197_v11 = vpack.c.bf16 %v200_v37, %v199_v61 }
 0x84b   :  { %v1568_v30 = vsel %vm213_vm1, %v6227_v0, 0.0 }
 0x84c   :  { %1569 = vadd.xlane.f32.xlu1 %v1568_v30  ;;  %v1565_v62 = vsel %vm213_vm1, %v6229_v40, 0.0  ;;  %5198 = vmatprep.subr.bf16.mxu0 %v5197_v11 }
 0x84d   :  { %1566 = vadd.xlane.f32.xlu0 %v1565_v62  ;;  %5200 = vmatpush3.bf16.msra.mxu0 %v5197_v11 }
 0x8c9   :  { %v1558_v21 = vpop.xlane.xlu0 %1557 }
 0x8ca   :  { %v1572_v22 = vmul.f32 0.03125, %v1558_v21  ;;  %v1555_v2 = vpop.xlane.xlu1 %1554 }
 0x8cb   :  { %v1571_v55 = vmul.f32 0.03125, %v1555_v2  ;;  %v4340_v2 = vld [vmem:[%s7064_s3 + $0x5] ss:$0 sm:$0xff] }
 0x8cc   :  { %v1578_v46 = vsub.f32 %v6207_v16, %v1572_v22 }
 0x8cd   :  { %v6237_v48 = vsub.f32 %v6209_v57, %v1571_v55 }
 0x8ce   :  { %v1584_v17 = vmul.f32 %v1578_v46, %v1578_v46 }
 0x8cf   :  { %v1583_v18 = vmul.f32 %v6237_v48, %v6237_v48 }
 0x8d0   :  { %v1592_v19 = vsel %vm213_vm1, %v1584_v17, 0.0 }
 0x8d1   :  { %v1564_v3 = vpop.xlane.xlu1 %1563  ;;  %1593 = vadd.xlane.f32.xlu1 %v1592_v19  ;;  %v1589_v4 = vsel %vm213_vm1, %v1583_v18, 0.0 }
 0x8d2   :  { %v1574_v43 = vmul.f32 0.03125, %v1564_v3  ;;  %1590 = vadd.xlane.f32.xlu0 %v1589_v4  ;;  %v1561_v5 = vpop.xlane.xlu0 %1560 }
 0x8d3   :  { %v1573_v7 = vmul.f32 0.03125, %v1561_v5 }
 0x8d4   :  { %v6244_v9 = vsub.f32 %v6217_v54, %v1574_v43 }
 0x8d5   :  { %v6247_v10 = vsub.f32 %v6219_v34, %v1573_v7 }
 0x8d6   :  { %v1586_v13 = vmul.f32 %v6244_v9, %v6244_v9 }
 0x8d7   :  { %v1585_v1 = vmul.f32 %v6247_v10, %v6247_v10 }
 0x8d8   :  { %v1598_v14 = vsel %vm213_vm1, %v1586_v13, 0.0 }
 0x8d9   :  { %v1570_v33 = vpop.xlane.xlu1 %1569  ;;  %1599 = vadd.xlane.f32.xlu1 %v1598_v14  ;;  %v1595_v15 = vsel %vm213_vm1, %v1585_v1, 0.0 }
 0x8da   :  { %v1576_v23 = vmul.f32 0.03125, %v1570_v33  ;;  %1596 = vadd.xlane.f32.xlu0 %v1595_v15  ;;  %v1567_v20 = vpop.xlane.xlu0 %1566 }
 0x8db   :  { %v1575_v59 = vmul.f32 0.03125, %v1567_v20 }
 0x8dc   :  { %v6256_v26 = vsub.f32 %v6227_v0, %v1576_v23 }
 0x8dd   :  { %v6259_v63 = vsub.f32 %v6229_v40, %v1575_v59 }
 0x8de   :  { %v1588_v27 = vmul.f32 %v6256_v26, %v6256_v26 }
 0x8df   :  { %v1587_v28 = vmul.f32 %v6259_v63, %v6259_v63 }
 0x8e0   :  { %v1604_v29 = vsel %vm213_vm1, %v1588_v27, 0.0 }
 0x8e1   :  { %1605 = vadd.xlane.f32.xlu1 %v1604_v29  ;;  %v1601_v53 = vsel %vm213_vm1, %v1587_v28, 0.0 }
 0x8e2   :  { %1602 = vadd.xlane.f32.xlu0 %v1601_v53  ;;  %v202_v53 = vld [vmem:[%s7063_s2 + $0x28] sm:$0xff] }
 0x95e   :  { %v1594_v39 = vpop.xlane.xlu1 %1593 }
 0x95f   :  { %v1608_v44 = vmul.f32 0.03125, %v1594_v39  ;;  %v1591_v50 = vpop.xlane.xlu0 %1590 }
 0x960   :  { %v1607_v45 = vmul.f32 0.03125, %v1591_v50 }
 0x961   :  { %v1614_v49 = vadd.f32 1e-06, %v1608_v44 }
 0x962   :  { %v1613_v51 = vadd.f32 1e-06, %v1607_v45 }
 0x963   :  { %5528 = vrsqrt.f32 %v1614_v49 }
 0x964   :  { %5530 = vrsqrt.f32 %v1613_v51 }
 0x966   :  { %v1600_v56 = vpop.xlane.xlu1 %1599 }
 0x967   :  { %v1610_v41 = vmul.f32 0.03125, %v1600_v56  ;;  %v1597_v52 = vpop.xlane.xlu0 %1596 }
 0x968   :  { %v1609_v31 = vmul.f32 0.03125, %v1597_v52 }
 0x969   :  { %v1616_v58 = vadd.f32 1e-06, %v1610_v41 }
 0x96a   :  { %v1615_v8 = vadd.f32 1e-06, %v1609_v31 }
 0x96b   :  { %5532 = vrsqrt.f32 %v1616_v58 }
 0x96c   :  { %5534 = vrsqrt.f32 %v1615_v8 }
 0x96d   :  { %v5529_v60 = vpop.eup %5528 }
 0x96e   :  { %v5531_v47 = vpop.eup %5530  ;;  %v1626_v38 = vmul.f32 %v5529_v60, %v1578_v46  ;;  %v1606_v30 = vpop.xlane.xlu1 %1605 }
 0x96f   :  { %v1612_v62 = vmul.f32 0.03125, %v1606_v30  ;;  %v1603_v21 = vpop.xlane.xlu0 %1602  ;;  %v1625_v22 = vmul.f32 %v5531_v47, %v6237_v48 }
 0x970   :  { %v1636_v55 = vmul.f32 %v4339_v32, %v1626_v38  ;;  %v1611_v17 = vmul.f32 0.03125, %v1603_v21 }
 0x971   :  { %v1618_v18 = vadd.f32 1e-06, %v1612_v62  ;;  %v1635_v19 = vmul.f32 %v4339_v32, %v1625_v22 }
 0x972   :  { %v1617_v3 = vadd.f32 1e-06, %v1611_v17  ;;  %v1646_v43 = vadd.f32 %v4340_v2, %v1636_v55 }
 0x973   :  { %5536 = vrsqrt.f32 %v1618_v18  ;;  %v1645_v4 = vadd.f32 %v4340_v2, %v1635_v19 }
 0x974   :  { %5538 = vrsqrt.f32 %v1617_v3 }
 0x975   :  { %v5533_v5 = vpop.eup %5532  ;;  %4851 = vmatprep.mubr.msk.f32.mxu0 %vm213_vm1, %v1645_v4 }
 0x976   :  { %v5535_v46 = vpop.eup %5534  ;;  %4852 = vmatmul.mubr.msk.f32.vlgmr.msra.gmra.mrb[32].mxu0 %vm213_vm1, %v1646_v43  ;;  %v1628_v48 = vmul.f32 %v5533_v5, %v6244_v9 }
 0x977   :  { %v1627_v7 = vmul.f32 %v5535_v46, %v6247_v10  ;;  %v201_v10 = vld [vmem:[%s7063_s2 + $0x10] sm:$0xff] }
 0x978   :  { %v1638_v13 = vmul.f32 %v4339_v32, %v1628_v48  ;;  %v5201_v35 = vpack.c.bf16 %v202_v53, %v201_v10 }
 0x979   :  { %v1637_v1 = vmul.f32 %v4339_v32, %v1627_v7 }
 0x97a   :  { %v1648_v33 = vadd.f32 %v4340_v2, %v1638_v13  ;;  %5202 = vmatprep.subr.bf16.mxu1 %v5201_v35 }
 0x97b   :  { %v1647_v14 = vadd.f32 %v4340_v2, %v1637_v1  ;;  %5204 = vmatpush3.bf16.xpose.msra.mxu1 %v5201_v35 }
 0x97d   :  { %v5537_v15 = vpop.eup %5536  ;;  %4854 = vmatprep.mubr.msk.f32.mxu0 %vm213_vm1, %v1647_v14 }
 0x97e   :  { %v5539_v23 = vpop.eup %5538  ;;  %4855 = vmatmul.mubr.msk.f32.gmra.mrb[34].mxu0 %vm213_vm1, %v1648_v33  ;;  %v1630_v20 = vmul.f32 %v5537_v15, %v6256_v26  ;;  %v203_v26 = vld [vmem:[%s7063_s2 + $0x40] sm:$0xff] }
 0x97f   :  { %v1629_v59 = vmul.f32 %v5539_v23, %v6259_v63  ;;  %v204_v63 = vld [vmem:[%s7063_s2 + $0x58] sm:$0xff] }
 0x980   :  { %v1640_v27 = vmul.f32 %v4339_v32, %v1630_v20  ;;  %v5205_v36 = vpack.c.bf16 %v204_v63, %v203_v26 }
 0x981   :  { %v1639_v28 = vmul.f32 %v4339_v32, %v1629_v59 }
 0x982   :  { %v1650_v9 = vadd.f32 %v4340_v2, %v1640_v27  ;;  %5206 = vmatprep.subr.bf16.mxu1 %v5205_v36 }
 0x983   :  { %v1649_v29 = vadd.f32 %v4340_v2, %v1639_v28  ;;  %5208 = vmatpush3.bf16.xpose.msra.mxu1 %v5205_v36 }
 0x984   :  { %5221 = vmatprep.subr.bf16.mxu1 %v5692_v12 }
 0x985   :  { %4857 = vmatprep.mubr.msk.f32.mxu0 %vm213_vm1, %v1649_v29 }
 0x986   :  { %4858 = vmatmul.mubr.msk.f32.gmra.mrb[36].mxu0 %vm213_vm1, %v1650_v9 }
 0xa49   :  { %v4853_v61 = vpop.f32.mrb[32].mxu0 }
 0xa4a   :  { %v6312_v37 = vadd.f32 %v4853_v61, %v4341_v25  ;;  %v1739_v11 = vpop.f32.mrb[33].mxu0 }
 0xa4b   :  { %v6314_v39 = vadd.f32 %v4341_v25, %v1739_v11 }
 0xa4c   :  { %v6317_v44 = vmul.f32 0.70710677, %v6312_v37 }
 0xa4d   :  { %v6320_v50 = vmul.f32 0.70710677, %v6314_v39 }
 0xa4e   :  { %v1781_v45 = vand.u32 2147483647, %v6317_v44  ;;  %vm1901_vm7 = vcmp.lt.f32.partialorder %v6317_v44, 0.0 }
 0xa4f   :  { %v1780_v49 = vand.u32 2147483647, %v6320_v50  ;;  %vm1900_vm8 = vcmp.lt.f32.partialorder %v6320_v50, 0.0 }
 0xa50   :  { %v1787_v51 = vmul.f32 0.3275911, %v1781_v45  ;;  %v1865_v2 = vsub.f32 0.0, %v1781_v45 }
 0xa51   :  { %v1786_v56 = vmul.f32 0.3275911, %v1780_v49  ;;  %v4856_v41 = vpop.f32.mrb[34].mxu0  ;;  %v1864_v19 = vsub.f32 0.0, %v1780_v49 }
 0xa52   :  { %v1793_v52 = vadd.f32 1.0, %v1787_v51  ;;  %v6324_v31 = vadd.f32 %v4856_v41, %v4341_v25  ;;  %v1749_v58 = vpop.f32.mrb[35].mxu0  ;;  %v1871_v48 = vmul.f32 %v1865_v2, %v1781_v45 }
 0xa53   :  { %v1792_v8 = vadd.f32 1.0, %v1786_v56  ;;  %v6326_v60 = vadd.f32 %v4341_v25, %v1749_v58  ;;  %v1870_v14 = vmul.f32 %v1864_v19, %v1780_v49 }
 0xa54   :  { %5540 = vrcp.f32 %v1793_v52  ;;  %v6329_v32 = vmul.f32 0.70710677, %v6324_v31  ;;  %v1878_v29 = vmul.f32 1.442695, %v1871_v48 }
 0xa55   :  { %5542 = vrcp.f32 %v1792_v8  ;;  %v6332_v47 = vmul.f32 0.70710677, %v6326_v60  ;;  %v1876_v35 = vmul.f32 1.442695, %v1870_v14 }
 0xa56   :  { %v1783_v38 = vand.u32 2147483647, %v6329_v32  ;;  %vm1903_vm9 = vcmp.lt.f32.partialorder %v6329_v32, 0.0  ;;  %v1771_v32 = vmul.f32 0.5, %v6324_v31 }
 0xa57   :  { %v1782_v30 = vand.u32 2147483647, %v6332_v47  ;;  %vm1902_vm10 = vcmp.lt.f32.partialorder %v6332_v47, 0.0 }
 0xa58   :  { %v1789_v62 = vmul.f32 0.3275911, %v1783_v38  ;;  %v1867_v15 = vsub.f32 0.0, %v1783_v38 }
 0xa59   :  { %v1788_v21 = vmul.f32 0.3275911, %v1782_v30  ;;  %v4859_v22 = vpop.f32.mrb[36].mxu0  ;;  %v1866_v27 = vsub.f32 0.0, %v1782_v30 }
 0xa5a   :  { %v1795_v55 = vadd.f32 1.0, %v1789_v62  ;;  %v6336_v17 = vadd.f32 %v4859_v22, %v4341_v25  ;;  %v1759_v18 = vpop.f32.mrb[37].mxu0  ;;  %v1873_v63 = vmul.f32 %v1867_v15, %v1783_v38 }
 0xa5b   :  { %v1794_v3 = vadd.f32 1.0, %v1788_v21  ;;  %v6338_v4 = vadd.f32 %v4341_v25, %v1759_v18  ;;  %v1872_v61 = vmul.f32 %v1866_v27, %v1782_v30 }
 0xa5c   :  { %5544 = vrcp.f32 %v1795_v55  ;;  %v6341_v43 = vmul.f32 0.70710677, %v6336_v17  ;;  %v1882_v41 = vmul.f32 1.442695, %v1873_v63  ;;  %v1773_v31 = vmul.f32 0.5, %v6336_v17 }
 0xa5d   :  { %5546 = vrcp.f32 %v1794_v3  ;;  %v6344_v5 = vmul.f32 0.70710677, %v6338_v4  ;;  %v1880_v38 = vmul.f32 1.442695, %v1872_v61 }
 0xa5e   :  { %v5541_v46 = vpop.eup %5540  ;;  %v1785_v7 = vand.u32 2147483647, %v6341_v43  ;;  %vm1905_vm11 = vcmp.lt.f32.partialorder %v6341_v43, 0.0  ;;  %v4348_v43 = vld [vmem:[%s7064_s3 + $0x7] ss:$0 sm:$0xff] }
 0xa5f   :  { %v5543_v13 = vpop.eup %5542  ;;  %v1811_v1 = vmul.f32 1.0614054, %v5541_v46  ;;  %v1784_v33 = vand.u32 2147483647, %v6344_v5  ;;  %vm1904_vm12 = vcmp.lt.f32.partialorder %v6344_v5, 0.0 }
 0xa60   :  { %v1791_v23 = vmul.f32 0.3275911, %v1785_v7  ;;  %v1810_v20 = vmul.f32 1.0614054, %v5543_v13  ;;  %v1869_v21 = vsub.f32 0.0, %v1785_v7 }
 0xa61   :  { %v1817_v59 = vadd.f32 -1.4531521, %v1811_v1  ;;  %v1790_v28 = vmul.f32 0.3275911, %v1784_v33  ;;  %v1868_v55 = vsub.f32 0.0, %v1784_v33 }
 0xa62   :  { %v1797_v9 = vadd.f32 1.0, %v1791_v23  ;;  %v1816_v10 = vadd.f32 -1.4531521, %v1810_v20  ;;  %v1875_v15 = vmul.f32 %v1869_v21, %v1785_v7 }
 0xa63   :  { %v1823_v53 = vmul.f32 %v5541_v46, %v1817_v59  ;;  %v1796_v26 = vadd.f32 1.0, %v1790_v28  ;;  %v1874_v28 = vmul.f32 %v1868_v55, %v1784_v33 }
 0xa64   :  { %5548 = vrcp.f32 %v1797_v9  ;;  %v1822_v36 = vmul.f32 %v5543_v13, %v1816_v10  ;;  %v1886_v61 = vmul.f32 1.442695, %v1875_v15 }
 0xa65   :  { %v1829_v25 = vadd.f32 1.4214138, %v1823_v53  ;;  %5550 = vrcp.f32 %v1796_v26  ;;  %v1884_v33 = vmul.f32 1.442695, %v1874_v28 }
 0xa66   :  { %v6348_v11 = vpop.eup %5544  ;;  %5552 = vpow2.f32 %v1878_v29  ;;  %v1828_v45 = vadd.f32 1.4214138, %v1822_v36 }
 0xa67   :  { %v6350_v49 = vpop.eup %5546  ;;  %v1835_v51 = vmul.f32 %v5541_v46, %v1829_v25  ;;  %5554 = vpow2.f32 %v1876_v35  ;;  %v1813_v56 = vmul.f32 1.0614054, %v6348_v11 }
 0xa68   :  { %v1834_v52 = vmul.f32 %v5543_v13, %v1828_v45  ;;  %v1812_v58 = vmul.f32 1.0614054, %v6350_v49  ;;  %5556 = vpow2.f32 %v1882_v41 }
 0xa69   :  { %v1841_v8 = vadd.f32 -0.28449672, %v1835_v51  ;;  %v1819_v62 = vadd.f32 -1.4531521, %v1813_v56  ;;  %5558 = vpow2.f32 %v1880_v38 }
 0xa6a   :  { %v1840_v30 = vadd.f32 -0.28449672, %v1834_v52  ;;  %v1818_v22 = vadd.f32 -1.4531521, %v1812_v58  ;;  %5560 = vpow2.f32 %v1886_v61 }
 0xa6b   :  { %v1847_v2 = vmul.f32 %v5541_v46, %v1841_v8  ;;  %v1825_v18 = vmul.f32 %v6348_v11, %v1819_v62  ;;  %5562 = vpow2.f32 %v1884_v33 }
 0xa6c   :  { %v1846_v19 = vmul.f32 %v5543_v13, %v1840_v30  ;;  %v1824_v3 = vmul.f32 %v6350_v49, %v1818_v22 }
 0xa6d   :  { %v1853_v48 = vadd.f32 0.2548296, %v1847_v2  ;;  %v1831_v1 = vadd.f32 1.4214138, %v1825_v18 }
 0xa6e   :  { %v6356_v14 = vpop.eup %5548  ;;  %v1852_v23 = vadd.f32 0.2548296, %v1846_v19  ;;  %v1830_v20 = vadd.f32 1.4214138, %v1824_v3 }
 0xa6f   :  { %v6358_v59 = vpop.eup %5550  ;;  %v1859_v27 = vmul.f32 %v5541_v46, %v1853_v48  ;;  %v1837_v29 = vmul.f32 %v6348_v11, %v1831_v1  ;;  %v1815_v9 = vmul.f32 1.0614054, %v6356_v14 }
 0xa70   :  { %v5553_v10 = vpop.eup %5552  ;;  %v1858_v53 = vmul.f32 %v5543_v13, %v1852_v23  ;;  %v1836_v35 = vmul.f32 %v6350_v49, %v1830_v20  ;;  %v1814_v26 = vmul.f32 1.0614054, %v6358_v59  ;;  %v1768_v23 = vmul.f32 0.5, %v6314_v39 }
 0xa71   :  { %v5555_v63 = vpop.eup %5554  ;;  %v1889_v36 = vmul.f32 %v5553_v10, %v1859_v27  ;;  %v1843_v25 = vadd.f32 -0.28449672, %v1837_v29  ;;  %v1821_v7 = vadd.f32 -1.4531521, %v1815_v9  ;;  %v1769_v29 = vmul.f32 0.5, %v6312_v37 }
 0xa72   :  { %v1888_v45 = vmul.f32 %v5555_v63, %v1858_v53  ;;  %v1842_v51 = vadd.f32 -0.28449672, %v1836_v35  ;;  %v1820_v56 = vadd.f32 -1.4531521, %v1814_v26  ;;  %v5557_v55 = vpop.eup %5556 }
 0xa73   :  { %v1895_v46 = vsub.f32 1.0, %v1889_v36  ;;  %v1849_v41 = vmul.f32 %v6348_v11, %v1843_v25  ;;  %v1827_v52 = vmul.f32 %v6356_v14, %v1821_v7  ;;  %v5559_v3 = vpop.eup %5558 }
 0xa74   :  { %v1894_v13 = vsub.f32 1.0, %v1888_v45  ;;  %v1848_v58 = vmul.f32 %v6350_v49, %v1842_v51  ;;  %v1826_v8 = vmul.f32 %v6358_v59, %v1820_v56  ;;  %v5561_v45 = vpop.eup %5560 }
 0xa75   :  { %v1907_v38 = vsub.f32 0.0, %v1895_v46  ;;  %v1855_v62 = vadd.f32 0.2548296, %v1849_v41  ;;  %v1833_v21 = vadd.f32 1.4214138, %v1827_v52  ;;  %v5563_v33 = vpop.eup %5562  ;;  %v1770_v41 = vmul.f32 0.5, %v6326_v60 }
 0xa76   :  { %v1906_v30 = vsub.f32 0.0, %v1894_v13  ;;  %v1854_v22 = vadd.f32 0.2548296, %v1848_v58  ;;  %v1832_v2 = vadd.f32 1.4214138, %v1826_v8 }
 0xa77   :  { %v1913_v18 = vsel %vm1901_vm7, %v1907_v38, %v1895_v46  ;;  %v1861_v19 = vmul.f32 %v6348_v11, %v1855_v62  ;;  %v1839_v44 = vmul.f32 %v6356_v14, %v1833_v21  ;;  %vm4003_vm7 = vcmask 785408  }
 0xa78   :  { %v1919_v48 = vadd.f32 1.0, %v1913_v18  ;;  %v1912_v1 = vsel %vm1900_vm8, %v1906_v30, %v1894_v13  ;;  %v1860_v15 = vmul.f32 %v6350_v49, %v1854_v22  ;;  %v1838_v50 = vmul.f32 %v6358_v59, %v1832_v2 }
 0xa79   :  { %v1918_v20 = vadd.f32 1.0, %v1912_v1  ;;  %v1891_v27 = vmul.f32 %v5557_v55, %v1861_v19  ;;  %v1845_v28 = vadd.f32 -0.28449672, %v1839_v44  ;;  %v1772_v22 = vmul.f32 0.5, %v6338_v4 }
 0xa7a   :  { %v1890_v9 = vmul.f32 %v5559_v3, %v1860_v15  ;;  %v1844_v10 = vadd.f32 -0.28449672, %v1838_v50  ;;  %v1925_v26 = vmul.f32 %v1919_v48, %v1769_v29 }
 0xa7b   :  { %v1924_v53 = vmul.f32 %v1918_v20, %v1768_v23  ;;  %v1897_v11 = vsub.f32 1.0, %v1891_v27  ;;  %v1851_v35 = vmul.f32 %v6356_v14, %v1845_v28 }
 0xa7c   :  { %v1896_v63 = vsub.f32 1.0, %v1890_v9  ;;  %v1850_v36 = vmul.f32 %v6358_v59, %v1844_v10 }
 0xa7d   :  { %4868 = vmatprep.mubr.f32.mxu1 %v1924_v53  ;;  %v1909_v49 = vsub.f32 0.0, %v1897_v11  ;;  %v1857_v25 = vadd.f32 0.2548296, %v1851_v35 }
 0xa7e   :  { %4869 = vmatmul.mubr.f32.vlgmr.msra.gmra.mrb[34].mxu1 %v1925_v26  ;;  %v1908_v39 = vsub.f32 0.0, %v1896_v63  ;;  %v1856_v7 = vadd.f32 0.2548296, %v1850_v36 }
 0xa7f   :  { %v1915_v37 = vsel %vm1903_vm9, %v1909_v49, %v1897_v11  ;;  %v1863_v61 = vmul.f32 %v6356_v14, %v1857_v25 }
 0xa80   :  { %v1914_v51 = vsel %vm1902_vm10, %v1908_v39, %v1896_v63  ;;  %v1921_v56 = vadd.f32 1.0, %v1915_v37  ;;  %v1862_v46 = vmul.f32 %v6358_v59, %v1856_v7 }
 0xa81   :  { %v1920_v52 = vadd.f32 1.0, %v1914_v51  ;;  %v1893_v13 = vmul.f32 %v5561_v45, %v1863_v61 }
 0xa82   :  { %v1892_v58 = vmul.f32 %v5563_v33, %v1862_v46  ;;  %v1927_v62 = vmul.f32 %v1921_v56, %v1771_v32 }
 0xa83   :  { %v1926_v8 = vmul.f32 %v1920_v52, %v1770_v41  ;;  %v1899_v38 = vsub.f32 1.0, %v1893_v13 }
 0xa84   :  { %v1898_v47 = vsub.f32 1.0, %v1892_v58 }
 0xa85   :  { %4871 = vmatprep.mubr.f32.mxu1 %v1926_v8  ;;  %v1911_v21 = vsub.f32 0.0, %v1899_v38 }
 0xa86   :  { %4872 = vmatmul.mubr.f32.gmra.mrb[36].mxu1 %v1927_v62  ;;  %v1910_v14 = vsub.f32 0.0, %v1898_v47 }
 0xa87   :  { %v1917_v59 = vsel %vm1905_vm11, %v1911_v21, %v1899_v38 }
 0xa88   :  { %v1916_v30 = vsel %vm1904_vm12, %v1910_v14, %v1898_v47  ;;  %v1923_v60 = vadd.f32 1.0, %v1917_v59 }
 0xa89   :  { %v1922_v2 = vadd.f32 1.0, %v1916_v30 }
 0xa8a   :  { %v1929_v18 = vmul.f32 %v1923_v60, %v1773_v31 }
 0xa8b   :  { %v1928_v55 = vmul.f32 %v1922_v2, %v1772_v22  ;;  %v6462_v22 = vld [vmem:[%s7063_s2 + $0x60] sm:$0xff]  ;;  %v6467_v2 = vld [vmem:[%s7063_s2 + $0x78] sm:$0xff] }
 0xa8c   :  { %v5209_v31 = vpack.c.bf16 %v6467_v2, %v6462_v22 }
 0xa8d   :  { %4874 = vmatprep.mubr.f32.mxu1 %v1928_v55  ;;  %v6474_v55 = vld [vmem:[%s7063_s2 + $0x90] sm:$0xff] }
 0xa8e   :  { %4875 = vmatmul.mubr.f32.gmra.mrb[38].mxu1 %v1929_v18  ;;  %5210 = vmatprep.subr.bf16.mxu0 %v5209_v31  ;;  %v6479_v18 = vld [vmem:[%s7063_s2 + $0xa8] sm:$0xff] }
 0xa8f   :  { %4915 = vmatprep.mubr.msk.f32.mxu1 %vm5694_vm2, %v5695_v24  ;;  %5212 = vmatpush3.bf16.msra.mxu0 %v5209_v31 }
 0xb51   :  { %v4870_v5 = vpop.f32.mrb[34].mxu1 }
 0xb52   :  { %v2026_v19 = vadd.f32 %v4870_v5, %v6207_v16  ;;  %v1996_v44 = vpop.f32.mrb[35].mxu1  ;;  %v5438_v5 = vpack.i.bf16 %v6467_v2, %v6462_v22 }
 0xb53   :  { %v2025_v4 = vadd.f32 %v1996_v44, %v6209_v57 }
 0xb54   :  { %v6395_v3 = vadd.f32 %v4348_v43, %v2026_v19  ;;  %v5443_v19 = vpack.i.bf16 %v6479_v18, %v6474_v55 }
 0xb55   :  { %v6397_v17 = vadd.f32 %v4348_v43, %v2025_v4 }
 0xb56   :  { %v2066_v48 = vsel %vm213_vm1, %v6395_v3, 0.0 }
 0xb57   :  { %2067 = vadd.xlane.f32.xlu1 %v2066_v48  ;;  %v2063_v1 = vsel %vm213_vm1, %v6397_v17, 0.0 }
 0xb58   :  { %2064 = vadd.xlane.f32.xlu0 %v2063_v1 }
 0xb59   :  { %v4873_v15 = vpop.f32.mrb[36].mxu1 }
 0xb5a   :  { %v2028_v50 = vadd.f32 %v4873_v15, %v6217_v54  ;;  %v2006_v23 = vpop.f32.mrb[37].mxu1 }
 0xb5b   :  { %v2027_v16 = vadd.f32 %v2006_v23, %v6219_v34 }
 0xb5c   :  { %v6405_v20 = vadd.f32 %v4348_v43, %v2028_v50 }
 0xb5d   :  { %v6407_v57 = vadd.f32 %v4348_v43, %v2027_v16 }
 0xb5e   :  { %v2072_v27 = vsel %vm213_vm1, %v6405_v20, 0.0 }
 0xb5f   :  { %2073 = vadd.xlane.f32.xlu1 %v2072_v27  ;;  %v2069_v28 = vsel %vm213_vm1, %v6407_v57, 0.0 }
 0xb60   :  { %2070 = vadd.xlane.f32.xlu0 %v2069_v28 }
 0xb61   :  { %v4876_v29 = vpop.f32.mrb[38].mxu1 }
 0xb62   :  { %v2030_v9 = vadd.f32 %v4876_v29, %v6227_v0  ;;  %v2016_v10 = vpop.f32.mrb[39].mxu1 }
 0xb63   :  { %v2029_v54 = vadd.f32 %v2016_v10, %v6229_v40 }
 0xb64   :  { %v6415_v53 = vadd.f32 %v4348_v43, %v2030_v9 }
 0xb65   :  { %v6417_v34 = vadd.f32 %v4348_v43, %v2029_v54  ;;  %v5213_v43 = vpack.c.bf16 %v6479_v18, %v6474_v55  ;;  %v4369_v54 = vld [vmem:[%s7064_s3 + $0x8] ss:$0 sm:$0xff] }
 0xb66   :  { %v2078_v11 = vsel %vm213_vm1, %v6415_v53, 0.0 }
 0xb67   :  { %2079 = vadd.xlane.f32.xlu1 %v2078_v11  ;;  %v2075_v35 = vsel %vm213_vm1, %v6417_v34, 0.0  ;;  %5214 = vmatprep.subr.bf16.mxu0 %v5213_v43 }
 0xb68   :  { %2076 = vadd.xlane.f32.xlu0 %v2075_v35  ;;  %5216 = vmatpush3.bf16.msra.mxu0 %v5213_v43 }
 0xb69   :  { %5217 = vmatprep.subr.bf16.mxu0 %v5692_v12 }
 0xbe4   :  { %v2068_v26 = vpop.xlane.xlu1 %2067 }
 0xbe5   :  { %v2082_v63 = vmul.f32 0.03125, %v2068_v26  ;;  %v2065_v36 = vpop.xlane.xlu0 %2064 }
 0xbe6   :  { %v2081_v49 = vmul.f32 0.03125, %v2065_v36 }
 0xbe7   :  { %v6424_v0 = vsub.f32 %v6395_v3, %v2082_v63 }
 0xbe8   :  { %v6427_v40 = vsub.f32 %v6397_v17, %v2081_v49 }
 0xbe9   :  { %v2094_v25 = vmul.f32 %v6424_v0, %v6424_v0 }
 0xbea   :  { %v2093_v39 = vmul.f32 %v6427_v40, %v6427_v40 }
 0xbeb   :  { %v2102_v7 = vsel %vm213_vm1, %v2094_v25, 0.0  ;;  %v4370_v25 = vld [vmem:[%s7064_s3 + $0x9] ss:$0 sm:$0xff] }
 0xbec   :  { %v2074_v37 = vpop.xlane.xlu1 %2073  ;;  %2103 = vadd.xlane.f32.xlu1 %v2102_v7  ;;  %v2099_v61 = vsel %vm213_vm1, %v2093_v39, 0.0 }
 0xbed   :  { %v2084_v45 = vmul.f32 0.03125, %v2074_v37  ;;  %v2071_v51 = vpop.xlane.xlu0 %2070  ;;  %2100 = vadd.xlane.f32.xlu0 %v2099_v61 }
 0xbee   :  { %v2083_v56 = vmul.f32 0.03125, %v2071_v51 }
 0xbef   :  { %v6436_v46 = vsub.f32 %v6405_v20, %v2084_v45 }
 0xbf0   :  { %v6439_v33 = vsub.f32 %v6407_v57, %v2083_v56 }
 0xbf1   :  { %v2096_v41 = vmul.f32 %v6436_v46, %v6436_v46 }
 0xbf2   :  { %v2095_v52 = vmul.f32 %v6439_v33, %v6439_v33 }
 0xbf3   :  { %v2108_v13 = vsel %vm213_vm1, %v2096_v41, 0.0 }
 0xbf4   :  { %2109 = vadd.xlane.f32.xlu1 %v2108_v13  ;;  %v2080_v32 = vpop.xlane.xlu1 %2079  ;;  %v2105_v58 = vsel %vm213_vm1, %v2095_v52, 0.0 }
 0xbf5   :  { %v2086_v8 = vmul.f32 0.03125, %v2080_v32  ;;  %2106 = vadd.xlane.f32.xlu0 %v2105_v58  ;;  %v2077_v38 = vpop.xlane.xlu0 %2076 }
 0xbf6   :  { %v2085_v62 = vmul.f32 0.03125, %v2077_v38 }
 0xbf7   :  { %v6448_v47 = vsub.f32 %v6415_v53, %v2086_v8 }
 0xbf8   :  { %v6451_v21 = vsub.f32 %v6417_v34, %v2085_v62 }
 0xbf9   :  { %v2098_v14 = vmul.f32 %v6448_v47, %v6448_v47 }
 0xbfa   :  { %v2097_v59 = vmul.f32 %v6451_v21, %v6451_v21 }
 0xbfb   :  { %v2114_v30 = vsel %vm213_vm1, %v2098_v14, 0.0 }
 0xbfc   :  { %2115 = vadd.xlane.f32.xlu1 %v2114_v30  ;;  %v2111_v60 = vsel %vm213_vm1, %v2097_v59, 0.0 }
 0xbfd   :  { %2112 = vadd.xlane.f32.xlu0 %v2111_v60 }
 0xc79   :  { %v2104_v44 = vpop.xlane.xlu1 %2103 }
 0xc7a   :  { %v2118_v4 = vmul.f32 0.03125, %v2104_v44  ;;  %v2101_v48 = vpop.xlane.xlu0 %2100 }
 0xc7b   :  { %v2117_v1 = vmul.f32 0.03125, %v2101_v48 }
 0xc7c   :  { %v2124_v15 = vadd.f32 1e-06, %v2118_v4 }
 0xc7d   :  { %v2123_v50 = vadd.f32 1e-06, %v2117_v1 }
 0xc7e   :  { %5564 = vrsqrt.f32 %v2124_v15 }
 0xc7f   :  { %5566 = vrsqrt.f32 %v2123_v50 }
 0xc81   :  { %v2110_v23 = vpop.xlane.xlu1 %2109 }
 0xc82   :  { %v2120_v16 = vmul.f32 0.03125, %v2110_v23  ;;  %v2107_v27 = vpop.xlane.xlu0 %2106 }
 0xc83   :  { %v2119_v28 = vmul.f32 0.03125, %v2107_v27 }
 0xc84   :  { %v2126_v29 = vadd.f32 1e-06, %v2120_v16 }
 0xc85   :  { %v2125_v9 = vadd.f32 1e-06, %v2119_v28 }
 0xc86   :  { %5568 = vrsqrt.f32 %v2126_v29 }
 0xc87   :  { %5570 = vrsqrt.f32 %v2125_v9 }
 0xc88   :  { %v5565_v10 = vpop.eup %5564 }
 0xc89   :  { %v5567_v11 = vpop.eup %5566  ;;  %v2136_v35 = vmul.f32 %v5565_v10, %v6424_v0  ;;  %v2116_v26 = vpop.xlane.xlu1 %2115 }
 0xc8a   :  { %v2122_v63 = vmul.f32 0.03125, %v2116_v26  ;;  %v2113_v36 = vpop.xlane.xlu0 %2112  ;;  %v2135_v49 = vmul.f32 %v5567_v11, %v6427_v40 }
 0xc8b   :  { %v2146_v39 = vmul.f32 %v4369_v54, %v2136_v35  ;;  %v2121_v7 = vmul.f32 0.03125, %v2113_v36 }
 0xc8c   :  { %v2128_v37 = vadd.f32 1e-06, %v2122_v63  ;;  %v2145_v61 = vmul.f32 %v4369_v54, %v2135_v49 }
 0xc8d   :  { %v2127_v45 = vadd.f32 1e-06, %v2121_v7  ;;  %v2156_v56 = vadd.f32 %v4370_v25, %v2146_v39 }
 0xc8e   :  { %5572 = vrsqrt.f32 %v2128_v37  ;;  %v2155_v51 = vadd.f32 %v4370_v25, %v2145_v61 }
 0xc8f   :  { %5574 = vrsqrt.f32 %v2127_v45 }
 0xc90   :  { %v5569_v41 = vpop.eup %5568  ;;  %4885 = vmatprep.mubr.msk.f32.mxu0 %vm213_vm1, %v2155_v51 }
 0xc91   :  { %v5571_v0 = vpop.eup %5570  ;;  %4886 = vmatmul.mubr.msk.f32.vlgmr.msra.gmra.mrb[38].mxu0 %vm213_vm1, %v2156_v56  ;;  %v2138_v40 = vmul.f32 %v5569_v41, %v6436_v46 }
 0xc92   :  { %v2137_v52 = vmul.f32 %v5571_v0, %v6439_v33  ;;  %v4371_v33 = vld [vmem:[%s7064_s3 + $0xa] ss:$0 sm:$0xff] }
 0xc93   :  { %v2148_v13 = vmul.f32 %v4369_v54, %v2138_v40 }
 0xc94   :  { %v2147_v32 = vmul.f32 %v4369_v54, %v2137_v52 }
 0xc95   :  { %v2158_v8 = vadd.f32 %v4370_v25, %v2148_v13 }
 0xc96   :  { %v2157_v58 = vadd.f32 %v4370_v25, %v2147_v32 }
 0xc98   :  { %v5573_v38 = vpop.eup %5572  ;;  %4888 = vmatprep.mubr.msk.f32.mxu0 %vm213_vm1, %v2157_v58 }
 0xc99   :  { %v5575_v62 = vpop.eup %5574  ;;  %4889 = vmatmul.mubr.msk.f32.gmra.mrb[40].mxu0 %vm213_vm1, %v2158_v8  ;;  %v2140_v14 = vmul.f32 %v5573_v38, %v6448_v47 }
 0xc9a   :  { %v2139_v59 = vmul.f32 %v5575_v62, %v6451_v21 }
 0xc9b   :  { %v2150_v30 = vmul.f32 %v4369_v54, %v2140_v14 }
 0xc9c   :  { %v2149_v60 = vmul.f32 %v4369_v54, %v2139_v59 }
 0xc9d   :  { %v2160_v46 = vadd.f32 %v4370_v25, %v2150_v30 }
 0xc9e   :  { %v2159_v31 = vadd.f32 %v4370_v25, %v2149_v60 }
 0xca0   :  { %4891 = vmatprep.mubr.msk.f32.mxu0 %vm213_vm1, %v2159_v31 }
 0xca1   :  { %4892 = vmatmul.mubr.msk.f32.gmra.mrb[42].mxu0 %vm213_vm1, %v2160_v46 }
 0xca2   :  { %4900 = vmatprep.mubr.msk.f32.mxu0 %vm5694_vm2, %v5695_v24 }
 0xd64   :  { %v4887_v43 = vpop.f32.mrb[38].mxu0 }
 0xd65   :  { %v6511_v44 = vadd.f32 %v4887_v43, %v4371_v33  ;;  %v2249_v47 = vpop.f32.mrb[39].mxu0 }
 0xd66   :  { %v6513_v21 = vadd.f32 %v4371_v33, %v2249_v47 }
 0xd68   :  { %v6517_v4 = vpack.i.bf16 %v6511_v44, %v6513_v21 }
 0xd6a   :  { %5399 = vrot.lane.b32.xlu0 %v6517_v4, %s5691_s10 }
 0xd6c   :  { %v4890_v48 = vpop.f32.mrb[40].mxu0 }
 0xd6d   :  { %v2259_v1 = vpop.f32.mrb[41].mxu0  ;;  %v6529_v50 = vadd.f32 %v4890_v48, %v4371_v33 }
 0xd6e   :  { %v6521_v15 = vadd.f32 %v4371_v33, %v2259_v1  ;;  %2379 = vrot.lane.b32.xlu0 %v6513_v21, %s5696_s9 }
 0xd70   :  { %2389 = vrot.lane.b32.xlu1 %v6521_v15, %s5691_s10 }
 0xd72   :  { %2383 = vrot.lane.b32.xlu0 %v6521_v15, %s5696_s9 }
 0xd74   :  { %v4893_v23 = vpop.f32.mrb[42].mxu0 }
 0xd75   :  { %v2269_v16 = vpop.f32.mrb[43].mxu0  ;;  %v6535_v28 = vadd.f32 %v4893_v23, %v4371_v33 }
 0xd76   :  { %v6531_v27 = vadd.f32 %v4371_v33, %v2269_v16  ;;  %2584 = vrot.lane.b32.xlu0 %v6529_v50, %s5696_s9 }
 0xd78   :  { %v6539_v29 = vpack.i.bf16 %v6531_v27, %v6529_v50 }
 0xd7a   :  { %2588 = vrot.lane.b32.xlu0 %v6535_v28, %s5696_s9  ;;  %5404 = vrot.lane.b32.xlu1 %v6539_v29, %s5691_s10 }
 0xd7e   :  { %2285 = vrot.lane.b32.xlu0 %v6521_v15, %s5693_s8  ;;  %2381 = vrot.lane.b32.xlu1 %v6511_v44, %s5696_s9 }
 0xd82   :  { %2490 = vrot.lane.b32.xlu0 %v6535_v28, %s5693_s8  ;;  %2594 = vrot.lane.b32.xlu1 %v6535_v28, %s5691_s10 }
 0xd86   :  { %2586 = vrot.lane.b32.xlu1 %v6531_v27, %s5696_s9 }
 0xd8a   :  { %5409 = vrot.lane.b32.xlu1 %v6517_v4, %s5693_s8 }
 0xd8e   :  { %5414 = vrot.lane.b32.xlu1 %v6539_v29, %s5693_s8 }
 0xddc   :  { %v5400_v9 = vpop.permute.xlu0 %5399 }
 0xddd   :  { %v5402_v10 = vunpack.i.h.bf16 %v5400_v9  ;;  %v5401_v54 = vunpack.i.l.bf16 %v5400_v9 }
 0xddf   :  { %v5222_v11 = vpack.c.bf16 %v5402_v10, %v5401_v54 }
 0xde0   :  { %v2380_v26 = vpop.permute.xlu0 %2379 }
 0xde1   :  { %5224 = vmatpush3.bf16.xpose.msk.msra.mxu1 %vm5942_vm4, %v5222_v11 }
 0xde2   :  { %4913 = vmatprep.subr.mxu1 %v5695_v24  ;;  %v2390_v35 = vpop.permute.xlu1 %2389 }
 0xde4   :  { %v2384_v7 = vpop.permute.xlu0 %2383 }
 0xde8   :  { %v2585_v45 = vpop.permute.xlu0 %2584 }
 0xde9   :  { %4914 = vmatpush3.xpose.msk.msra.mxu1 %vm439_vm3, %v2390_v35 }
 0xdea   :  { %5229 = vmatprep.subr.bf16.mxu1 %v5692_v12 }
 0xdec   :  { %v5405_v63 = vpop.permute.xlu1 %5404  ;;  %4916 = vmatmul.mubr.msk.f32.vlgmr.msra.gmra.mrb[40].mxu1 %vm439_vm3, %v2380_v26  ;;  %v2589_v40 = vpop.permute.xlu0 %2588 }
 0xded   :  { %v5407_v36 = vunpack.i.h.bf16 %v5405_v63  ;;  %v5406_v49 = vunpack.i.l.bf16 %v5405_v63  ;;  %4918 = vmatprep.mubr.msk.f32.mxu1 %vm5694_vm2, %v5695_v24 }
 0xdef   :  { %v5230_v25 = vpack.c.bf16 %v5407_v36, %v5406_v49 }
 0xdf0   :  { %v2382_v39 = vpop.permute.xlu1 %2381  ;;  %v2286_v58 = vpop.permute.xlu0 %2285 }
 0xdf1   :  { %4919 = vmatmul.mubr.msk.f32.gmra.mrb[42].mxu1 %vm439_vm3, %v2382_v39 }
 0xdf2   :  { %5232 = vmatpush3.bf16.xpose.msk.msra.mxu1 %vm5942_vm4, %v5230_v25  ;;  %4921 = vmatprep.mubr.msk.f32.mxu1 %vm5694_vm2, %v5695_v24 }
 0xdf3   :  { %4943 = vmatprep.subr.mxu1 %v5695_v24 }
 0xdf4   :  { %v2595_v37 = vpop.permute.xlu1 %2594  ;;  %v2491_v38 = vpop.permute.xlu0 %2490 }
 0xdf5   :  { %4922 = vmatmul.mubr.msk.f32.gmra.mrb[44].mxu1 %vm439_vm3, %v2384_v7 }
 0xdf6   :  { %4945 = vmatprep.mubr.msk.f32.mxu1 %vm5694_vm2, %v5695_v24 }
 0xdf8   :  { %v2587_v61 = vpop.permute.xlu1 %2586 }
 0xdfa   :  { %4944 = vmatpush3.xpose.msk.msra.mxu1 %vm439_vm3, %v2595_v37 }
 0xdfb   :  { %5236 = vmatprep.subr.bf16.mxu1 %v5692_v12 }
 0xdfc   :  { %v5410_v51 = vpop.permute.xlu1 %5409 }
 0xdfd   :  { %v5412_v56 = vunpack.i.h.bf16 %v5410_v51  ;;  %v5411_v41 = vunpack.i.l.bf16 %v5410_v51  ;;  %4946 = vmatmul.mubr.msk.f32.vlgmr.msra.gmra.mrb[46].mxu1 %vm439_vm3, %v2585_v45 }
 0xdfe   :  { %4948 = vmatprep.mubr.msk.f32.mxu1 %vm5694_vm2, %v5695_v24 }
 0xdff   :  { %v5218_v0 = vpack.c.bf16 %v5412_v56, %v5411_v41 }
 0xe00   :  { %v5415_v52 = vpop.permute.xlu1 %5414 }
 0xe01   :  { %4949 = vmatmul.mubr.msk.f32.gmra.mrb[48].mxu1 %vm439_vm3, %v2587_v61  ;;  %5220 = vmatpush3.bf16.xpose.msk.msra.mxu0 %vm5942_vm4, %v5218_v0  ;;  %v5417_v13 = vunpack.i.h.bf16 %v5415_v52  ;;  %v5416_v32 = vunpack.i.l.bf16 %v5415_v52 }
 0xe02   :  { %4951 = vmatprep.mubr.msk.f32.mxu1 %vm5694_vm2, %v5695_v24  ;;  %4898 = vmatprep.subr.mxu0 %v5695_v24 }
 0xe03   :  { %v5226_v8 = vpack.c.bf16 %v5417_v13, %v5416_v32 }
 0xe05   :  { %4952 = vmatmul.mubr.msk.f32.gmra.mrb[50].mxu1 %vm439_vm3, %v2589_v40 }
 0xe06   :  { %4975 = vmatprep.mubr.msk.f32.mxu1 %vm5694_vm2, %v5695_v24 }
 0xe09   :  { %4899 = vmatpush3.xpose.msk.msra.mxu0 %vm439_vm3, %v2286_v58 }
 0xe0a   :  { %5225 = vmatprep.subr.bf16.mxu0 %v5692_v12 }
 0xe0c   :  { %4901 = vmatmul.mubr.msk.f32.vlgmr.msra.gmra.mrb[44].mxu0 %vm439_vm3, %v6513_v21 }
 0xe0d   :  { %5228 = vmatpush3.bf16.xpose.msk.msra.mxu0 %vm5942_vm4, %v5226_v8  ;;  %4903 = vmatprep.mubr.msk.f32.mxu0 %vm5694_vm2, %v5695_v24 }
 0xe0e   :  { %4928 = vmatprep.subr.mxu0 %v5695_v24 }
 0xe10   :  { %4904 = vmatmul.mubr.msk.f32.gmra.mrb[46].mxu0 %vm439_vm3, %v6511_v44 }
 0xe11   :  { %4906 = vmatprep.mubr.msk.f32.mxu0 %vm5694_vm2, %v5695_v24 }
 0xe14   :  { %4907 = vmatmul.mubr.msk.f32.gmra.mrb[48].mxu0 %vm439_vm3, %v6521_v15 }
 0xe15   :  { %4929 = vmatpush3.xpose.msk.msra.mxu0 %vm439_vm3, %v2491_v38  ;;  %4930 = vmatprep.mubr.msk.f32.mxu0 %vm5694_vm2, %v5695_v24 }
 0xe16   :  { %5233 = vmatprep.subr.bf16.mxu0 %v5692_v12 }
 0xe18   :  { %4931 = vmatmul.mubr.msk.f32.vlgmr.msra.gmra.mrb[50].mxu0 %vm439_vm3, %v6529_v50 }
 0xe19   :  { %4933 = vmatprep.mubr.msk.f32.mxu0 %vm5694_vm2, %v5695_v24 }
 0xe1c   :  { %4934 = vmatmul.mubr.msk.f32.gmra.mrb[52].mxu0 %vm439_vm3, %v6531_v27 }
 0xe1d   :  { %4936 = vmatprep.mubr.msk.f32.mxu0 %vm5694_vm2, %v5695_v24 }
 0xe20   :  { %4937 = vmatmul.mubr.msk.f32.gmra.mrb[54].mxu0 %vm439_vm3, %v6535_v28 }
 0xe21   :  { %4960 = vmatprep.mubr.msk.f32.mxu0 %vm5694_vm2, %v5695_v24 }
 0xebf   :  { %v2469_v42 = vpop.f32.mrb[40].mxu1 }
 0xec0   :  { %v2691_v62 = vadd.f32 %v2469_v42, %v6007_v6  ;;  %v4917_v14 = vpop.f32.mrb[41].mxu1 }
 0xec2   :  { %v2709_v59 = vsel %vm853_vm6, %v2691_v62, -inf }
 0xec3   :  { %2710 = vmax.xlane.f32.xlu1 %v2709_v59 }
 0xec4   :  { %v2474_v30 = vpop.f32.mrb[42].mxu1 }
 0xec5   :  { %v4920_v60 = vpop.f32.mrb[43].mxu1  ;;  %v2692_v16 = vadd.f32 %v2474_v30, %v6007_v6 }
 0xec7   :  { %v2712_v63 = vsel %vm853_vm6, %v2692_v16, -inf }
 0xec8   :  { %v2479_v31 = vpop.f32.mrb[44].mxu1 }
 0xec9   :  { %v4923_v46 = vpop.f32.mrb[45].mxu1  ;;  %v6628_v11 = vadd.f32 %v2479_v31, %v6007_v6 }
 0xecb   :  { %v2715_v39 = vsel %vm853_vm6, %v6628_v11, -inf }
 0xed0   :  { %v2674_v33 = vpop.f32.mrb[46].mxu1 }
 0xed1   :  { %v4947_v43 = vpop.f32.mrb[47].mxu1  ;;  %v6631_v35 = vadd.f32 %v2674_v33, %v6007_v6 }
 0xed3   :  { %v2727_v7 = vsel %vm853_vm6, %v6631_v35, -inf }
 0xed4   :  { %v2679_v44 = vpop.f32.mrb[48].mxu1 }
 0xed5   :  { %v4950_v47 = vpop.f32.mrb[49].mxu1  ;;  %v6644_v51 = vadd.f32 %v2679_v44, %v6007_v6 }
 0xed7   :  { %v2730_v52 = vsel %vm853_vm6, %v6644_v51, -inf }
 0xed8   :  { %v2684_v21 = vpop.f32.mrb[50].mxu1 }
 0xed9   :  { %v4953_v48 = vpop.f32.mrb[51].mxu1  ;;  %v6656_v58 = vadd.f32 %v2684_v21, %v6007_v6 }
 0xedb   :  { %v2733_v38 = vsel %vm853_vm6, %v6656_v58, -inf }
 0xedf   :  { %v2365_v1 = vpop.f32.mrb[44].mxu0 }
 0xee0   :  { %v2688_v50 = vadd.f32 %v2365_v1, %v6007_v6  ;;  %v4902_v23 = vpop.f32.mrb[45].mxu0 }
 0xee2   :  { %v2700_v27 = vsel %vm853_vm6, %v2688_v50, -inf }
 0xee3   :  { %2701 = vmax.xlane.f32.xlu0 %v2700_v27  ;;  %v2370_v9 = vpop.f32.mrb[46].mxu0 }
 0xee4   :  { %v2689_v10 = vadd.f32 %v2370_v9, %v6007_v6  ;;  %v4905_v54 = vpop.f32.mrb[47].mxu0 }
 0xee6   :  { %v2703_v26 = vsel %vm853_vm6, %v2689_v10, -inf }
 0xee7   :  { %v2375_v36 = vpop.f32.mrb[48].mxu0  ;;  %2704 = vmax.xlane.f32.xlu1 %v2703_v26  ;;  %2713 = vmax.xlane.f32.xlu0 %v2712_v63 }
 0xee8   :  { %v4908_v49 = vpop.f32.mrb[49].mxu0  ;;  %v6636_v25 = vadd.f32 %v2375_v36, %v6007_v6 }
 0xeea   :  { %v2706_v56 = vsel %vm853_vm6, %v6636_v25, -inf }
 0xeeb   :  { %v2570_v37 = vpop.f32.mrb[50].mxu0  ;;  %2716 = vmax.xlane.f32.xlu0 %v2715_v39  ;;  %2728 = vmax.xlane.f32.xlu1 %v2727_v7 }
 0xeec   :  { %v2694_v61 = vadd.f32 %v2570_v37, %v6007_v6  ;;  %v4932_v45 = vpop.f32.mrb[51].mxu0 }
 0xeee   :  { %v2718_v41 = vsel %vm853_vm6, %v2694_v61, -inf }
 0xeef   :  { %v2575_v0 = vpop.f32.mrb[52].mxu0  ;;  %2707 = vmax.xlane.f32.xlu0 %v2706_v56  ;;  %2719 = vmax.xlane.f32.xlu1 %v2718_v41 }
 0xef0   :  { %v4935_v40 = vpop.f32.mrb[53].mxu0  ;;  %v6659_v8 = vadd.f32 %v2575_v0, %v6007_v6 }
 0xef2   :  { %v2721_v42 = vsel %vm853_vm6, %v6659_v8, -inf }
 0xef3   :  { %v2580_v13 = vpop.f32.mrb[54].mxu0  ;;  %2731 = vmax.xlane.f32.xlu0 %v2730_v52 }
 0xef4   :  { %v4938_v32 = vpop.f32.mrb[55].mxu0  ;;  %v6670_v60 = vadd.f32 %v2580_v13, %v6007_v6 }
 0xef6   :  { %v2724_v31 = vsel %vm853_vm6, %v6670_v60, -inf }
 0xf00   :  { %2934 = vrot.lane.b32.xlu1 %v6521_v15, %s5698_s11 }
 0xf09   :  { %5419 = vrot.lane.b32.xlu0 %v6517_v4, %s5698_s11 }
 0xf24   :  { %2734 = vmax.xlane.f32.xlu1 %v2733_v38 }
 0xf28   :  { %2722 = vmax.xlane.f32.xlu0 %v2721_v42 }
 0xf35   :  { %5424 = vrot.lane.b32.xlu1 %v6539_v29, %s5698_s11 }
 0xf3e   :  { %3145 = vrot.lane.b32.xlu0 %v6535_v28, %s5698_s11 }
 0xf50   :  { %v2711_v14 = vpop.xlane.xlu1 %2710 }
 0xf51   :  { %v2739_v59 = vsub.f32 %v2691_v62, %v2711_v14 }
 0xf53   :  { %v2754_v30 = vmul.f32 1.442695, %v2739_v59 }
 0xf55   :  { %5576 = vpow2.f32 %v2754_v30 }
 0xf59   :  { %2725 = vmax.xlane.f32.xlu1 %v2724_v31 }
 0xf5f   :  { %v6674_v46 = vpop.eup %5576 }
 0xf60   :  { %v2781_v33 = vsel %vm853_vm6, %v6674_v46, 0.0 }
 0xf61   :  { %2782 = vadd.xlane.f32.xlu0 %v2781_v33 }
 0xf70   :  { %v2702_v43 = vpop.xlane.xlu0 %2701 }
 0xf71   :  { %v2736_v44 = vsub.f32 %v2688_v50, %v2702_v43 }
 0xf73   :  { %v2748_v47 = vmul.f32 1.442695, %v2736_v44 }
 0xf74   :  { %v2705_v21 = vpop.xlane.xlu1 %2704  ;;  %v2714_v62 = vpop.xlane.xlu0 %2713 }
 0xf75   :  { %5578 = vpow2.f32 %v2748_v47  ;;  %v2737_v48 = vsub.f32 %v2689_v10, %v2705_v21  ;;  %v2740_v6 = vsub.f32 %v2692_v16, %v2714_v62 }
 0xf77   :  { %v2750_v1 = vmul.f32 1.442695, %v2737_v48  ;;  %v2756_v23 = vmul.f32 1.442695, %v2740_v6 }
 0xf78   :  { %v2717_v27 = vpop.xlane.xlu0 %2716  ;;  %v2729_v9 = vpop.xlane.xlu1 %2728 }
 0xf79   :  { %5580 = vpow2.f32 %v2750_v1  ;;  %v2741_v54 = vsub.f32 %v6628_v11, %v2717_v27  ;;  %v2745_v26 = vsub.f32 %v6631_v35, %v2729_v9 }
 0xf7a   :  { %5582 = vpow2.f32 %v2756_v23 }
 0xf7b   :  { %v2758_v63 = vmul.f32 1.442695, %v2741_v54  ;;  %v2766_v36 = vmul.f32 1.442695, %v2745_v26 }
 0xf7c   :  { %v2708_v49 = vpop.xlane.xlu0 %2707  ;;  %v2720_v50 = vpop.xlane.xlu1 %2719 }
 0xf7d   :  { %5584 = vpow2.f32 %v2758_v63  ;;  %v2738_v39 = vsub.f32 %v6636_v25, %v2708_v49  ;;  %v2742_v7 = vsub.f32 %v2694_v61, %v2720_v50 }
 0xf7e   :  { %5586 = vpow2.f32 %v2766_v36 }
 0xf7f   :  { %v6681_v16 = vpop.eup %5578  ;;  %v2752_v10 = vmul.f32 1.442695, %v2738_v39  ;;  %v2760_v37 = vmul.f32 1.442695, %v2742_v7 }
 0xf80   :  { %v2732_v45 = vpop.xlane.xlu0 %2731  ;;  %v2772_v11 = vsel %vm853_vm6, %v6681_v16, 0.0  ;;  %v2935_v31 = vpop.permute.xlu1 %2934 }
 0xf81   :  { %5588 = vpow2.f32 %v2752_v10  ;;  %v2746_v35 = vsub.f32 %v6644_v51, %v2732_v45  ;;  %2773 = vadd.xlane.f32.xlu1 %v2772_v11 }
 0xf82   :  { %5590 = vpow2.f32 %v2760_v37 }
 0xf83   :  { %v6686_v56 = vpop.eup %5580  ;;  %v2768_v41 = vmul.f32 1.442695, %v2746_v35 }
 0xf84   :  { %v6688_v0 = vpop.eup %5582  ;;  %v5420_v25 = vpop.permute.xlu0 %5419  ;;  %v2775_v61 = vsel %vm853_vm6, %v6686_v56, 0.0 }
 0xf85   :  { %5592 = vpow2.f32 %v2768_v41  ;;  %v5422_v40 = vunpack.i.h.bf16 %v5420_v25  ;;  %v5421_v52 = vunpack.i.l.bf16 %v5420_v25  ;;  %2776 = vadd.xlane.f32.xlu0 %v2775_v61  ;;  %v2784_v13 = vsel %vm853_vm6, %v6688_v0, 0.0 }
 0xf86   :  { %2785 = vadd.xlane.f32.xlu1 %v2784_v13 }
 0xf87   :  { %v6694_v51 = vpop.eup %5584  ;;  %v5237_v32 = vpack.c.bf16 %v5422_v40, %v5421_v52 }
 0xf88   :  { %v6696_v38 = vpop.eup %5586  ;;  %v2787_v42 = vsel %vm853_vm6, %v6694_v51, 0.0 }
 0xf89   :  { %2788 = vadd.xlane.f32.xlu0 %v2787_v42  ;;  %5238 = vmatpush3.bf16.msra.mxu1 %v5237_v32  ;;  %v2799_v14 = vsel %vm853_vm6, %v6696_v38, 0.0 }
 0xf8a   :  { %2800 = vadd.xlane.f32.xlu1 %v2799_v14  ;;  %4973 = vmatprep.subr.mxu1 %v5695_v24 }
 0xf8b   :  { %v6703_v59 = vpop.eup %5588 }
 0xf8c   :  { %v6705_v30 = vpop.eup %5590  ;;  %v2778_v33 = vsel %vm853_vm6, %v6703_v59, 0.0 }
 0xf8d   :  { %2779 = vadd.xlane.f32.xlu0 %v2778_v33  ;;  %4974 = vmatpush3.msra.mxu1 %v2935_v31  ;;  %v2790_v43 = vsel %vm853_vm6, %v6705_v30, 0.0 }
 0xf8e   :  { %2791 = vadd.xlane.f32.xlu1 %v2790_v43  ;;  %5242 = vmatprep.subr.bf16.mxu1 %v5692_v12 }
 0xf8f   :  { %v6712_v44 = vpop.eup %5592 }
 0xf90   :  { %v2802_v47 = vsel %vm853_vm6, %v6712_v44, 0.0 }
 0xf91   :  { %2803 = vadd.xlane.f32.xlu0 %v2802_v47 }
 0xfa7   :  { %5429 = vrot.lane.b32.xlu0 %v6517_v4, %s5690_s30 }
 0xfb1   :  { %v2735_v21 = vpop.xlane.xlu1 %2734 }
 0xfb2   :  { %v2747_v62 = vsub.f32 %v6656_v58, %v2735_v21 }
 0xfb4   :  { %v2770_v48 = vmul.f32 1.442695, %v2747_v62 }
 0xfb5   :  { %v2723_v6 = vpop.xlane.xlu0 %2722  ;;  %v5425_v58 = vpop.permute.xlu1 %5424 }
 0xfb6   :  { %5594 = vpow2.f32 %v2770_v48  ;;  %v2743_v1 = vsub.f32 %v6659_v8, %v2723_v6  ;;  %v5426_v39 = vunpack.i.l.bf16 %v5425_v58 }
 0xfb8   :  { %v2762_v23 = vmul.f32 1.442695, %v2743_v1 }
 0xfb9   :  { %v3146_v36 = vpop.permute.xlu0 %3145 }
 0xfba   :  { %5596 = vpow2.f32 %v2762_v23 }
 0xfc0   :  { %v6720_v27 = vpop.eup %5594 }
 0xfc1   :  { %v2805_v9 = vsel %vm853_vm6, %v6720_v27, 0.0 }
 0xfc2   :  { %2806 = vadd.xlane.f32.xlu1 %v2805_v9 }
 0xfc4   :  { %v6724_v54 = vpop.eup %5596 }
 0xfc5   :  { %v2793_v4 = vsel %vm853_vm6, %v6724_v54, 0.0 }
 0xfc6   :  { %2794 = vadd.xlane.f32.xlu0 %v2793_v4 }
 0xfd3   :  { %2836 = vrot.lane.b32.xlu1 %v6521_v15, %s5690_s30 }
 0xfdc   :  { %3047 = vrot.lane.b32.xlu0 %v6535_v28, %s5690_s30  ;;  %v5427_v28 = vunpack.i.h.bf16 %v5425_v58 }
 0xfde   :  { %v5243_v18 = vpack.c.bf16 %v5427_v28, %v5426_v39 }
 0xfe0   :  { %5444 = vrot.lane.b32.xlu0 %v5443_v19, %s5699_s12 }
 0xfe6   :  { %v2726_v8 = vpop.xlane.xlu1 %2725 }
 0xfe7   :  { %v2744_v26 = vsub.f32 %v6670_v60, %v2726_v8 }
 0xfe9   :  { %v2764_v63 = vmul.f32 1.442695, %v2744_v26 }
 0xfeb   :  { %5598 = vpow2.f32 %v2764_v63 }
 0xfee   :  { %v2783_v49 = vpop.xlane.xlu0 %2782 }
 0xfef   :  { %5600 = vrcp.f32 %v2783_v49 }
 0xff5   :  { %v6737_v50 = vpop.eup %5598 }
 0xff6   :  { %v2796_v15 = vsel %vm853_vm6, %v6737_v50, 0.0 }
 0xff7   :  { %2797 = vadd.xlane.f32.xlu1 %v2796_v15 }
 0xff9   :  { %v5601_v7 = vpop.eup %5600 }
 0xffa   :  { %v2823_v55 = vmul.f32 %v5601_v7, %v6674_v46 }
 0xffc   :  { %4976 = vmatmul.mubr.msk.f32.vlgmr.msra.gmra.mrb[52].mxu1 %vm853_vm6, %v2823_v55 }
 0xffd   :  { %5244 = vmatpush3.bf16.msra.mxu1 %v5243_v18  ;;  %4978 = vmatprep.mubr.msk.f32.mxu1 %vm5694_vm2, %v5695_v24 }
 0xffe   :  { %5003 = vmatprep.subr.mxu1 %v5695_v24 }
0x1001   :  { %5004 = vmatpush3.msra.mxu1 %v3146_v36 }
0x1008   :  { %5434 = vrot.lane.b32.xlu1 %v6539_v29, %s5690_s30 }
0x100c   :  { %5439 = vrot.lane.b32.xlu1 %v5438_v5, %s5699_s12 }
0x100e   :  { %v2774_v19 = vpop.xlane.xlu1 %2773 }
0x1012   :  { %v2777_v60 = vpop.xlane.xlu0 %2776 }
0x1013   :  { %v2786_v46 = vpop.xlane.xlu1 %2785 }
0x1014   :  { %5602 = vrcp.f32 %v2786_v46 }
0x1016   :  { %v2789_v10 = vpop.xlane.xlu0 %2788 }
0x1017   :  { %5604 = vrcp.f32 %v2789_v10  ;;  %v2801_v37 = vpop.xlane.xlu1 %2800 }
0x1018   :  { %5606 = vrcp.f32 %v2801_v37 }
0x101a   :  { %v2780_v45 = vpop.xlane.xlu0 %2779 }
0x101e   :  { %v5603_v11 = vpop.eup %5602  ;;  %v2804_v35 = vpop.xlane.xlu0 %2803 }
0x101f   :  { %5608 = vrcp.f32 %v2804_v35  ;;  %v2824_v41 = vmul.f32 %v5603_v11, %v6688_v0 }
0x1020   :  { %5610 = vrcp.f32 %v2774_v19 }
0x1021   :  { %v5605_v29 = vpop.eup %5604  ;;  %4979 = vmatmul.mubr.msk.f32.gmra.mrb[54].mxu1 %vm853_vm6, %v2824_v41  ;;  %5612 = vrcp.f32 %v2777_v60 }
0x1022   :  { %v5430_v25 = vpop.permute.xlu0 %5429  ;;  %4981 = vmatprep.mubr.msk.f32.mxu1 %vm5694_vm2, %v5695_v24  ;;  %v2825_v22 = vmul.f32 %v5605_v29, %v6694_v51  ;;  %v5607_v61 = vpop.eup %5606  ;;  %5614 = vrcp.f32 %v2780_v45 }
0x1023   :  { %v5432_v2 = vunpack.i.h.bf16 %v5430_v25  ;;  %v5431_v5 = vunpack.i.l.bf16 %v5430_v25  ;;  %v2829_v0 = vmul.f32 %v5607_v61, %v6696_v38  ;;  %v2792_v51 = vpop.xlane.xlu1 %2791 }
0x1025   :  { %v5234_v40 = vpack.c.bf16 %v5432_v2, %v5431_v5  ;;  %4982 = vmatmul.mubr.msk.f32.gmra.mrb[56].mxu1 %vm853_vm6, %v2825_v22 }
0x1026   :  { %5005 = vmatprep.mubr.msk.f32.mxu1 %vm5694_vm2, %v5695_v24 }
0x1027   :  { %5235 = vmatpush3.bf16.msra.mxu0 %v5234_v40 }
0x1028   :  { %4958 = vmatprep.subr.mxu0 %v5695_v24 }
0x1029   :  { %v5609_v52 = vpop.eup %5608  ;;  %5006 = vmatmul.mubr.msk.f32.vlgmr.msra.gmra.mrb[58].mxu1 %vm853_vm6, %v2829_v0 }
0x102a   :  { %5008 = vmatprep.mubr.msk.f32.mxu1 %vm5694_vm2, %v5695_v24  ;;  %v2830_v13 = vmul.f32 %v5609_v52, %v6712_v44  ;;  %v5611_v38 = vpop.eup %5610 }
0x102b   :  { %v2820_v42 = vmul.f32 %v5611_v38, %v6681_v16  ;;  %v5613_v31 = vpop.eup %5612 }
0x102c   :  { %v2821_v33 = vmul.f32 %v5613_v31, %v6686_v56  ;;  %v5615_v43 = vpop.eup %5614 }
0x102d   :  { %5009 = vmatmul.mubr.msk.f32.gmra.mrb[60].mxu1 %vm853_vm6, %v2830_v13  ;;  %v2822_v16 = vmul.f32 %v5615_v43, %v6703_v59 }
0x102e   :  { %5011 = vmatprep.mubr.msk.f32.mxu1 %vm5694_vm2, %v5695_v24 }
0x104f   :  { %v2807_v32 = vpop.xlane.xlu1 %2806 }
0x1050   :  { %5616 = vrcp.f32 %v2807_v32 }
0x1051   :  { %5618 = vrcp.f32 %v2792_v51 }
0x1053   :  { %v2837_v14 = vpop.permute.xlu1 %2836  ;;  %v2795_v56 = vpop.xlane.xlu0 %2794 }
0x1054   :  { %4959 = vmatpush3.msra.mxu0 %v2837_v14  ;;  %5620 = vrcp.f32 %v2795_v56 }
0x1055   :  { %4961 = vmatmul.mubr.msk.f32.vlgmr.msra.gmra.mrb[56].mxu0 %vm853_vm6, %v2820_v42  ;;  %5239 = vmatprep.subr.bf16.mxu0 %v5692_v12 }
0x1056   :  { %4963 = vmatprep.mubr.msk.f32.mxu0 %vm5694_vm2, %v5695_v24 }
0x1059   :  { %4964 = vmatmul.mubr.msk.f32.gmra.mrb[58].mxu0 %vm853_vm6, %v2821_v33 }
0x105a   :  { %v5617_v44 = vpop.eup %5616  ;;  %4966 = vmatprep.mubr.msk.f32.mxu0 %vm5694_vm2, %v5695_v24 }
0x105b   :  { %v2831_v47 = vmul.f32 %v5617_v44, %v6720_v27  ;;  %v5619_v23 = vpop.eup %5618  ;;  %v3048_v27 = vpop.permute.xlu0 %3047 }
0x105c   :  { %v2826_v59 = vmul.f32 %v5619_v23, %v6705_v30 }
0x105d   :  { %4967 = vmatmul.mubr.msk.f32.gmra.mrb[60].mxu0 %vm853_vm6, %v2822_v16  ;;  %5012 = vmatmul.mubr.msk.f32.gmra.mrb[62].mxu1 %vm853_vm6, %v2831_v47 }
0x105e   :  { %4990 = vmatprep.mubr.msk.f32.mxu0 %vm5694_vm2, %v5695_v24  ;;  %v5621_v9 = vpop.eup %5620 }
0x105f   :  { %v2827_v4 = vmul.f32 %v5621_v9, %v6724_v54  ;;  %v5445_v49 = vpop.permute.xlu0 %5444 }
0x1060   :  { %v5447_v15 = vunpack.i.h.bf16 %v5445_v49  ;;  %v5446_v28 = vunpack.i.l.bf16 %v5445_v49 }
0x1062   :  { %v5249_v54 = vpack.c.bf16 %v5447_v15, %v5446_v28 }
0x1084   :  { %v2798_v21 = vpop.xlane.xlu1 %2797 }
0x1085   :  { %5622 = vrcp.f32 %v2798_v21  ;;  %v4420_v21 = vld [vmem:[%s7064_s3 + $0xb] ss:$0 sm:$0xff] }
0x1088   :  { %v5435_v62 = vpop.permute.xlu1 %5434 }
0x1089   :  { %v5437_v48 = vunpack.i.h.bf16 %v5435_v62  ;;  %v5436_v6 = vunpack.i.l.bf16 %v5435_v62 }
0x108b   :  { %v5240_v1 = vpack.c.bf16 %v5437_v48, %v5436_v6 }
0x108c   :  { %v5440_v30 = vpop.permute.xlu1 %5439 }
0x108d   :  { %5241 = vmatpush3.bf16.msra.mxu0 %v5240_v1  ;;  %v5442_v26 = vunpack.i.h.bf16 %v5440_v30  ;;  %v5441_v63 = vunpack.i.l.bf16 %v5440_v30 }
0x108e   :  { %4988 = vmatprep.subr.mxu0 %v5695_v24 }
0x108f   :  { %v5623_v58 = vpop.eup %5622  ;;  %v5245_v36 = vpack.c.bf16 %v5442_v26, %v5441_v63 }
0x1090   :  { %v2828_v8 = vmul.f32 %v5623_v58, %v6737_v50 }
0x1091   :  { %4989 = vmatpush3.msra.mxu0 %v3048_v27 }
0x1092   :  { %4991 = vmatmul.mubr.msk.f32.vlgmr.msra.gmra.mrb[62].mxu0 %vm853_vm6, %v2826_v59  ;;  %5246 = vmatprep.subr.bf16.mxu0 %v5245_v36 }
0x1093   :  { %4993 = vmatprep.mubr.msk.f32.mxu0 %vm5694_vm2, %v5695_v24  ;;  %5248 = vmatpush3.bf16.msra.mxu0 %v5245_v36 }
0x1094   :  { %5250 = vmatprep.subr.bf16.mxu0 %v5249_v54 }
0x1096   :  { %4994 = vmatmul.mubr.msk.f32.gmra.mrb[64].mxu0 %vm853_vm6, %v2827_v4 }
0x1097   :  { %4996 = vmatprep.mubr.msk.f32.mxu0 %vm5694_vm2, %v5695_v24  ;;  %5252 = vmatpush3.bf16.msra.mxu0 %v5249_v54 }
0x109a   :  { %4997 = vmatmul.mubr.msk.f32.gmra.mrb[66].mxu0 %vm853_vm6, %v2828_v8  ;;  %vm4001_vm6 = vcmask 523264  }
0x10cf   :  { %v3014_v39 = vpop.f32.mrb[52].mxu1 }
0x10d0   :  { %3031 = vrot.lane.b32.xlu1 %v3014_v39, %s5700_s13  ;;  %v4977_v7 = vpop.f32.mrb[53].mxu1 }
0x10f4   :  { %v3019_v55 = vpop.f32.mrb[54].mxu1 }
0x10f5   :  { %3033 = vrot.lane.b32.xlu0 %v3019_v55, %s5700_s13  ;;  %v4980_v50 = vpop.f32.mrb[55].mxu1 }
0x10f8   :  { %v3024_v18 = vpop.f32.mrb[56].mxu1 }
0x10f9   :  { %3035 = vrot.lane.b32.xlu1 %v3024_v18, %s5700_s13  ;;  %v4983_v19 = vpop.f32.mrb[57].mxu1 }
0x10fc   :  { %v3225_v60 = vpop.f32.mrb[58].mxu1 }
0x10fd   :  { %3242 = vrot.lane.b32.xlu0 %v3225_v60, %s5700_s13  ;;  %v5007_v46 = vpop.f32.mrb[59].mxu1 }
0x1100   :  { %v3230_v10 = vpop.f32.mrb[60].mxu1 }
0x1101   :  { %3244 = vrot.lane.b32.xlu1 %v3230_v10, %s5700_s13  ;;  %v5010_v37 = vpop.f32.mrb[61].mxu1 }
0x1128   :  { %v2916_v45 = vpop.f32.mrb[56].mxu0 }
0x1129   :  { %v4962_v11 = vpop.f32.mrb[57].mxu0 }
0x112c   :  { %v2921_v35 = vpop.f32.mrb[58].mxu0 }
0x112d   :  { %v4965_v41 = vpop.f32.mrb[59].mxu0 }
0x1130   :  { %v2926_v29 = vpop.f32.mrb[60].mxu0  ;;  %v3235_v25 = vpop.f32.mrb[62].mxu1 }
0x1131   :  { %v4968_v22 = vpop.f32.mrb[61].mxu0  ;;  %3246 = vrot.lane.b32.xlu0 %v3235_v25, %s5700_s13  ;;  %v5013_v2 = vpop.f32.mrb[63].mxu1 }
0x1142   :  { %v3032_v5 = vpop.permute.xlu1 %3031 }
0x1143   :  { %v3040_v61 = vsel %vm439_vm3, %v2916_v45, %v3032_v5 }
0x1144   :  { %5022 = vmatprep.mubr.msk.f32.mxu0 %vm213_vm1, %v3040_v61  ;;  %v4353_v61 = vld [vmem:[%s7063_s2 + $0x68] sm:$0xff] }
0x1165   :  { %v3127_v40 = vpop.f32.mrb[62].mxu0 }
0x1166   :  { %v4992_v0 = vpop.f32.mrb[63].mxu0 }
0x1167   :  { %v3034_v52 = vpop.permute.xlu0 %3033 }
0x1168   :  { %v3041_v13 = vsel %vm439_vm3, %v2921_v35, %v3034_v52  ;;  %v4355_v52 = vld [vmem:[%s7063_s2 + $0x98] sm:$0xff] }
0x1169   :  { %5023 = vmatmul.mubr.msk.f32.vlgmr.msra.gmra.mrb[68].mxu0 %vm213_vm1, %v3041_v13  ;;  %v3132_v51 = vpop.f32.mrb[64].mxu0  ;;  %v4356_v13 = vld [vmem:[%s7063_s2 + $0xb0] sm:$0xff] }
0x116a   :  { %v4995_v32 = vpop.f32.mrb[65].mxu0 }
0x116b   :  { %v3036_v38 = vpop.permute.xlu1 %3035 }
0x116c   :  { %v3042_v42 = vsel %vm439_vm3, %v2926_v29, %v3036_v38 }
0x116d   :  { %5025 = vmatprep.mubr.msk.f32.mxu0 %vm213_vm1, %v3042_v42  ;;  %v3137_v14 = vpop.f32.mrb[66].mxu0 }
0x116e   :  { %v4998_v31 = vpop.f32.mrb[67].mxu0 }
0x116f   :  { %v3243_v33 = vpop.permute.xlu0 %3242 }
0x1170   :  { %v3251_v43 = vsel %vm439_vm3, %v3127_v40, %v3243_v33  ;;  %v4354_v40 = vld [vmem:[%s7063_s2 + $0x80] sm:$0xff] }
0x1171   :  { %5026 = vmatmul.mubr.msk.f32.gmra.mrb[70].mxu0 %vm213_vm1, %v3251_v43  ;;  %v5253_v0 = vpack.c.bf16 %v4354_v40, %v4353_v61 }
0x1173   :  { %v3245_v44 = vpop.permute.xlu1 %3244  ;;  %5254 = vmatprep.subr.bf16.mxu1 %v5253_v0 }
0x1174   :  { %v3252_v16 = vsel %vm439_vm3, %v3132_v51, %v3245_v44  ;;  %5256 = vmatpush3.bf16.msra.mxu1 %v5253_v0  ;;  %v5257_v51 = vpack.c.bf16 %v4356_v13, %v4355_v52  ;;  %v4357_v13 = vld [vmem:[%s7063_s2 + $0x70] sm:$0xff] }
0x1175   :  { %5028 = vmatprep.mubr.msk.f32.mxu0 %vm213_vm1, %v3252_v16 }
0x1176   :  { %5258 = vmatprep.subr.bf16.mxu1 %v5257_v51 }
0x1178   :  { %5260 = vmatpush3.bf16.msra.mxu1 %v5257_v51  ;;  %v4358_v51 = vld [vmem:[%s7063_s2 + $0x88] sm:$0xff] }
0x11a3   :  { %v3247_v47 = vpop.permute.xlu0 %3246 }
0x11a4   :  { %v3253_v56 = vsel %vm439_vm3, %v3137_v14, %v3247_v47 }
0x11a5   :  { %5029 = vmatmul.mubr.msk.f32.gmra.mrb[72].mxu0 %vm213_vm1, %v3253_v56 }
0x123c   :  { %v5024_v62 = vpop.f32.mrb[68].mxu0 }
0x123d   :  { %v3384_v48 = vadd.f32 %v5024_v62, %v6395_v3  ;;  %v3354_v6 = vpop.f32.mrb[69].mxu0 }
0x123e   :  { %v3383_v1 = vadd.f32 %v3354_v6, %v6397_v17 }
0x123f   :  { %v6818_v23 = vadd.f32 %v4420_v21, %v3384_v48 }
0x1240   :  { %v6820_v59 = vadd.f32 %v4420_v21, %v3383_v1 }
0x1241   :  { %v3402_v27 = vsel %vm213_vm1, %v6818_v23, 0.0 }
0x1242   :  { %3403 = vadd.xlane.f32.xlu0 %v3402_v27  ;;  %v3399_v9 = vsel %vm213_vm1, %v6820_v59, 0.0 }
0x1243   :  { %3400 = vadd.xlane.f32.xlu1 %v3399_v9 }
0x1244   :  { %v5027_v4 = vpop.f32.mrb[70].mxu0 }
0x1245   :  { %v3386_v58 = vadd.f32 %v5027_v4, %v6405_v20  ;;  %v3364_v8 = vpop.f32.mrb[71].mxu0 }
0x1246   :  { %v3385_v3 = vadd.f32 %v3364_v8, %v6407_v57 }
0x1247   :  { %v6828_v30 = vadd.f32 %v4420_v21, %v3386_v58 }
0x1248   :  { %v6830_v17 = vadd.f32 %v4420_v21, %v3385_v3 }
0x1249   :  { %v3408_v26 = vsel %vm213_vm1, %v6828_v30, 0.0 }
0x124a   :  { %3409 = vadd.xlane.f32.xlu1 %v3408_v26  ;;  %v3405_v63 = vsel %vm213_vm1, %v6830_v17, 0.0 }
0x124b   :  { %3406 = vadd.xlane.f32.xlu0 %v3405_v63  ;;  %v4421_v63 = vld [vmem:[%s7064_s3 + $0xc] ss:$0 sm:$0xff] }
0x1278   :  { %v5030_v36 = vpop.f32.mrb[72].mxu0 }
0x1279   :  { %v3388_v49 = vadd.f32 %v5030_v36, %v6415_v53  ;;  %v3374_v15 = vpop.f32.mrb[73].mxu0 }
0x127a   :  { %v3387_v20 = vadd.f32 %v3374_v15, %v6417_v34 }
0x127b   :  { %v6838_v28 = vadd.f32 %v4420_v21, %v3388_v49 }
0x127c   :  { %v6840_v57 = vadd.f32 %v4420_v21, %v3387_v20  ;;  %v4422_v20 = vld [vmem:[%s7064_s3 + $0xd] ss:$0 sm:$0xff] }
0x127d   :  { %v3414_v54 = vsel %vm213_vm1, %v6838_v28, 0.0 }
0x127e   :  { %3415 = vadd.xlane.f32.xlu1 %v3414_v54  ;;  %v3411_v39 = vsel %vm213_vm1, %v6840_v57, 0.0 }
0x127f   :  { %3412 = vadd.xlane.f32.xlu0 %v3411_v39 }
0x12cf   :  { %v3404_v7 = vpop.xlane.xlu0 %3403 }
0x12d0   :  { %v3418_v55 = vmul.f32 0.03125, %v3404_v7  ;;  %v3401_v50 = vpop.xlane.xlu1 %3400 }
0x12d1   :  { %v3417_v18 = vmul.f32 0.03125, %v3401_v50 }
0x12d2   :  { %v3424_v53 = vsub.f32 %v6818_v23, %v3418_v55 }
0x12d3   :  { %v3423_v34 = vsub.f32 %v6820_v59, %v3417_v18 }
0x12d4   :  { %v3430_v19 = vmul.f32 %v3424_v53, %v3424_v53 }
0x12d5   :  { %v3429_v60 = vmul.f32 %v3423_v34, %v3423_v34 }
0x12d6   :  { %v3438_v46 = vsel %vm213_vm1, %v3430_v19, 0.0 }
0x12d7   :  { %v3410_v10 = vpop.xlane.xlu1 %3409  ;;  %3439 = vadd.xlane.f32.xlu1 %v3438_v46  ;;  %v3435_v37 = vsel %vm213_vm1, %v3429_v60, 0.0 }
0x12d8   :  { %v3420_v45 = vmul.f32 0.03125, %v3410_v10  ;;  %3436 = vadd.xlane.f32.xlu0 %v3435_v37  ;;  %v3407_v11 = vpop.xlane.xlu0 %3406 }
0x12d9   :  { %v3419_v35 = vmul.f32 0.03125, %v3407_v11 }
0x12da   :  { %v3426_v41 = vsub.f32 %v6828_v30, %v3420_v45 }
0x12db   :  { %v3425_v29 = vsub.f32 %v6830_v17, %v3419_v35 }
0x12dc   :  { %v3432_v25 = vmul.f32 %v3426_v41, %v3426_v41 }
0x12dd   :  { %v3431_v22 = vmul.f32 %v3425_v29, %v3425_v29 }
0x12de   :  { %v3444_v2 = vsel %vm213_vm1, %v3432_v25, 0.0 }
0x12df   :  { %3445 = vadd.xlane.f32.xlu1 %v3444_v2  ;;  %v3441_v5 = vsel %vm213_vm1, %v3431_v22, 0.0 }
0x12e0   :  { %3442 = vadd.xlane.f32.xlu0 %v3441_v5 }
0x130b   :  { %v3416_v32 = vpop.xlane.xlu1 %3415 }
0x130c   :  { %v3422_v38 = vmul.f32 0.03125, %v3416_v32  ;;  %v3413_v42 = vpop.xlane.xlu0 %3412  ;;  %v5261_v32 = vpack.c.bf16 %v4358_v51, %v4357_v13 }
0x130d   :  { %v3421_v14 = vmul.f32 0.03125, %v3413_v42  ;;  %v4360_v42 = vld [vmem:[%s7063_s2 + $0xb8] sm:$0xff] }
0x130e   :  { %v3428_v31 = vsub.f32 %v6838_v28, %v3422_v38  ;;  %5262 = vmatprep.subr.bf16.mxu0 %v5261_v32  ;;  %v4359_v38 = vld [vmem:[%s7063_s2 + $0xa0] sm:$0xff] }
0x130f   :  { %v3427_v33 = vsub.f32 %v6840_v57, %v3421_v14  ;;  %5264 = vmatpush3.bf16.xpose.msra.mxu0 %v5261_v32  ;;  %v5265_v14 = vpack.c.bf16 %v4360_v42, %v4359_v38 }
0x1310   :  { %v3434_v43 = vmul.f32 %v3428_v31, %v3428_v31 }
0x1311   :  { %v3433_v44 = vmul.f32 %v3427_v33, %v3427_v33  ;;  %5266 = vmatprep.subr.bf16.mxu0 %v5265_v14 }
0x1312   :  { %v3450_v16 = vsel %vm213_vm1, %v3434_v43, 0.0 }
0x1313   :  { %3451 = vadd.xlane.f32.xlu1 %v3450_v16  ;;  %v3447_v47 = vsel %vm213_vm1, %v3433_v44, 0.0 }
0x1314   :  { %3448 = vadd.xlane.f32.xlu0 %v3447_v47 }
0x1317   :  { %5268 = vmatpush3.bf16.xpose.msra.mxu0 %v5265_v14 }
0x1318   :  { %5305 = vmatprep.subr.bf16.mxu0 %v5692_v12 }
0x1364   :  { %v3440_v56 = vpop.xlane.xlu1 %3439 }
0x1365   :  { %v3454_v21 = vmul.f32 0.03125, %v3440_v56  ;;  %v3437_v62 = vpop.xlane.xlu0 %3436 }
0x1366   :  { %v3453_v48 = vmul.f32 0.03125, %v3437_v62 }
0x1367   :  { %v3460_v6 = vadd.f32 1e-06, %v3454_v21 }
0x1368   :  { %v3459_v1 = vadd.f32 1e-06, %v3453_v48 }
0x1369   :  { %5624 = vrsqrt.f32 %v3460_v6 }
0x136a   :  { %5626 = vrsqrt.f32 %v3459_v1 }
0x136c   :  { %v3446_v27 = vpop.xlane.xlu1 %3445 }
0x136d   :  { %v3456_v9 = vmul.f32 0.03125, %v3446_v27  ;;  %v3443_v4 = vpop.xlane.xlu0 %3442 }
0x136e   :  { %v3455_v58 = vmul.f32 0.03125, %v3443_v4 }
0x136f   :  { %v3462_v8 = vadd.f32 1e-06, %v3456_v9 }
0x1370   :  { %v3461_v3 = vadd.f32 1e-06, %v3455_v58 }
0x1371   :  { %5628 = vrsqrt.f32 %v3462_v8 }
0x1372   :  { %5630 = vrsqrt.f32 %v3461_v3 }
0x1373   :  { %v5625_v26 = vpop.eup %5624 }
0x1374   :  { %v5627_v36 = vpop.eup %5626  ;;  %v3472_v49 = vmul.f32 %v5625_v26, %v3424_v53 }
0x1375   :  { %v3471_v15 = vmul.f32 %v5627_v36, %v3423_v34 }
0x1376   :  { %v3482_v54 = vmul.f32 %v4421_v63, %v3472_v49 }
0x1377   :  { %v3481_v39 = vmul.f32 %v4421_v63, %v3471_v15 }
0x1378   :  { %v3492_v55 = vadd.f32 %v4422_v20, %v3482_v54 }
0x1379   :  { %v3491_v7 = vadd.f32 %v4422_v20, %v3481_v39 }
0x137b   :  { %v5629_v50 = vpop.eup %5628  ;;  %5039 = vmatprep.mubr.msk.f32.mxu1 %vm213_vm1, %v3491_v7 }
0x137c   :  { %v5631_v18 = vpop.eup %5630  ;;  %5040 = vmatmul.mubr.msk.f32.vlgmr.msra.gmra.mrb[64].mxu1 %vm213_vm1, %v3492_v55  ;;  %v3474_v19 = vmul.f32 %v5629_v50, %v3426_v41 }
0x137d   :  { %v3473_v60 = vmul.f32 %v5631_v18, %v3425_v29 }
0x137e   :  { %v3484_v46 = vmul.f32 %v4421_v63, %v3474_v19 }
0x137f   :  { %v3483_v10 = vmul.f32 %v4421_v63, %v3473_v60 }
0x1380   :  { %v3494_v34 = vadd.f32 %v4422_v20, %v3484_v46 }
0x1381   :  { %v3493_v53 = vadd.f32 %v4422_v20, %v3483_v10 }
0x1383   :  { %5042 = vmatprep.mubr.msk.f32.mxu1 %vm213_vm1, %v3493_v53 }
0x1384   :  { %5043 = vmatmul.mubr.msk.f32.gmra.mrb[66].mxu1 %vm213_vm1, %v3494_v34 }
0x13a0   :  { %v3452_v37 = vpop.xlane.xlu1 %3451 }
0x13a1   :  { %v3458_v45 = vmul.f32 0.03125, %v3452_v37  ;;  %v3449_v11 = vpop.xlane.xlu0 %3448 }
0x13a2   :  { %v3457_v35 = vmul.f32 0.03125, %v3449_v11 }
0x13a3   :  { %v3464_v25 = vadd.f32 1e-06, %v3458_v45 }
0x13a4   :  { %v3463_v22 = vadd.f32 1e-06, %v3457_v35 }
0x13a5   :  { %5632 = vrsqrt.f32 %v3464_v25 }
0x13a6   :  { %5634 = vrsqrt.f32 %v3463_v22 }
0x13af   :  { %v5633_v2 = vpop.eup %5632 }
0x13b0   :  { %v5635_v5 = vpop.eup %5634  ;;  %v3476_v41 = vmul.f32 %v5633_v2, %v3428_v31  ;;  %v6898_v31 = vld [vmem:[%s7064_s3 + $0xe] ss:$0 sm:$0xff] }
0x13b1   :  { %v3475_v29 = vmul.f32 %v5635_v5, %v3427_v33 }
0x13b2   :  { %v3486_v61 = vmul.f32 %v4421_v63, %v3476_v41 }
0x13b3   :  { %v3485_v40 = vmul.f32 %v4421_v63, %v3475_v29 }
0x13b4   :  { %v3496_v52 = vadd.f32 %v4422_v20, %v3486_v61 }
0x13b5   :  { %v3495_v0 = vadd.f32 %v4422_v20, %v3485_v40 }
0x13b7   :  { %5045 = vmatprep.mubr.msk.f32.mxu1 %vm213_vm1, %v3495_v0 }
0x13b8   :  { %5046 = vmatmul.mubr.msk.f32.gmra.mrb[68].mxu1 %vm213_vm1, %v3496_v52 }
0x144f   :  { %v5041_v33 = vpop.f32.mrb[64].mxu1 }
0x1450   :  { %v6901_v43 = vadd.f32 %v5041_v33, %v6898_v31  ;;  %v3585_v44 = vpop.f32.mrb[65].mxu1 }
0x1451   :  { %v6904_v16 = vadd.f32 %v6898_v31, %v3585_v44 }
0x1452   :  { %v6907_v47 = vmul.f32 0.70710677, %v6901_v43 }
0x1453   :  { %v6910_v56 = vmul.f32 0.70710677, %v6904_v16 }
0x1454   :  { %v3627_v21 = vand.u32 2147483647, %v6907_v47  ;;  %vm3747_vm13 = vcmp.lt.f32.partialorder %v6907_v47, 0.0 }
0x1455   :  { %v3626_v62 = vand.u32 2147483647, %v6910_v56  ;;  %vm3746_vm14 = vcmp.lt.f32.partialorder %v6910_v56, 0.0 }
0x1456   :  { %v3633_v48 = vmul.f32 0.3275911, %v3627_v21  ;;  %v3711_v20 = vsub.f32 0.0, %v3627_v21 }
0x1457   :  { %v3632_v6 = vmul.f32 0.3275911, %v3626_v62  ;;  %v5044_v1 = vpop.f32.mrb[66].mxu1  ;;  %v3710_v39 = vsub.f32 0.0, %v3626_v62 }
0x1458   :  { %v3639_v27 = vadd.f32 1.0, %v3633_v48  ;;  %v6915_v9 = vadd.f32 %v5044_v1, %v6898_v31  ;;  %v3595_v4 = vpop.f32.mrb[67].mxu1  ;;  %v3717_v50 = vmul.f32 %v3711_v20, %v3627_v21 }
0x1459   :  { %v3638_v58 = vadd.f32 1.0, %v3632_v6  ;;  %v6918_v8 = vadd.f32 %v6898_v31, %v3595_v4  ;;  %v3716_v60 = vmul.f32 %v3710_v39, %v3626_v62 }
0x145a   :  { %5636 = vrcp.f32 %v3639_v27  ;;  %v6921_v3 = vmul.f32 0.70710677, %v6915_v9  ;;  %v3724_v53 = vmul.f32 1.442695, %v3717_v50 }
0x145b   :  { %5638 = vrcp.f32 %v3638_v58  ;;  %v6924_v26 = vmul.f32 0.70710677, %v6918_v8  ;;  %v3722_v11 = vmul.f32 1.442695, %v3716_v60 }
0x145c   :  { %v3629_v63 = vand.u32 2147483647, %v6921_v3  ;;  %vm3749_vm15 = vcmp.lt.f32.partialorder %v6921_v3, 0.0 }
0x145d   :  { %v3628_v36 = vand.u32 2147483647, %v6924_v26  ;;  %vm3748_vm3 = vcmp.lt.f32.partialorder %v6924_v26, 0.0 }
0x145e   :  { %v3635_v49 = vmul.f32 0.3275911, %v3629_v63  ;;  %v3713_v34 = vsub.f32 0.0, %v3629_v63 }
0x145f   :  { %v3634_v15 = vmul.f32 0.3275911, %v3628_v36  ;;  %v3712_v35 = vsub.f32 0.0, %v3628_v36 }
0x1460   :  { %v3641_v54 = vadd.f32 1.0, %v3635_v49  ;;  %v3719_v5 = vmul.f32 %v3713_v34, %v3629_v63 }
0x1461   :  { %v3640_v7 = vadd.f32 1.0, %v3634_v15  ;;  %v3718_v40 = vmul.f32 %v3712_v35, %v3628_v36 }
0x1462   :  { %5640 = vrcp.f32 %v3641_v54  ;;  %v3728_v38 = vmul.f32 1.442695, %v3719_v5 }
0x1463   :  { %5642 = vrcp.f32 %v3640_v7  ;;  %v3726_v44 = vmul.f32 1.442695, %v3718_v40 }
0x1464   :  { %v5637_v55 = vpop.eup %5636  ;;  %5644 = vpow2.f32 %v3724_v53 }
0x1465   :  { %v5639_v18 = vpop.eup %5638  ;;  %v3657_v19 = vmul.f32 1.0614054, %v5637_v55  ;;  %5646 = vpow2.f32 %v3722_v11 }
0x1466   :  { %v3656_v46 = vmul.f32 1.0614054, %v5639_v18  ;;  %5648 = vpow2.f32 %v3728_v38 }
0x1467   :  { %v3663_v10 = vadd.f32 -1.4531521, %v3657_v19  ;;  %5650 = vpow2.f32 %v3726_v44 }
0x1468   :  { %v3662_v37 = vadd.f32 -1.4531521, %v3656_v46 }
0x1469   :  { %v3669_v45 = vmul.f32 %v5637_v55, %v3663_v10 }
0x146a   :  { %v3668_v25 = vmul.f32 %v5639_v18, %v3662_v37 }
0x146b   :  { %v3675_v22 = vadd.f32 1.4214138, %v3669_v45 }
0x146c   :  { %v5641_v2 = vpop.eup %5640  ;;  %v3674_v41 = vadd.f32 1.4214138, %v3668_v25 }
0x146d   :  { %v5643_v29 = vpop.eup %5642  ;;  %v3681_v61 = vmul.f32 %v5637_v55, %v3675_v22  ;;  %v3659_v0 = vmul.f32 1.0614054, %v5641_v2 }
0x146e   :  { %v3680_v52 = vmul.f32 %v5639_v18, %v3674_v41  ;;  %v3658_v13 = vmul.f32 1.0614054, %v5643_v29  ;;  %v5645_v36 = vpop.eup %5644  ;;  %v3614_v41 = vmul.f32 0.5, %v6904_v16 }
0x146f   :  { %v3687_v51 = vadd.f32 -0.28449672, %v3681_v61  ;;  %v3665_v32 = vadd.f32 -1.4531521, %v3659_v0  ;;  %v5647_v20 = vpop.eup %5646  ;;  %v3615_v0 = vmul.f32 0.5, %v6901_v43  ;;  %v3617_v43 = vmul.f32 0.5, %v6915_v9 }
0x1470   :  { %v3686_v42 = vadd.f32 -0.28449672, %v3680_v52  ;;  %v3664_v14 = vadd.f32 -1.4531521, %v3658_v13  ;;  %v5649_v11 = vpop.eup %5648 }
0x1471   :  { %v3693_v33 = vmul.f32 %v5637_v55, %v3687_v51  ;;  %v3671_v21 = vmul.f32 %v5641_v2, %v3665_v32  ;;  %v5651_v5 = vpop.eup %5650 }
0x1472   :  { %v3692_v62 = vmul.f32 %v5639_v18, %v3686_v42  ;;  %v3670_v48 = vmul.f32 %v5643_v29, %v3664_v14  ;;  %v3616_v42 = vmul.f32 0.5, %v6918_v8 }
0x1473   :  { %v3699_v6 = vadd.f32 0.2548296, %v3693_v33  ;;  %v3677_v1 = vadd.f32 1.4214138, %v3671_v21 }
0x1474   :  { %v3698_v27 = vadd.f32 0.2548296, %v3692_v62  ;;  %v3676_v4 = vadd.f32 1.4214138, %v3670_v48 }
0x1475   :  { %v3705_v58 = vmul.f32 %v5637_v55, %v3699_v6  ;;  %v3683_v63 = vmul.f32 %v5641_v2, %v3677_v1 }
0x1476   :  { %v3704_v49 = vmul.f32 %v5639_v18, %v3698_v27  ;;  %v3682_v15 = vmul.f32 %v5643_v29, %v3676_v4 }
0x1477   :  { %v3735_v54 = vmul.f32 %v5645_v36, %v3705_v58  ;;  %v3689_v39 = vadd.f32 -0.28449672, %v3683_v63 }
0x1478   :  { %v3734_v7 = vmul.f32 %v5647_v20, %v3704_v49  ;;  %v3688_v50 = vadd.f32 -0.28449672, %v3682_v15 }
0x1479   :  { %v3741_v19 = vsub.f32 1.0, %v3735_v54  ;;  %v3695_v60 = vmul.f32 %v5641_v2, %v3689_v39 }
0x147a   :  { %v3740_v46 = vsub.f32 1.0, %v3734_v7  ;;  %v3694_v10 = vmul.f32 %v5643_v29, %v3688_v50 }
0x147b   :  { %v3753_v53 = vsub.f32 0.0, %v3741_v19  ;;  %v3701_v34 = vadd.f32 0.2548296, %v3695_v60 }
0x147c   :  { %v3752_v37 = vsub.f32 0.0, %v3740_v46  ;;  %v3700_v55 = vadd.f32 0.2548296, %v3694_v10 }
0x147d   :  { %v3759_v45 = vsel %vm3747_vm13, %v3753_v53, %v3741_v19  ;;  %v3707_v18 = vmul.f32 %v5641_v2, %v3701_v34 }
0x147e   :  { %v3765_v35 = vadd.f32 1.0, %v3759_v45  ;;  %v3758_v25 = vsel %vm3746_vm14, %v3752_v37, %v3740_v46  ;;  %v3706_v22 = vmul.f32 %v5643_v29, %v3700_v55 }
0x147f   :  { %v3764_v61 = vadd.f32 1.0, %v3758_v25  ;;  %v3737_v40 = vmul.f32 %v5649_v11, %v3707_v18 }
0x1480   :  { %v3736_v52 = vmul.f32 %v5651_v5, %v3706_v22  ;;  %v3771_v51 = vmul.f32 %v3765_v35, %v3615_v0 }
0x1481   :  { %v3770_v13 = vmul.f32 %v3764_v61, %v3614_v41  ;;  %v3743_v47 = vsub.f32 1.0, %v3737_v40 }
0x1482   :  { %v3742_v32 = vsub.f32 1.0, %v3736_v52 }
0x1483   :  { %5056 = vmatprep.mubr.f32.mxu0 %v3770_v13  ;;  %v3755_v38 = vsub.f32 0.0, %v3743_v47 }
0x1484   :  { %5057 = vmatmul.mubr.f32.vlgmr.msra.gmra.mrb[74].mxu0 %v3771_v51  ;;  %v3754_v56 = vsub.f32 0.0, %v3742_v32 }
0x1485   :  { %v3761_v2 = vsel %vm3749_vm15, %v3755_v38, %v3743_v47 }
0x1486   :  { %v3760_v29 = vsel %vm3748_vm3, %v3754_v56, %v3742_v32  ;;  %v3767_v16 = vadd.f32 1.0, %v3761_v2 }
0x1487   :  { %v3766_v14 = vadd.f32 1.0, %v3760_v29 }
0x1488   :  { %v3773_v44 = vmul.f32 %v3767_v16, %v3617_v43 }
0x1489   :  { %v3772_v33 = vmul.f32 %v3766_v14, %v3616_v42 }
0x148b   :  { %5059 = vmatprep.mubr.f32.mxu0 %v3772_v33  ;;  %v5047_v21 = vpop.f32.mrb[68].mxu1  ;;  %v3887_v33 = vld [vmem:[%s7062_s1] sm:$0xff] }
0x148c   :  { %v3611_v62 = vadd.f32 %v5047_v21, %v6898_v31  ;;  %5060 = vmatmul.mubr.f32.gmra.mrb[76].mxu0 %v3773_v44  ;;  %v3605_v3 = vpop.f32.mrb[69].mxu1  ;;  %5077 = vmatprep.mubr.msk.f32.mxu1 %vm81_vm0, %v3887_v33  ;;  %v4430_v44 = vld [vmem:[%s7064_s3 + $0xf] ss:$0 sm:$0xff] }
0x148d   :  { %v3606_v48 = vadd.f32 %v6898_v31, %v3605_v3 }
0x148e   :  { %v3625_v6 = vmul.f32 0.70710677, %v3611_v62  ;;  %v3619_v42 = vmul.f32 0.5, %v3611_v62 }
0x148f   :  { %v3624_v26 = vmul.f32 0.70710677, %v3606_v48  ;;  %v3618_v29 = vmul.f32 0.5, %v3606_v48 }
0x1490   :  { %v3631_v1 = vand.u32 2147483647, %v3625_v6  ;;  %vm3751_vm4 = vcmp.lt.f32.partialorder %v3625_v6, 0.0 }
0x1491   :  { %v3630_v27 = vand.u32 2147483647, %v3624_v26  ;;  %vm3750_vm5 = vcmp.lt.f32.partialorder %v3624_v26, 0.0 }
0x1492   :  { %v3637_v4 = vmul.f32 0.3275911, %v3631_v1  ;;  %v3715_v9 = vsub.f32 0.0, %v3631_v1 }
0x1493   :  { %v3636_v58 = vmul.f32 0.3275911, %v3630_v27  ;;  %v3714_v36 = vsub.f32 0.0, %v3630_v27 }
0x1494   :  { %v3643_v8 = vadd.f32 1.0, %v3637_v4  ;;  %v3721_v15 = vmul.f32 %v3715_v9, %v3631_v1 }
0x1495   :  { %v3642_v63 = vadd.f32 1.0, %v3636_v58  ;;  %v3720_v54 = vmul.f32 %v3714_v36, %v3630_v27 }
0x1496   :  { %5652 = vrcp.f32 %v3643_v8  ;;  %v3732_v31 = vmul.f32 1.442695, %v3721_v15 }
0x1497   :  { %5654 = vrcp.f32 %v3642_v63  ;;  %v3730_v60 = vmul.f32 1.442695, %v3720_v54 }
0x1498   :  { %5656 = vpow2.f32 %v3732_v31 }
0x1499   :  { %5658 = vpow2.f32 %v3730_v60 }
0x14a0   :  { %v5653_v49 = vpop.eup %5652 }
0x14a1   :  { %v5655_v20 = vpop.eup %5654  ;;  %v3661_v39 = vmul.f32 1.0614054, %v5653_v49 }
0x14a2   :  { %v3660_v7 = vmul.f32 1.0614054, %v5655_v20  ;;  %v5657_v41 = vpop.eup %5656 }
0x14a3   :  { %v3667_v50 = vadd.f32 -1.4531521, %v3661_v39  ;;  %v5659_v40 = vpop.eup %5658 }
0x14a4   :  { %v3666_v19 = vadd.f32 -1.4531521, %v3660_v7 }
0x14a5   :  { %v3673_v46 = vmul.f32 %v5653_v49, %v3667_v50 }
0x14a6   :  { %v3672_v10 = vmul.f32 %v5655_v20, %v3666_v19 }
0x14a7   :  { %v3679_v53 = vadd.f32 1.4214138, %v3673_v46 }
0x14a8   :  { %v3678_v34 = vadd.f32 1.4214138, %v3672_v10 }
0x14a9   :  { %v3685_v37 = vmul.f32 %v5653_v49, %v3679_v53 }
0x14aa   :  { %v3684_v55 = vmul.f32 %v5655_v20, %v3678_v34  ;;  %v4005_v34 = vld [vmem:[%s7065_s4] sm:$0xff] }
0x14ab   :  { %v3691_v45 = vadd.f32 -0.28449672, %v3685_v37  ;;  %v4006_v37 = vld [vmem:[%s7065_s4 + $0x8] sm:$0xff] }
0x14ac   :  { %v3690_v18 = vadd.f32 -0.28449672, %v3684_v55  ;;  %v4007_v55 = vld [vmem:[%s7065_s4 + $0x10] sm:$0xff] }
0x14ad   :  { %v3697_v11 = vmul.f32 %v5653_v49, %v3691_v45  ;;  %v5282_v45 = vpack.c.bf16 %v4006_v37, %v4005_v34 }
0x14ae   :  { %v3696_v35 = vmul.f32 %v5655_v20, %v3690_v18  ;;  %v4008_v18 = vld [vmem:[%s7065_s4 + $0x18] sm:$0xff] }
0x14af   :  { %v3703_v25 = vadd.f32 0.2548296, %v3697_v11  ;;  %v5285_v11 = vpack.c.bf16 %v4008_v18, %v4007_v55 }
0x14b0   :  { %v3702_v22 = vadd.f32 0.2548296, %v3696_v35  ;;  %v4009_v35 = vld [vmem:[%s7065_s4 + $0x20] sm:$0xff] }
0x14b1   :  { %v3709_v5 = vmul.f32 %v5653_v49, %v3703_v25  ;;  %v4010_v25 = vld [vmem:[%s7065_s4 + $0x28] sm:$0xff] }
0x14b2   :  { %v3708_v61 = vmul.f32 %v5655_v20, %v3702_v22  ;;  %v5288_v22 = vpack.c.bf16 %v4010_v25, %v4009_v35 }
0x14b3   :  { %v3739_v0 = vmul.f32 %v5657_v41, %v3709_v5 }
0x14b4   :  { %v3738_v52 = vmul.f32 %v5659_v40, %v3708_v61 }
0x14b5   :  { %v3745_v13 = vsub.f32 1.0, %v3739_v0  ;;  %v4011_v0 = vld [vmem:[%s7065_s4 + $0x30] sm:$0xff] }
0x14b6   :  { %v3744_v47 = vsub.f32 1.0, %v3738_v52  ;;  %v4012_v52 = vld [vmem:[%s7065_s4 + $0x38] sm:$0xff] }
0x14b7   :  { %v3757_v51 = vsub.f32 0.0, %v3745_v13 }
0x14b8   :  { %v3756_v32 = vsub.f32 0.0, %v3744_v47 }
0x14b9   :  { %v3763_v38 = vsel %vm3751_vm4, %v3757_v51, %v3745_v13  ;;  %v5291_v13 = vpack.c.bf16 %v4012_v52, %v4011_v0  ;;  %v4014_v51 = vld [vmem:[%s7065_s4 + $0x48] sm:$0xff] }
0x14ba   :  { %v3762_v56 = vsel %vm3750_vm5, %v3756_v32, %v3744_v47  ;;  %v3769_v2 = vadd.f32 1.0, %v3763_v38  ;;  %v4013_v47 = vld [vmem:[%s7065_s4 + $0x40] sm:$0xff]  ;;  %v4015_v38 = vld [vmem:[%s7065_s4 + $0x50] sm:$0xff] }
0x14bb   :  { %v3768_v16 = vadd.f32 1.0, %v3762_v56  ;;  %v5294_v32 = vpack.c.bf16 %v4014_v51, %v4013_v47  ;;  %v4016_v56 = vld [vmem:[%s7065_s4 + $0x58] sm:$0xff] }
0x14bc   :  { %v3775_v43 = vmul.f32 %v3769_v2, %v3619_v42  ;;  %v5297_v2 = vpack.c.bf16 %v4016_v56, %v4015_v38 }
0x14bd   :  { %v3774_v14 = vmul.f32 %v3768_v16, %v3618_v29  ;;  %v4017_v29 = vld [vmem:[%s7065_s4 + $0x60] sm:$0xff]  ;;  %v4018_v16 = vld [vmem:[%s7065_s4 + $0x68] sm:$0xff] }
0x14be   :  { %v5300_v42 = vpack.c.bf16 %v4018_v16, %v4017_v29  ;;  %v4442_v29 = vld [vmem:[%s7064_s3 + $0x13] ss:$0 sm:$0xff] }
0x14bf   :  { %5062 = vmatprep.mubr.f32.mxu0 %v3774_v14  ;;  %v4019_v14 = vld [vmem:[%s7065_s4 + $0x70] sm:$0xff] }
0x14c0   :  { %5063 = vmatmul.mubr.f32.gmra.mrb[78].mxu0 %v3775_v43  ;;  %v4020_v43 = vld [vmem:[%s7065_s4 + $0x78] sm:$0xff] }
0x14c1   :  { %5134 = vmatprep.mubr.msk.f32.mxu0 %vm5694_vm2, %v5695_v24  ;;  %v5303_v33 = vpack.c.bf16 %v4020_v43, %v4019_v14 }
0x1557   :  { %v5058_v21 = vpop.f32.mrb[74].mxu0 }
0x1558   :  { %v3872_v62 = vadd.f32 %v5058_v21, %v6818_v23  ;;  %v3842_v3 = vpop.f32.mrb[75].mxu0  ;;  %v5453_v21 = vpack.i.bf16 %v4008_v18, %v4007_v55 }
0x1559   :  { %v3871_v48 = vadd.f32 %v3842_v3, %v6820_v59  ;;  %v5463_v3 = vpack.i.bf16 %v4012_v52, %v4011_v0 }
0x155a   :  { %v3882_v6 = vadd.f32 %v4430_v44, %v3872_v62  ;;  %v5458_v62 = vpack.i.bf16 %v4010_v25, %v4009_v35 }
0x155b   :  { %v3881_v26 = vadd.f32 %v4430_v44, %v3871_v48 }
0x155d   :  { %v5269_v1 = vpack.c.bf16 %v3882_v6, %v3881_v26 }
0x155f   :  { %v5061_v27 = vpop.f32.mrb[76].mxu0  ;;  %5270 = vmatprep.subr.bf16.mxu1 %v5269_v1 }
0x1560   :  { %v3874_v4 = vadd.f32 %v5061_v27, %v6828_v30  ;;  %v3852_v58 = vpop.f32.mrb[77].mxu0  ;;  %5272 = vmatpush3.bf16.msra.mxu1 %v5269_v1  ;;  %v3888_v30 = vld [vmem:[%s7062_s1 + $0x8] sm:$0xff]  ;;  %v4439_v27 = vld [vmem:[%s7064_s3 + $0x10] ss:$0 sm:$0xff] }
0x1561   :  { %v3873_v8 = vadd.f32 %v3852_v58, %v6830_v17  ;;  %v3889_v17 = vld [vmem:[%s7062_s1 + $0x10] sm:$0xff] }
0x1562   :  { %v3884_v63 = vadd.f32 %v4430_v44, %v3874_v4  ;;  %v4440_v58 = vld [vmem:[%s7064_s3 + $0x11] ss:$0 sm:$0xff] }
0x1563   :  { %v3883_v9 = vadd.f32 %v4430_v44, %v3873_v8 }
0x1565   :  { %v5273_v36 = vpack.c.bf16 %v3884_v63, %v3883_v9 }
0x1567   :  { %5274 = vmatprep.subr.bf16.mxu1 %v5273_v36 }
0x1568   :  { %5276 = vmatpush3.bf16.msra.mxu1 %v5273_v36 }
0x1593   :  { %v5064_v23 = vpop.f32.mrb[78].mxu0 }
0x1594   :  { %v3876_v49 = vadd.f32 %v5064_v23, %v6838_v28  ;;  %v3862_v59 = vpop.f32.mrb[79].mxu0  ;;  %v3890_v28 = vld [vmem:[%s7062_s1 + $0x18] sm:$0xff] }
0x1595   :  { %v3875_v15 = vadd.f32 %v3862_v59, %v6840_v57 }
0x1596   :  { %v3886_v20 = vadd.f32 %v4430_v44, %v3876_v49 }
0x1597   :  { %v3885_v54 = vadd.f32 %v4430_v44, %v3875_v15  ;;  %v5448_v44 = vpack.i.bf16 %v4006_v37, %v4005_v34 }
0x1599   :  { %v5277_v39 = vpack.c.bf16 %v3886_v20, %v3885_v54 }
0x159b   :  { %5278 = vmatprep.subr.bf16.mxu1 %v5277_v39 }
0x159c   :  { %5280 = vmatpush3.bf16.msra.mxu1 %v5277_v39 }
0x159d   :  { %5281 = vmatprep.subr.bf16.mxu1 %v5692_v12 }
0x159f   :  { %5078 = vmatmul.mubr.msk.f32.vlgmr.msra.gmra.mrb[70].mxu1 %vm81_vm0, %v3888_v30 }
0x15a0   :  { %5080 = vmatprep.mubr.msk.f32.mxu1 %vm81_vm0, %v3889_v17  ;;  %5283 = vmatpush3.bf16.msra.mxu1 %v5282_v45 }
0x15a1   :  { %5284 = vmatprep.subr.bf16.mxu1 %v5692_v12 }
0x15a3   :  { %5081 = vmatmul.mubr.msk.f32.gmra.mrb[72].mxu1 %vm81_vm0, %v3890_v28 }
0x15a4   :  { %5115 = vmatprep.mubr.msk.f32.mxu1 %vm5694_vm2, %v5695_v24  ;;  %5286 = vmatpush3.bf16.msra.mxu1 %v5285_v11 }
0x15a5   :  { %5287 = vmatprep.subr.bf16.mxu1 %v5692_v12 }
0x15a8   :  { %5289 = vmatpush3.bf16.msra.mxu1 %v5288_v22 }
0x15a9   :  { %5290 = vmatprep.subr.bf16.mxu1 %v5692_v12 }
0x15ac   :  { %5292 = vmatpush3.bf16.msra.mxu1 %v5291_v13 }
0x15ad   :  { %5293 = vmatprep.subr.bf16.mxu1 %v5692_v12 }
0x15b0   :  { %5295 = vmatpush3.bf16.msra.mxu1 %v5294_v32 }
0x15b1   :  { %5296 = vmatprep.subr.bf16.mxu1 %v5692_v12 }
0x15b4   :  { %5298 = vmatpush3.bf16.msra.mxu1 %v5297_v2 }
0x15b5   :  { %5299 = vmatprep.subr.bf16.mxu1 %v5692_v12 }
0x15b8   :  { %5301 = vmatpush3.bf16.msra.mxu1 %v5300_v42 }
0x15b9   :  { %5302 = vmatprep.subr.bf16.mxu1 %v5692_v12 }
0x15bc   :  { %5304 = vmatpush3.bf16.msra.mxu1 %v5303_v33 }
0x1672   :  { %v5079_v57 = vpop.f32.mrb[70].mxu1 }
0x1673   :  { %3989 = vrot.lane.b32.xlu0 %v5079_v57, %s5699_s12  ;;  %v3969_v7 = vpop.f32.mrb[71].mxu1 }
0x1676   :  { %v5082_v50 = vpop.f32.mrb[72].mxu1 }
0x1677   :  { %v3979_v31 = vpop.f32.mrb[73].mxu1 }
0x1678   :  { %3993 = vrot.lane.b32.xlu1 %v3979_v31, %s5690_s30 }
0x167c   :  { %3997 = vrot.lane.b32.xlu1 %v5082_v50, %s5693_s8 }
0x16e5   :  { %v3990_v19 = vpop.permute.xlu0 %3989 }
0x16e6   :  { %v4000_v46 = vsel %vm213_vm1, %v3969_v7, %v3990_v19  ;;  %v4441_v19 = vld [vmem:[%s7064_s3 + $0x12] ss:$0 sm:$0xff] }
0x16ea   :  { %v3994_v60 = vpop.permute.xlu1 %3993 }
0x16eb   :  { %v4002_v10 = vsel %vm4001_vm6, %v4000_v46, %v3994_v60 }
0x16ee   :  { %v3998_v53 = vpop.permute.xlu1 %3997 }
0x16ef   :  { %v4004_v24 = vsel %vm4003_vm7, %v4002_v10, %v3998_v53 }
0x16f0   :  { %4034 = vadd.xlane.f32.xlu0 %v4004_v24 }
0x1706   :  { %5449 = vrot.lane.b32.xlu0 %v5448_v44, %s5690_s30 }
0x170a   :  { %5459 = vrot.lane.b32.xlu0 %v5458_v62, %s5690_s30 }
0x177d   :  { %v4035_v5 = vpop.xlane.xlu0 %4034 }
0x177e   :  { %v4037_v41 = vmul.f32 0.0078125, %v4035_v5 }
0x1780   :  { %v4038_v61 = vsub.f32 %v4004_v24, %v4037_v41 }
0x1781   :  { %v5450_v9 = vpop.permute.xlu0 %5449 }
0x1782   :  { %v4039_v40 = vmul.f32 %v4038_v61, %v4038_v61  ;;  %v5452_v36 = vunpack.i.h.bf16 %v5450_v9  ;;  %v5451_v23 = vunpack.i.l.bf16 %v5450_v9 }
0x1784   :  { %4040 = vadd.xlane.f32.xlu1 %v4039_v40  ;;  %v5306_v49 = vpack.c.bf16 %v5452_v36, %v5451_v23 }
0x1785   :  { %v5460_v39 = vpop.permute.xlu0 %5459 }
0x1786   :  { %5307 = vmatpush3.bf16.msra.mxu0 %v5306_v49  ;;  %v5462_v30 = vunpack.i.h.bf16 %v5460_v39  ;;  %v5461_v17 = vunpack.i.l.bf16 %v5460_v39 }
0x1787   :  { %5308 = vmatprep.subr.bf16.mxu0 %v5692_v12 }
0x1788   :  { %v5312_v28 = vpack.c.bf16 %v5462_v30, %v5461_v17 }
0x1795   :  { %5454 = vrot.lane.b32.xlu1 %v5453_v21, %s5690_s30 }
0x1799   :  { %5464 = vrot.lane.b32.xlu1 %v5463_v3, %s5690_s30 }
0x1811   :  { %v4041_v48 = vpop.xlane.xlu1 %4040 }
0x1812   :  { %v4042_v6 = vmul.f32 0.0078125, %v4041_v48 }
0x1814   :  { %v4043_v26 = vadd.f32 1e-05, %v4042_v6 }
0x1815   :  { %v5455_v59 = vpop.permute.xlu1 %5454 }
0x1816   :  { %5660 = vrsqrt.f32 %v4043_v26  ;;  %v5457_v15 = vunpack.i.h.bf16 %v5455_v59  ;;  %v5456_v20 = vunpack.i.l.bf16 %v5455_v59 }
0x1818   :  { %v5309_v54 = vpack.c.bf16 %v5457_v15, %v5456_v20 }
0x1819   :  { %v5465_v57 = vpop.permute.xlu1 %5464 }
0x181a   :  { %5310 = vmatpush3.bf16.msra.mxu0 %v5309_v54  ;;  %v5467_v7 = vunpack.i.h.bf16 %v5465_v57  ;;  %v5466_v50 = vunpack.i.l.bf16 %v5465_v57 }
0x181b   :  { %5311 = vmatprep.subr.bf16.mxu0 %v5692_v12 }
0x181c   :  { %v5315_v31 = vpack.c.bf16 %v5467_v7, %v5466_v50 }
0x181e   :  { %5313 = vmatpush3.bf16.msra.mxu0 %v5312_v28 }
0x181f   :  { %5314 = vmatprep.subr.bf16.mxu0 %v5692_v12 }
0x1820   :  { %v5661_v1 = vpop.eup %5660 }
0x1821   :  { %v4045_v4 = vmul.f32 %v5661_v1, %v4038_v61 }
0x1822   :  { %5316 = vmatpush3.bf16.msra.mxu0 %v5315_v31 }
0x1823   :  { %v4050_v8 = vmul.f32 %v4439_v27, %v4045_v4 }
0x1825   :  { %v4055_v63 = vadd.f32 %v4440_v58, %v4050_v8 }
0x1827   :  { %5116 = vmatmul.mubr.f32.vlgmr.msra.gmra.mrb[74].mxu1 %v4055_v63 }
0x18fa   :  { %v4126_v60 = vpop.f32.mrb[74].mxu1 }
0x18fb   :  { %v4127_v46 = vadd.f32 %v4441_v19, %v4126_v60  ;;  %v5117_v10 = vpop.f32.mrb[75].mxu1 }
0x18fd   :  { %v4131_v53 = vmul.f32 0.70710677, %v4127_v46  ;;  %v4130_v38 = vmul.f32 0.5, %v4127_v46 }
0x18ff   :  { %v4132_v24 = vand.u32 2147483647, %v4131_v53  ;;  %vm4152_vm0 = vcmp.lt.f32.partialorder %v4131_v53, 0.0 }
0x1901   :  { %v4133_v34 = vmul.f32 0.3275911, %v4132_v24  ;;  %v4146_v55 = vsub.f32 0.0, %v4132_v24 }
0x1903   :  { %v4134_v37 = vadd.f32 1.0, %v4133_v34  ;;  %v4147_v18 = vmul.f32 %v4146_v55, %v4132_v24 }
0x1905   :  { %5662 = vrcp.f32 %v4134_v37  ;;  %v4148_v12 = vmul.f32 1.442695, %v4147_v18 }
0x1907   :  { %5664 = vpow2.f32 %v4148_v12 }
0x190f   :  { %v5663_v45 = vpop.eup %5662 }
0x1910   :  { %v4137_v11 = vmul.f32 1.0614054, %v5663_v45 }
0x1911   :  { %v5665_v52 = vpop.eup %5664 }
0x1912   :  { %v4138_v35 = vadd.f32 -1.4531521, %v4137_v11 }
0x1914   :  { %v4139_v25 = vmul.f32 %v5663_v45, %v4138_v35 }
0x1916   :  { %v4140_v22 = vadd.f32 1.4214138, %v4139_v25 }
0x1918   :  { %v4141_v5 = vmul.f32 %v5663_v45, %v4140_v22 }
0x191a   :  { %v4142_v41 = vadd.f32 -0.28449672, %v4141_v5 }
0x191c   :  { %v4143_v61 = vmul.f32 %v5663_v45, %v4142_v41 }
0x191e   :  { %v4144_v40 = vadd.f32 0.2548296, %v4143_v61 }
0x1920   :  { %v4145_v0 = vmul.f32 %v5663_v45, %v4144_v40 }
0x1922   :  { %v4150_v13 = vmul.f32 %v5665_v52, %v4145_v0 }
0x1924   :  { %v4151_v47 = vsub.f32 1.0, %v4150_v13 }
0x1926   :  { %v4153_v51 = vsub.f32 0.0, %v4151_v47 }
0x1928   :  { %v4154_v32 = vsel %vm4152_vm0, %v4153_v51, %v4151_v47 }
0x1929   :  { %v4155_v56 = vadd.f32 1.0, %v4154_v32 }
0x192b   :  { %v4156_v2 = vmul.f32 %v4155_v56, %v4130_v38 }
0x192d   :  { %5135 = vmatmul.mubr.msk.f32.vlgmr.msra.gmra.mrb[80].mxu0 %vm4001_vm6, %v4156_v2 }
0x1a00   :  { %v4262_v16 = vpop.f32.mrb[80].mxu0 }
0x1a01   :  { %v4263_v42 = vadd.f32 %v4442_v29, %v4262_v16  ;;  %v5136_v14 = vpop.f32.mrb[81].mxu0 }
0x1a03   :  { %4266 = vst.msk [vmem:[#allocation2] sm:$0xff] %vm4001_vm6, %v4263_v42 }
0x1a04   :  { %5677 = shalt.err (!%p5674_p4)
}
0x1a05   :  { %s5678_s10 = scalar_lea.hbm %s7066_s5, 128 }
0x1a06   :  { %p5679_p5 = scmp.ne.s32.totalorder %s7066_s5, %s5678_s10  ;;  %p5682_p6 = scmp.lt.u32.totalorder %s5678_s10, %s7066_s5 }
0x1a08   :  { %p5684_p7 = pnand %p5682_p6, %p5679_p5 }
0x1a0a   :  { %5687 = shalt.err (!%p5684_p7)
}
0x1a0b   :  { %4276 = dma.vmem_to_hbm [thread:$0]  %s4274_s6, 128, %s7066_s5, [#allocation3]  }
0x1a0c   :  { %5688 = dma.done.wait [#allocation3], 128  }
0x1a0d   :  { %5689 = vsyncadd [#allocation3], 4294967168 }
0x1a0e   :  { %4280 = vsyncpa [#allocation3], 1 }

</bundles_post_ra>
